<compile_context>
chip_gen: v7x
topology: tpu7x:2x2x1
jax: 0.10.0
libtpu: 0.0.40
codegen_flags: <defaults>
</compile_context>

<pallas_src>
import jax
import jax.numpy as jnp
from jax import lax
from jax.scipy.linalg import block_diag
from jax.experimental import pallas as pl
from jax.experimental.pallas import tpu as pltpu

D_TEXT = 768
RNN_HID = 16
RNN_OUT = 16
FUSE_HID = 128
N_CLASS = 2
VOCAB = 64
TYPE_VOCAB = 2


def _vmem():
    return pl.BlockSpec(memory_space=pltpu.MemorySpace.VMEM)


def _smem():
    return pl.BlockSpec(memory_space=pltpu.MemorySpace.SMEM)


# ---------------------------------------------------------------------------
# Single fused kernel: text pool + 2x LSTM + 3x MMILB + SubNet + 3x CPC
# ---------------------------------------------------------------------------
def _mmim_fused_kernel(emb_ref, mask_ref, rnnx_ref, wih_ref, bih_ref,
                       whh_ref, wlin_ref, blin_ref,
                       wtext_ref, btext_ref, wva1_ref, bva1_ref,
                       wh2_ref, bh2_ref, wf2_ref, bf2_ref,
                       wcpc_ref, bcpc_ref,
                       preds_ref, loss_ref):
    f32 = jnp.float32
    B = emb_ref.shape[0]
    H = RNN_HID
    Tv = rnnx_ref.shape[0] // B - 1          # rows = Tv*B (visual) + B (audio)

    # ---- text encoder: masked mean pooling over the sequence ----
    emb = emb_ref[...]                        # (B, S, 768) f32
    mask = mask_ref[...]                      # (B, S, 1)   f32
    summed = jnp.sum(emb * mask, axis=1)      # (B, 768)
    denom = jnp.sum(mask, axis=1)             # (B, 1)
    text_enc = summed * pl.reciprocal(denom + 1e-8, approx=True)

    # ---- both LSTM encoders: input projection hoisted & batched over T and modality ----
    # rnnx is bf16 ((Tv+1)*B, 768); wih is bf16 (768, 128) = [w_ih_visual | w_ih_audio]
    xproj = (jnp.dot(rnnx_ref[...], wih_ref[...], preferred_element_type=f32)
             + bih_ref[...])                  # ((Tv+1)*B, 128) f32

    def lstm_tail(gates_x, whh, wlin, blin, T):
        h = jnp.zeros((B, H), f32)
        c = jnp.zeros((B, H), f32)
        for t in range(T):                    # tiny static T -> fully unrolled
            g = gates_x[t * B:(t + 1) * B, :] + jnp.dot(h, whh, preferred_element_type=f32)
            i_g = jax.nn.sigmoid(g[:, 0:H])           # PyTorch LSTM gate order: i, f, g, o
            f_g = jax.nn.sigmoid(g[:, H:2 * H])
            g_g = jnp.tanh(g[:, 2 * H:3 * H])
            o_g = jax.nn.sigmoid(g[:, 3 * H:4 * H])
            c = f_g * c + i_g * g_g
            h = o_g * jnp.tanh(c)
        return jnp.dot(h, wlin, preferred_element_type=f32) + blin   # (B, 16)

    visual_enc = lstm_tail(xproj[0:Tv * B, 0:4 * H],
                           whh_ref[0], wlin_ref[0], blin_ref[0], Tv)
    audio_enc = lstm_tail(xproj[Tv * B:(Tv + 1) * B, 4 * H:8 * H],
                          whh_ref[1], wlin_ref[1], blin_ref[1], 1)

    # ---- every projection that consumes text_enc: one MXU push (B, 192) ----
    t_out = (jnp.dot(text_enc.astype(jnp.bfloat16), wtext_ref[...],
                     preferred_element_type=f32) + btext_ref[...])
    h_text = jnp.maximum(t_out[:, 0:4 * H], 0.0)     # [h_mu_tv | h_lv_tv | h_mu_ta | h_lv_ta]
    y1 = jnp.maximum(t_out[:, 4 * H:4 * H + FUSE_HID], 0.0)   # SubNet relu(linear_1)

    # ---- mi_va first layer (consumes visual_enc) ----
    va_out = jnp.dot(visual_enc, wva1_ref[...], preferred_element_type=f32) + bva1_ref[...]
    h_va = jnp.maximum(va_out, 0.0)                  # [h_mu_va | h_lv_va]

    # ---- all six mu/logvar heads as one block-diagonal matmul ----
    h_cat = jnp.concatenate([h_text, h_va], axis=-1)                       # (B, 96)
    mulv = jnp.dot(h_cat, wh2_ref[...], preferred_element_type=f32) + bh2_ref[...]

    def lld_term(mu, lv, y):
        # mean_b( sum_d( -(mu - y)^2 / 2 / exp(logvar) ) )  with exp(-lv) on the EUP
        return jnp.sum(-(mu - y) ** 2 * 0.5 * jnp.exp(-lv)) * (1.0 / B)

    lld = (lld_term(mulv[:, 0 * H:1 * H], mulv[:, 1 * H:2 * H], visual_enc)
           + lld_term(mulv[:, 2 * H:3 * H], mulv[:, 3 * H:4 * H], audio_enc)
           + lld_term(mulv[:, 4 * H:5 * H], mulv[:, 5 * H:6 * H], audio_enc))

    # ---- SubNet: fusion = relu(linear_2(y1)) ----
    fusion = jnp.maximum(jnp.dot(y1, wf2_ref[...], preferred_element_type=f32)
                         + bf2_ref[...], 0.0)        # (B, 128)

    # ---- preds + all three CPC predictors in one push: (B, 768+16+16+2) ----
    cpc_out = (jnp.dot(fusion.astype(jnp.bfloat16), wcpc_ref[...],
                       preferred_element_type=f32) + bcpc_ref[...])
    preds = cpc_out[:, 800:802]

    def nce_term(x, x_pred):
        xn = x * lax.rsqrt(jnp.sum(x * x, axis=-1, keepdims=True) + 1e-8)
        pn = x_pred * lax.rsqrt(jnp.sum(x_pred * x_pred, axis=-1, keepdims=True) + 1e-8)
        pos = jnp.sum(xn * pn, axis=-1, keepdims=True)                     # (B, 1)
        scores = lax.dot_general(xn, pn, (((1,), (1,)), ((), ())),
                                 preferred_element_type=f32)               # (B, B)
        m = jnp.max(scores, axis=-1, keepdims=True)
        neg = jnp.log(jnp.sum(jnp.exp(scores - m), axis=-1, keepdims=True)) + m
        return -jnp.sum(pos - neg) * (1.0 / B)

    nce = (nce_term(text_enc, cpc_out[:, 0:D_TEXT])
           + nce_term(visual_enc, cpc_out[:, D_TEXT:D_TEXT + RNN_OUT])
           + nce_term(audio_enc, cpc_out[:, D_TEXT + RNN_OUT:D_TEXT + 2 * RNN_OUT]))
    nce = jnp.where(jnp.isnan(nce), jnp.float32(0.0), nce)

    # ---- lane-dense outputs ----
    preds_ref[...] = jnp.concatenate(
        [preds, jnp.zeros((B, 128 - N_CLASS), f32)], axis=-1)              # (B, 128) slab
    loss_ref[0, 0] = lld
    loss_ref[0, 1] = nce


# ---------------------------------------------------------------------------
# Parameter packing: concat / block-diag co-consumed weights once, up front
# ---------------------------------------------------------------------------
def pack_params(p):
    tv, ta, va = p["mi_tv"], p["mi_ta"], p["mi_va"]
    fp = p["fusion_prj"]
    ve, ae = p["visual_encoder"], p["acoustic_encoder"]

    w_text = jnp.concatenate([tv["w_mu1"], tv["w_lv1"], ta["w_mu1"], ta["w_lv1"], fp["w1"]], 1)
    b_text = jnp.concatenate([tv["b_mu1"], tv["b_lv1"], ta["b_mu1"], ta["b_lv1"], fp["b1"]], 1)
    w_va1 = jnp.concatenate([va["w_mu1"], va["w_lv1"]], 1)
    b_va1 = jnp.concatenate([va["b_mu1"], va["b_lv1"]], 1)
    w_h2 = block_diag(tv["w_mu2"], tv["w_lv2"], ta["w_mu2"], ta["w_lv2"], va["w_mu2"], va["w_lv2"])
    b_h2 = jnp.concatenate([tv["b_mu2"], tv["b_lv2"], ta["b_mu2"], ta["b_lv2"],
                            va["b_mu2"], va["b_lv2"]], 1)
    w_cpc = jnp.concatenate([p["cpc_zt"]["w"], p["cpc_zv"]["w"], p["cpc_za"]["w"], fp["w3"]], 1)
    b_cpc = jnp.concatenate([p["cpc_zt"]["b"], p["cpc_zv"]["b"], p["cpc_za"]["b"], fp["b3"]], 1)

    return {
        "word_emb": p["word_emb"], "type_emb": p["type_emb"],
        "w_ih": jnp.concatenate([ve["w_ih"], ae["w_ih"]], 1).astype(jnp.bfloat16),  # (768,128)
        "b_ih": jnp.concatenate([ve["b"], ae["b"]], 1),                             # (1,128)
        "w_hh": jnp.stack([ve["w_hh"], ae["w_hh"]], 0),                             # (2,16,64)
        "w_lin": jnp.stack([ve["w_lin"], ae["w_lin"]], 0),                          # (2,16,16)
        "b_lin": jnp.stack([ve["b_lin"], ae["b_lin"]], 0),                          # (2,1,16)
        "w_text": w_text.astype(jnp.bfloat16), "b_text": b_text,                    # (768,192)
        "w_va1": w_va1, "b_va1": b_va1,                                             # (16,32)
        "w_h2": w_h2, "b_h2": b_h2,                                                 # (96,96)
        "w_f2": fp["w2"], "b_f2": fp["b2"],                                         # (128,128)
        "w_cpc": w_cpc.astype(jnp.bfloat16), "b_cpc": b_cpc,                        # (128,802)
    }


# ---------------------------------------------------------------------------
# Forward
# ---------------------------------------------------------------------------
@jax.jit
def _mmim_forward_impl(packed, bert_sent, bert_sent_type, bert_sent_mask, visual, audio):
    # TODO(synk): BERT stand-in — deterministic word + token-type embedding; the
    # masked mean pooling itself runs inside the fused kernel.
    emb = (jnp.take(packed["word_emb"], bert_sent, axis=0)
           + jnp.take(packed["type_emb"], bert_sent_type, axis=0)).astype(jnp.float32)
    mask3 = bert_sent_mask.astype(jnp.float32)[:, :, None]          # (B, S, 1)

    B, S, D = emb.shape
    Tv = visual.shape[1]
    vis_tm = jnp.transpose(visual, (1, 0, 2)).reshape(Tv * B, D)    # time-major rows
    rnn_x = jnp.concatenate([vis_tm, audio], axis=0).astype(jnp.bfloat16)  # ((Tv+1)*B, 768)

    preds_slab, losses = pl.pallas_call(
        _mmim_fused_kernel,
        out_shape=(jax.ShapeDtypeStruct((B, 128), jnp.float32),     # lane-dense preds slab
                   jax.ShapeDtypeStruct((1, 2), jnp.float32)),      # [lld, nce]
        in_specs=[_vmem()] * 18,
        out_specs=(_vmem(), _smem()),
    )(emb, mask3, rnn_x,
      packed["w_ih"], packed["b_ih"], packed["w_hh"], packed["w_lin"], packed["b_lin"],
      packed["w_text"], packed["b_text"], packed["w_va1"], packed["b_va1"],
      packed["w_h2"], packed["b_h2"], packed["w_f2"], packed["b_f2"],
      packed["w_cpc"], packed["b_cpc"])

    preds = preds_slab[:, :N_CLASS]
    lld = losses[0, 0]
    nce = losses[0, 1]
    pn_none = {"pos": None, "neg": None}
    pn_dic = {"hate_tv": pn_none, "hate_ta": pn_none, "hate_va": pn_none}
    H = jnp.zeros((), jnp.float32)
    return lld, nce, preds, pn_dic, H


def mmim_forward(packed, is_train, bert_sent, bert_sent_type, bert_sent_mask,
                 visual, audio, y=None, mem=None):
    # y=None, mem=None => MMILB contributes only lld; H == 0.0 (as in the reference).
    return _mmim_forward_impl(packed, bert_sent, bert_sent_type, bert_sent_mask,
                              visual, audio)


# ---------------------------------------------------------------------------
# Parameter initialization (deterministic, synthetic)
# ---------------------------------------------------------------------------
def init_params(key):
    keys = iter(jax.random.split(key, 64))

    def lin(in_d, out_d):
        w = jax.random.normal(next(keys), (in_d, out_d), jnp.float32) / jnp.sqrt(in_d)
        b = jax.random.normal(next(keys), (1, out_d), jnp.float32) * 0.01
        return w, b

    params = {
        "word_emb": jax.random.normal(next(keys), (VOCAB, D_TEXT), jnp.float32) * 0.02,
        "type_emb": jax.random.normal(next(keys), (TYPE_VOCAB, D_TEXT), jnp.float32) * 0.02,
    }

    def rnn_p(in_d, hid, out_d):
        w_ih, _ = lin(in_d, 4 * hid)
        w_hh, _ = lin(hid, 4 * hid)
        b = jax.random.normal(next(keys), (1, 4 * hid), jnp.float32) * 0.01
        w_lin, b_lin = lin(hid, out_d)
        return {"w_ih": w_ih, "w_hh": w_hh, "b": b, "w_lin": w_lin, "b_lin": b_lin}

    params["visual_encoder"] = rnn_p(D_TEXT, RNN_HID, RNN_OUT)
    params["acoustic_encoder"] = rnn_p(D_TEXT, RNN_HID, RNN_OUT)

    def mmilb_p(xs, ys):
        w_mu1, b_mu1 = lin(xs, ys)
        w_mu2, b_mu2 = lin(ys, ys)
        w_lv1, b_lv1 = lin(xs, ys)
        w_lv2, b_lv2 = lin(ys, ys)
        return {"w_mu1": w_mu1, "b_mu1": b_mu1, "w_mu2": w_mu2, "b_mu2": b_mu2,
                "w_lv1": w_lv1, "b_lv1": b_lv1, "w_lv2": w_lv2, "b_lv2": b_lv2}

    params["mi_tv"] = mmilb_p(D_TEXT, RNN_OUT)
    params["mi_ta"] = mmilb_p(D_TEXT, RNN_OUT)
    params["mi_va"] = mmilb_p(RNN_OUT, RNN_OUT)

    def cpc_p(xs, ys):
        w, b = lin(ys, xs)        # nn.Linear(y_size, x_size) stored as (in, out)
        return {"w": w, "b": b}

    params["cpc_zt"] = cpc_p(D_TEXT, FUSE_HID)
    params["cpc_zv"] = cpc_p(RNN_OUT, FUSE_HID)
    params["cpc_za"] = cpc_p(RNN_OUT, FUSE_HID)

    w1, b1 = lin(D_TEXT, FUSE_HID)
    w2, b2 = lin(FUSE_HID, FUSE_HID)
    w3, b3 = lin(FUSE_HID, N_CLASS)
    params["fusion_prj"] = {"w1": w1, "b1": b1, "w2": w2, "b2": b2, "w3": w3, "b3": b3}
    return params


if __name__ == "__main__":
    key = jax.random.PRNGKey(0)
    pkey, k1, k2, k3 = jax.random.split(key, 4)
    params = init_params(pkey)
    packed = pack_params(params)

    B, S, VS = 2, 8, 4
    bert_sent = jax.random.randint(k1, (B, S), 0, VOCAB, dtype=jnp.int32)
    bert_sent_type = jnp.zeros((B, S), jnp.int32)
    lengths = jnp.array([8, 5])
    bert_sent_mask = (jnp.arange(S)[None, :] < lengths[:, None]).astype(jnp.float32)
    visual = jax.random.normal(k2, (B, VS, D_TEXT), jnp.float32)
    audio = jax.random.normal(k3, (B, D_TEXT), jnp.float32)

    lld, nce, preds, pn_dic, H = mmim_forward(
        packed, False, bert_sent, bert_sent_type, bert_sent_mask, visual, audio)
    jax.block_until_ready((lld, nce, preds))
    print("KERNEL_OK")
</pallas_src>

<mosaic_0001>
module attributes {stable_mosaic.version = 11 : i64} {
  func.func @_mmim_fused_kernel(%arg0: memref<2x8x768xf32, #tpu.memory_space<vmem>>, %arg1: memref<2x8x1xf32, #tpu.memory_space<vmem>>, %arg2: memref<10x768xbf16, #tpu.memory_space<vmem>>, %arg3: memref<768x128xbf16, #tpu.memory_space<vmem>>, %arg4: memref<1x128xf32, #tpu.memory_space<vmem>>, %arg5: memref<2x16x64xf32, #tpu.memory_space<vmem>>, %arg6: memref<2x16x16xf32, #tpu.memory_space<vmem>>, %arg7: memref<2x1x16xf32, #tpu.memory_space<vmem>>, %arg8: memref<768x192xbf16, #tpu.memory_space<vmem>>, %arg9: memref<1x192xf32, #tpu.memory_space<vmem>>, %arg10: memref<16x32xf32, #tpu.memory_space<vmem>>, %arg11: memref<1x32xf32, #tpu.memory_space<vmem>>, %arg12: memref<96x96xf32, #tpu.memory_space<vmem>>, %arg13: memref<1x96xf32, #tpu.memory_space<vmem>>, %arg14: memref<128x128xf32, #tpu.memory_space<vmem>>, %arg15: memref<1x128xf32, #tpu.memory_space<vmem>>, %arg16: memref<128x802xbf16, #tpu.memory_space<vmem>>, %arg17: memref<1x802xf32, #tpu.memory_space<vmem>>, %arg18: memref<2x128xf32, #tpu.memory_space<vmem>>, %arg19: memref<1x2xf32, #tpu.memory_space<smem>>) attributes {dimension_semantics = [], scalar_prefetch = 0 : i64, scratch_operands = 0 : i64, tpu.core_type = #tpu.core_type<tc>} {
    %c0 = arith.constant 0 : index
    %c0_0 = arith.constant 0 : index
    %c0_1 = arith.constant 0 : index
    %0 = vector.load %arg0[%c0, %c0_0, %c0_1] : memref<2x8x768xf32, #tpu.memory_space<vmem>>, vector<2x8x768xf32>
    %c0_2 = arith.constant 0 : index
    %c0_3 = arith.constant 0 : index
    %c0_4 = arith.constant 0 : index
    %1 = vector.load %arg1[%c0_2, %c0_3, %c0_4] : memref<2x8x1xf32, #tpu.memory_space<vmem>>, vector<2x8x1xf32>
    %2 = vector.broadcast %1 : vector<2x8x1xf32> to vector<2x8x768xf32>
    %3 = arith.mulf %0, %2 : vector<2x8x768xf32>
    %cst = arith.constant dense<0.000000e+00> : vector<2x768xf32>
    %4 = vector.multi_reduction <add>, %3, %cst [1] : vector<2x8x768xf32> to vector<2x768xf32>
    %cst_5 = arith.constant dense<0.000000e+00> : vector<2x1xf32>
    %5 = vector.multi_reduction <add>, %1, %cst_5 [1] : vector<2x8x1xf32> to vector<2x1xf32>
    %cst_6 = arith.constant 9.99999993E-9 : f32
    %6 = vector.broadcast %cst_6 : f32 to vector<2x1xf32>
    %7 = arith.addf %5, %6 : vector<2x1xf32>
    %8 = tpu.reciprocal %7 {approx = true} : vector<2x1xf32> -> vector<2x1xf32>
    %9 = vector.broadcast %8 : vector<2x1xf32> to vector<2x768xf32>
    %10 = arith.mulf %4, %9 : vector<2x768xf32>
    %c0_7 = arith.constant 0 : index
    %c0_8 = arith.constant 0 : index
    %11 = vector.load %arg2[%c0_7, %c0_8] : memref<10x768xbf16, #tpu.memory_space<vmem>>, vector<10x768xbf16>
    %c0_9 = arith.constant 0 : index
    %c0_10 = arith.constant 0 : index
    %12 = vector.load %arg3[%c0_9, %c0_10] : memref<768x128xbf16, #tpu.memory_space<vmem>>, vector<768x128xbf16>
    %cst_11 = arith.constant dense<0.000000e+00> : vector<10x128xf32>
    %13 = tpu.matmul %11, %12, %cst_11 {dimension_numbers = #tpu.dot_dimension_numbers<[1], [0], [0], [1], [0, 0, 1, 1], [], []>} : vector<10x768xbf16>, vector<768x128xbf16>, vector<10x128xf32> -> vector<10x128xf32>
    %c0_12 = arith.constant 0 : index
    %c0_13 = arith.constant 0 : index
    %14 = vector.load %arg4[%c0_12, %c0_13] : memref<1x128xf32, #tpu.memory_space<vmem>>, vector<1x128xf32>
    %15 = vector.broadcast %14 : vector<1x128xf32> to vector<10x128xf32>
    %16 = arith.addf %13, %15 : vector<10x128xf32>
    %17 = vector.extract_strided_slice %16 {offsets = [0, 0], sizes = [8, 64], strides = [1, 1]} : vector<10x128xf32> to vector<8x64xf32>
    %c0_14 = arith.constant 0 : index
    %c0_15 = arith.constant 0 : index
    %c0_16 = arith.constant 0 : index
    %18 = vector.load %arg5[%c0_14, %c0_15, %c0_16] : memref<2x16x64xf32, #tpu.memory_space<vmem>>, vector<1x16x64xf32>
    %19 = vector.shape_cast %18 : vector<1x16x64xf32> to vector<16x64xf32>
    %c0_17 = arith.constant 0 : index
    %c0_18 = arith.constant 0 : index
    %c0_19 = arith.constant 0 : index
    %20 = vector.load %arg6[%c0_17, %c0_18, %c0_19] : memref<2x16x16xf32, #tpu.memory_space<vmem>>, vector<1x16x16xf32>
    %21 = vector.shape_cast %20 : vector<1x16x16xf32> to vector<16x16xf32>
    %c0_20 = arith.constant 0 : index
    %c0_21 = arith.constant 0 : index
    %c0_22 = arith.constant 0 : index
    %22 = vector.load %arg7[%c0_20, %c0_21, %c0_22] : memref<2x1x16xf32, #tpu.memory_space<vmem>>, vector<1x1x16xf32>
    %23 = vector.shape_cast %22 : vector<1x1x16xf32> to vector<1x16xf32>
    %cst_23 = arith.constant 0.000000e+00 : f32
    %24 = vector.broadcast %cst_23 : f32 to vector<2x16xf32>
    %cst_24 = arith.constant 0.000000e+00 : f32
    %25 = vector.broadcast %cst_24 : f32 to vector<2x16xf32>
    %26 = vector.extract_strided_slice %17 {offsets = [0, 0], sizes = [2, 64], strides = [1, 1]} : vector<8x64xf32> to vector<2x64xf32>
    %cst_25 = arith.constant dense<0.000000e+00> : vector<2x64xf32>
    %27 = tpu.matmul %24, %19, %cst_25 {dimension_numbers = #tpu.dot_dimension_numbers<[1], [0], [0], [1], [0, 0, 1, 1], [], []>} : vector<2x16xf32>, vector<16x64xf32>, vector<2x64xf32> -> vector<2x64xf32>
    %28 = arith.addf %26, %27 : vector<2x64xf32>
    %29 = vector.extract_strided_slice %28 {offsets = [0, 0], sizes = [2, 16], strides = [1, 1]} : vector<2x64xf32> to vector<2x16xf32>
    %30 = arith.negf %29 : vector<2x16xf32>
    %31 = math.exp %30 : vector<2x16xf32>
    %cst_26 = arith.constant 1.000000e+00 : f32
    %32 = vector.broadcast %cst_26 : f32 to vector<2x16xf32>
    %33 = arith.addf %32, %31 : vector<2x16xf32>
    %34 = arith.divf %32, %33 : vector<2x16xf32>
    %35 = vector.extract_strided_slice %28 {offsets = [0, 16], sizes = [2, 16], strides = [1, 1]} : vector<2x64xf32> to vector<2x16xf32>
    %36 = arith.negf %35 : vector<2x16xf32>
    %37 = math.exp %36 : vector<2x16xf32>
    %cst_27 = arith.constant 1.000000e+00 : f32
    %38 = vector.broadcast %cst_27 : f32 to vector<2x16xf32>
    %39 = arith.addf %38, %37 : vector<2x16xf32>
    %40 = arith.divf %38, %39 : vector<2x16xf32>
    %41 = vector.extract_strided_slice %28 {offsets = [0, 32], sizes = [2, 16], strides = [1, 1]} : vector<2x64xf32> to vector<2x16xf32>
    %42 = math.tanh %41 : vector<2x16xf32>
    %43 = vector.extract_strided_slice %28 {offsets = [0, 48], sizes = [2, 16], strides = [1, 1]} : vector<2x64xf32> to vector<2x16xf32>
    %44 = arith.negf %43 : vector<2x16xf32>
    %45 = math.exp %44 : vector<2x16xf32>
    %cst_28 = arith.constant 1.000000e+00 : f32
    %46 = vector.broadcast %cst_28 : f32 to vector<2x16xf32>
    %47 = arith.addf %46, %45 : vector<2x16xf32>
    %48 = arith.divf %46, %47 : vector<2x16xf32>
    %49 = arith.mulf %40, %25 : vector<2x16xf32>
    %50 = arith.mulf %34, %42 : vector<2x16xf32>
    %51 = arith.addf %49, %50 : vector<2x16xf32>
    %52 = math.tanh %51 : vector<2x16xf32>
    %53 = arith.mulf %48, %52 : vector<2x16xf32>
    %54 = vector.extract_strided_slice %17 {offsets = [2, 0], sizes = [2, 64], strides = [1, 1]} : vector<8x64xf32> to vector<2x64xf32>
    %cst_29 = arith.constant dense<0.000000e+00> : vector<2x64xf32>
    %55 = tpu.matmul %53, %19, %cst_29 {dimension_numbers = #tpu.dot_dimension_numbers<[1], [0], [0], [1], [0, 0, 1, 1], [], []>} : vector<2x16xf32>, vector<16x64xf32>, vector<2x64xf32> -> vector<2x64xf32>
    %56 = arith.addf %54, %55 : vector<2x64xf32>
    %57 = vector.extract_strided_slice %56 {offsets = [0, 0], sizes = [2, 16], strides = [1, 1]} : vector<2x64xf32> to vector<2x16xf32>
    %58 = arith.negf %57 : vector<2x16xf32>
    %59 = math.exp %58 : vector<2x16xf32>
    %cst_30 = arith.constant 1.000000e+00 : f32
    %60 = vector.broadcast %cst_30 : f32 to vector<2x16xf32>
    %61 = arith.addf %60, %59 : vector<2x16xf32>
    %62 = arith.divf %60, %61 : vector<2x16xf32>
    %63 = vector.extract_strided_slice %56 {offsets = [0, 16], sizes = [2, 16], strides = [1, 1]} : vector<2x64xf32> to vector<2x16xf32>
    %64 = arith.negf %63 : vector<2x16xf32>
    %65 = math.exp %64 : vector<2x16xf32>
    %cst_31 = arith.constant 1.000000e+00 : f32
    %66 = vector.broadcast %cst_31 : f32 to vector<2x16xf32>
    %67 = arith.addf %66, %65 : vector<2x16xf32>
    %68 = arith.divf %66, %67 : vector<2x16xf32>
    %69 = vector.extract_strided_slice %56 {offsets = [0, 32], sizes = [2, 16], strides = [1, 1]} : vector<2x64xf32> to vector<2x16xf32>
    %70 = math.tanh %69 : vector<2x16xf32>
    %71 = vector.extract_strided_slice %56 {offsets = [0, 48], sizes = [2, 16], strides = [1, 1]} : vector<2x64xf32> to vector<2x16xf32>
    %72 = arith.negf %71 : vector<2x16xf32>
    %73 = math.exp %72 : vector<2x16xf32>
    %cst_32 = arith.constant 1.000000e+00 : f32
    %74 = vector.broadcast %cst_32 : f32 to vector<2x16xf32>
    %75 = arith.addf %74, %73 : vector<2x16xf32>
    %76 = arith.divf %74, %75 : vector<2x16xf32>
    %77 = arith.mulf %68, %51 : vector<2x16xf32>
    %78 = arith.mulf %62, %70 : vector<2x16xf32>
    %79 = arith.addf %77, %78 : vector<2x16xf32>
    %80 = math.tanh %79 : vector<2x16xf32>
    %81 = arith.mulf %76, %80 : vector<2x16xf32>
    %82 = vector.extract_strided_slice %17 {offsets = [4, 0], sizes = [2, 64], strides = [1, 1]} : vector<8x64xf32> to vector<2x64xf32>
    %cst_33 = arith.constant dense<0.000000e+00> : vector<2x64xf32>
    %83 = tpu.matmul %81, %19, %cst_33 {dimension_numbers = #tpu.dot_dimension_numbers<[1], [0], [0], [1], [0, 0, 1, 1], [], []>} : vector<2x16xf32>, vector<16x64xf32>, vector<2x64xf32> -> vector<2x64xf32>
    %84 = arith.addf %82, %83 : vector<2x64xf32>
    %85 = vector.extract_strided_slice %84 {offsets = [0, 0], sizes = [2, 16], strides = [1, 1]} : vector<2x64xf32> to vector<2x16xf32>
    %86 = arith.negf %85 : vector<2x16xf32>
    %87 = math.exp %86 : vector<2x16xf32>
    %cst_34 = arith.constant 1.000000e+00 : f32
    %88 = vector.broadcast %cst_34 : f32 to vector<2x16xf32>
    %89 = arith.addf %88, %87 : vector<2x16xf32>
    %90 = arith.divf %88, %89 : vector<2x16xf32>
    %91 = vector.extract_strided_slice %84 {offsets = [0, 16], sizes = [2, 16], strides = [1, 1]} : vector<2x64xf32> to vector<2x16xf32>
    %92 = arith.negf %91 : vector<2x16xf32>
    %93 = math.exp %92 : vector<2x16xf32>
    %cst_35 = arith.constant 1.000000e+00 : f32
    %94 = vector.broadcast %cst_35 : f32 to vector<2x16xf32>
    %95 = arith.addf %94, %93 : vector<2x16xf32>
    %96 = arith.divf %94, %95 : vector<2x16xf32>
    %97 = vector.extract_strided_slice %84 {offsets = [0, 32], sizes = [2, 16], strides = [1, 1]} : vector<2x64xf32> to vector<2x16xf32>
    %98 = math.tanh %97 : vector<2x16xf32>
    %99 = vector.extract_strided_slice %84 {offsets = [0, 48], sizes = [2, 16], strides = [1, 1]} : vector<2x64xf32> to vector<2x16xf32>
    %100 = arith.negf %99 : vector<2x16xf32>
    %101 = math.exp %100 : vector<2x16xf32>
    %cst_36 = arith.constant 1.000000e+00 : f32
    %102 = vector.broadcast %cst_36 : f32 to vector<2x16xf32>
    %103 = arith.addf %102, %101 : vector<2x16xf32>
    %104 = arith.divf %102, %103 : vector<2x16xf32>
    %105 = arith.mulf %96, %79 : vector<2x16xf32>
    %106 = arith.mulf %90, %98 : vector<2x16xf32>
    %107 = arith.addf %105, %106 : vector<2x16xf32>
    %108 = math.tanh %107 : vector<2x16xf32>
    %109 = arith.mulf %104, %108 : vector<2x16xf32>
    %110 = vector.extract_strided_slice %17 {offsets = [6, 0], sizes = [2, 64], strides = [1, 1]} : vector<8x64xf32> to vector<2x64xf32>
    %cst_37 = arith.constant dense<0.000000e+00> : vector<2x64xf32>
    %111 = tpu.matmul %109, %19, %cst_37 {dimension_numbers = #tpu.dot_dimension_numbers<[1], [0], [0], [1], [0, 0, 1, 1], [], []>} : vector<2x16xf32>, vector<16x64xf32>, vector<2x64xf32> -> vector<2x64xf32>
    %112 = arith.addf %110, %111 : vector<2x64xf32>
    %113 = vector.extract_strided_slice %112 {offsets = [0, 0], sizes = [2, 16], strides = [1, 1]} : vector<2x64xf32> to vector<2x16xf32>
    %114 = arith.negf %113 : vector<2x16xf32>
    %115 = math.exp %114 : vector<2x16xf32>
    %cst_38 = arith.constant 1.000000e+00 : f32
    %116 = vector.broadcast %cst_38 : f32 to vector<2x16xf32>
    %117 = arith.addf %116, %115 : vector<2x16xf32>
    %118 = arith.divf %116, %117 : vector<2x16xf32>
    %119 = vector.extract_strided_slice %112 {offsets = [0, 16], sizes = [2, 16], strides = [1, 1]} : vector<2x64xf32> to vector<2x16xf32>
    %120 = arith.negf %119 : vector<2x16xf32>
    %121 = math.exp %120 : vector<2x16xf32>
    %cst_39 = arith.constant 1.000000e+00 : f32
    %122 = vector.broadcast %cst_39 : f32 to vector<2x16xf32>
    %123 = arith.addf %122, %121 : vector<2x16xf32>
    %124 = arith.divf %122, %123 : vector<2x16xf32>
    %125 = vector.extract_strided_slice %112 {offsets = [0, 32], sizes = [2, 16], strides = [1, 1]} : vector<2x64xf32> to vector<2x16xf32>
    %126 = math.tanh %125 : vector<2x16xf32>
    %127 = vector.extract_strided_slice %112 {offsets = [0, 48], sizes = [2, 16], strides = [1, 1]} : vector<2x64xf32> to vector<2x16xf32>
    %128 = arith.negf %127 : vector<2x16xf32>
    %129 = math.exp %128 : vector<2x16xf32>
    %cst_40 = arith.constant 1.000000e+00 : f32
    %130 = vector.broadcast %cst_40 : f32 to vector<2x16xf32>
    %131 = arith.addf %130, %129 : vector<2x16xf32>
    %132 = arith.divf %130, %131 : vector<2x16xf32>
    %133 = arith.mulf %124, %107 : vector<2x16xf32>
    %134 = arith.mulf %118, %126 : vector<2x16xf32>
    %135 = arith.addf %133, %134 : vector<2x16xf32>
    %136 = math.tanh %135 : vector<2x16xf32>
    %137 = arith.mulf %132, %136 : vector<2x16xf32>
    %cst_41 = arith.constant dense<0.000000e+00> : vector<2x16xf32>
    %138 = tpu.matmul %137, %21, %cst_41 {dimension_numbers = #tpu.dot_dimension_numbers<[1], [0], [0], [1], [0, 0, 1, 1], [], []>} : vector<2x16xf32>, vector<16x16xf32>, vector<2x16xf32> -> vector<2x16xf32>
    %139 = vector.broadcast %23 : vector<1x16xf32> to vector<2x16xf32>
    %140 = arith.addf %138, %139 : vector<2x16xf32>
    %141 = vector.extract_strided_slice %16 {offsets = [8, 64], sizes = [2, 64], strides = [1, 1]} : vector<10x128xf32> to vector<2x64xf32>
    %c1 = arith.constant 1 : index
    %c0_42 = arith.constant 0 : index
    %c0_43 = arith.constant 0 : index
    %142 = vector.load %arg5[%c1, %c0_42, %c0_43] : memref<2x16x64xf32, #tpu.memory_space<vmem>>, vector<1x16x64xf32>
    %143 = vector.shape_cast %142 : vector<1x16x64xf32> to vector<16x64xf32>
    %c1_44 = arith.constant 1 : index
    %c0_45 = arith.constant 0 : index
    %c0_46 = arith.constant 0 : index
    %144 = vector.load %arg6[%c1_44, %c0_45, %c0_46] : memref<2x16x16xf32, #tpu.memory_space<vmem>>, vector<1x16x16xf32>
    %145 = vector.shape_cast %144 : vector<1x16x16xf32> to vector<16x16xf32>
    %c1_47 = arith.constant 1 : index
    %c0_48 = arith.constant 0 : index
    %c0_49 = arith.constant 0 : index
    %146 = vector.load %arg7[%c1_47, %c0_48, %c0_49] : memref<2x1x16xf32, #tpu.memory_space<vmem>>, vector<1x1x16xf32>
    %147 = vector.shape_cast %146 : vector<1x1x16xf32> to vector<1x16xf32>
    %cst_50 = arith.constant 0.000000e+00 : f32
    %148 = vector.broadcast %cst_50 : f32 to vector<2x16xf32>
    %cst_51 = arith.constant 0.000000e+00 : f32
    %149 = vector.broadcast %cst_51 : f32 to vector<2x16xf32>
    %cst_52 = arith.constant dense<0.000000e+00> : vector<2x64xf32>
    %150 = tpu.matmul %148, %143, %cst_52 {dimension_numbers = #tpu.dot_dimension_numbers<[1], [0], [0], [1], [0, 0, 1, 1], [], []>} : vector<2x16xf32>, vector<16x64xf32>, vector<2x64xf32> -> vector<2x64xf32>
    %151 = arith.addf %141, %150 : vector<2x64xf32>
    %152 = vector.extract_strided_slice %151 {offsets = [0, 0], sizes = [2, 16], strides = [1, 1]} : vector<2x64xf32> to vector<2x16xf32>
    %153 = arith.negf %152 : vector<2x16xf32>
    %154 = math.exp %153 : vector<2x16xf32>
    %cst_53 = arith.constant 1.000000e+00 : f32
    %155 = vector.broadcast %cst_53 : f32 to vector<2x16xf32>
    %156 = arith.addf %155, %154 : vector<2x16xf32>
    %157 = arith.divf %155, %156 : vector<2x16xf32>
    %158 = vector.extract_strided_slice %151 {offsets = [0, 16], sizes = [2, 16], strides = [1, 1]} : vector<2x64xf32> to vector<2x16xf32>
    %159 = arith.negf %158 : vector<2x16xf32>
    %160 = math.exp %159 : vector<2x16xf32>
    %cst_54 = arith.constant 1.000000e+00 : f32
    %161 = vector.broadcast %cst_54 : f32 to vector<2x16xf32>
    %162 = arith.addf %161, %160 : vector<2x16xf32>
    %163 = arith.divf %161, %162 : vector<2x16xf32>
    %164 = vector.extract_strided_slice %151 {offsets = [0, 32], sizes = [2, 16], strides = [1, 1]} : vector<2x64xf32> to vector<2x16xf32>
    %165 = math.tanh %164 : vector<2x16xf32>
    %166 = vector.extract_strided_slice %151 {offsets = [0, 48], sizes = [2, 16], strides = [1, 1]} : vector<2x64xf32> to vector<2x16xf32>
    %167 = arith.negf %166 : vector<2x16xf32>
    %168 = math.exp %167 : vector<2x16xf32>
    %cst_55 = arith.constant 1.000000e+00 : f32
    %169 = vector.broadcast %cst_55 : f32 to vector<2x16xf32>
    %170 = arith.addf %169, %168 : vector<2x16xf32>
    %171 = arith.divf %169, %170 : vector<2x16xf32>
    %172 = arith.mulf %163, %149 : vector<2x16xf32>
    %173 = arith.mulf %157, %165 : vector<2x16xf32>
    %174 = arith.addf %172, %173 : vector<2x16xf32>
    %175 = math.tanh %174 : vector<2x16xf32>
    %176 = arith.mulf %171, %175 : vector<2x16xf32>
    %cst_56 = arith.constant dense<0.000000e+00> : vector<2x16xf32>
    %177 = tpu.matmul %176, %145, %cst_56 {dimension_numbers = #tpu.dot_dimension_numbers<[1], [0], [0], [1], [0, 0, 1, 1], [], []>} : vector<2x16xf32>, vector<16x16xf32>, vector<2x16xf32> -> vector<2x16xf32>
    %178 = vector.broadcast %147 : vector<1x16xf32> to vector<2x16xf32>
    %179 = arith.addf %177, %178 : vector<2x16xf32>
    %180 = arith.truncf %10 : vector<2x768xf32> to vector<2x768xbf16>
    %c0_57 = arith.constant 0 : index
    %c0_58 = arith.constant 0 : index
    %181 = vector.load %arg8[%c0_57, %c0_58] : memref<768x192xbf16, #tpu.memory_space<vmem>>, vector<768x192xbf16>
    %cst_59 = arith.constant dense<0.000000e+00> : vector<2x192xf32>
    %182 = tpu.matmul %180, %181, %cst_59 {dimension_numbers = #tpu.dot_dimension_numbers<[1], [0], [0], [1], [0, 0, 1, 1], [], []>} : vector<2x768xbf16>, vector<768x192xbf16>, vector<2x192xf32> -> vector<2x192xf32>
    %c0_60 = arith.constant 0 : index
    %c0_61 = arith.constant 0 : index
    %183 = vector.load %arg9[%c0_60, %c0_61] : memref<1x192xf32, #tpu.memory_space<vmem>>, vector<1x192xf32>
    %184 = vector.broadcast %183 : vector<1x192xf32> to vector<2x192xf32>
    %185 = arith.addf %182, %184 : vector<2x192xf32>
    %186 = vector.extract_strided_slice %185 {offsets = [0, 0], sizes = [2, 64], strides = [1, 1]} : vector<2x192xf32> to vector<2x64xf32>
    %cst_62 = arith.constant 0.000000e+00 : f32
    %187 = vector.broadcast %cst_62 : f32 to vector<2x64xf32>
    %188 = arith.maximumf %186, %187 : vector<2x64xf32>
    %189 = vector.extract_strided_slice %185 {offsets = [0, 64], sizes = [2, 128], strides = [1, 1]} : vector<2x192xf32> to vector<2x128xf32>
    %cst_63 = arith.constant 0.000000e+00 : f32
    %190 = vector.broadcast %cst_63 : f32 to vector<2x128xf32>
    %191 = arith.maximumf %189, %190 : vector<2x128xf32>
    %c0_64 = arith.constant 0 : index
    %c0_65 = arith.constant 0 : index
    %192 = vector.load %arg10[%c0_64, %c0_65] : memref<16x32xf32, #tpu.memory_space<vmem>>, vector<16x32xf32>
    %cst_66 = arith.constant dense<0.000000e+00> : vector<2x32xf32>
    %193 = tpu.matmul %140, %192, %cst_66 {dimension_numbers = #tpu.dot_dimension_numbers<[1], [0], [0], [1], [0, 0, 1, 1], [], []>} : vector<2x16xf32>, vector<16x32xf32>, vector<2x32xf32> -> vector<2x32xf32>
    %c0_67 = arith.constant 0 : index
    %c0_68 = arith.constant 0 : index
    %194 = vector.load %arg11[%c0_67, %c0_68] : memref<1x32xf32, #tpu.memory_space<vmem>>, vector<1x32xf32>
    %195 = vector.broadcast %194 : vector<1x32xf32> to vector<2x32xf32>
    %196 = arith.addf %193, %195 : vector<2x32xf32>
    %cst_69 = arith.constant 0.000000e+00 : f32
    %197 = vector.broadcast %cst_69 : f32 to vector<2x32xf32>
    %198 = arith.maximumf %196, %197 : vector<2x32xf32>
    %199 = tpu.concatenate %188, %198 in 1 : vector<2x64xf32>, vector<2x32xf32> -> vector<2x96xf32>
    %c0_70 = arith.constant 0 : index
    %c0_71 = arith.constant 0 : index
    %200 = vector.load %arg12[%c0_70, %c0_71] : memref<96x96xf32, #tpu.memory_space<vmem>>, vector<96x96xf32>
    %cst_72 = arith.constant dense<0.000000e+00> : vector<2x96xf32>
    %201 = tpu.matmul %199, %200, %cst_72 {dimension_numbers = #tpu.dot_dimension_numbers<[1], [0], [0], [1], [0, 0, 1, 1], [], []>} : vector<2x96xf32>, vector<96x96xf32>, vector<2x96xf32> -> vector<2x96xf32>
    %c0_73 = arith.constant 0 : index
    %c0_74 = arith.constant 0 : index
    %202 = vector.load %arg13[%c0_73, %c0_74] : memref<1x96xf32, #tpu.memory_space<vmem>>, vector<1x96xf32>
    %203 = vector.broadcast %202 : vector<1x96xf32> to vector<2x96xf32>
    %204 = arith.addf %201, %203 : vector<2x96xf32>
    %205 = vector.extract_strided_slice %204 {offsets = [0, 0], sizes = [2, 16], strides = [1, 1]} : vector<2x96xf32> to vector<2x16xf32>
    %206 = vector.extract_strided_slice %204 {offsets = [0, 16], sizes = [2, 16], strides = [1, 1]} : vector<2x96xf32> to vector<2x16xf32>
    %207 = arith.subf %205, %140 : vector<2x16xf32>
    %208 = arith.mulf %207, %207 : vector<2x16xf32>
    %cst_75 = arith.constant 0.000000e+00 : f32
    %209 = vector.broadcast %cst_75 : f32 to vector<2x16xf32>
    %210 = arith.subf %209, %208 : vector<2x16xf32>
    %cst_76 = arith.constant 5.000000e-01 : f32
    %211 = vector.broadcast %cst_76 : f32 to vector<2x16xf32>
    %212 = arith.mulf %210, %211 : vector<2x16xf32>
    %cst_77 = arith.constant 0.000000e+00 : f32
    %213 = vector.broadcast %cst_77 : f32 to vector<2x16xf32>
    %214 = arith.subf %213, %206 : vector<2x16xf32>
    %215 = math.exp %214 : vector<2x16xf32>
    %216 = arith.mulf %212, %215 : vector<2x16xf32>
    %217 = vector.shape_cast %216 : vector<2x16xf32> to vector<1x2x16xf32>
    %cst_78 = arith.constant dense<0.000000e+00> : vector<1xf32>
    %218 = vector.multi_reduction <add>, %217, %cst_78 [1, 2] : vector<1x2x16xf32> to vector<1xf32>
    %219 = vector.shape_cast %218 : vector<1xf32> to vector<1x1x1xf32>
    %220 = vector.extract %219[0, 0, 0] : f32 from vector<1x1x1xf32>
    %cst_79 = arith.constant 5.000000e-01 : f32
    %221 = arith.mulf %220, %cst_79 : f32
    %222 = vector.extract_strided_slice %204 {offsets = [0, 32], sizes = [2, 16], strides = [1, 1]} : vector<2x96xf32> to vector<2x16xf32>
    %223 = vector.extract_strided_slice %204 {offsets = [0, 48], sizes = [2, 16], strides = [1, 1]} : vector<2x96xf32> to vector<2x16xf32>
    %224 = arith.subf %222, %179 : vector<2x16xf32>
    %225 = arith.mulf %224, %224 : vector<2x16xf32>
    %cst_80 = arith.constant 0.000000e+00 : f32
    %226 = vector.broadcast %cst_80 : f32 to vector<2x16xf32>
    %227 = arith.subf %226, %225 : vector<2x16xf32>
    %cst_81 = arith.constant 5.000000e-01 : f32
    %228 = vector.broadcast %cst_81 : f32 to vector<2x16xf32>
    %229 = arith.mulf %227, %228 : vector<2x16xf32>
    %cst_82 = arith.constant 0.000000e+00 : f32
    %230 = vector.broadcast %cst_82 : f32 to vector<2x16xf32>
    %231 = arith.subf %230, %223 : vector<2x16xf32>
    %232 = math.exp %231 : vector<2x16xf32>
    %233 = arith.mulf %229, %232 : vector<2x16xf32>
    %234 = vector.shape_cast %233 : vector<2x16xf32> to vector<1x2x16xf32>
    %cst_83 = arith.constant dense<0.000000e+00> : vector<1xf32>
    %235 = vector.multi_reduction <add>, %234, %cst_83 [1, 2] : vector<1x2x16xf32> to vector<1xf32>
    %236 = vector.shape_cast %235 : vector<1xf32> to vector<1x1x1xf32>
    %237 = vector.extract %236[0, 0, 0] : f32 from vector<1x1x1xf32>
    %cst_84 = arith.constant 5.000000e-01 : f32
    %238 = arith.mulf %237, %cst_84 : f32
    %239 = arith.addf %221, %238 : f32
    %240 = vector.extract_strided_slice %204 {offsets = [0, 64], sizes = [2, 16], strides = [1, 1]} : vector<2x96xf32> to vector<2x16xf32>
    %241 = vector.extract_strided_slice %204 {offsets = [0, 80], sizes = [2, 16], strides = [1, 1]} : vector<2x96xf32> to vector<2x16xf32>
    %242 = arith.subf %240, %179 : vector<2x16xf32>
    %243 = arith.mulf %242, %242 : vector<2x16xf32>
    %cst_85 = arith.constant 0.000000e+00 : f32
    %244 = vector.broadcast %cst_85 : f32 to vector<2x16xf32>
    %245 = arith.subf %244, %243 : vector<2x16xf32>
    %cst_86 = arith.constant 5.000000e-01 : f32
    %246 = vector.broadcast %cst_86 : f32 to vector<2x16xf32>
    %247 = arith.mulf %245, %246 : vector<2x16xf32>
    %cst_87 = arith.constant 0.000000e+00 : f32
    %248 = vector.broadcast %cst_87 : f32 to vector<2x16xf32>
    %249 = arith.subf %248, %241 : vector<2x16xf32>
    %250 = math.exp %249 : vector<2x16xf32>
    %251 = arith.mulf %247, %250 : vector<2x16xf32>
    %252 = vector.shape_cast %251 : vector<2x16xf32> to vector<1x2x16xf32>
    %cst_88 = arith.constant dense<0.000000e+00> : vector<1xf32>
    %253 = vector.multi_reduction <add>, %252, %cst_88 [1, 2] : vector<1x2x16xf32> to vector<1xf32>
    %254 = vector.shape_cast %253 : vector<1xf32> to vector<1x1x1xf32>
    %255 = vector.extract %254[0, 0, 0] : f32 from vector<1x1x1xf32>
    %cst_89 = arith.constant 5.000000e-01 : f32
    %256 = arith.mulf %255, %cst_89 : f32
    %257 = arith.addf %239, %256 : f32
    %c0_90 = arith.constant 0 : index
    %c0_91 = arith.constant 0 : index
    %258 = vector.load %arg14[%c0_90, %c0_91] : memref<128x128xf32, #tpu.memory_space<vmem>>, vector<128x128xf32>
    %cst_92 = arith.constant dense<0.000000e+00> : vector<2x128xf32>
    %259 = tpu.matmul %191, %258, %cst_92 {dimension_numbers = #tpu.dot_dimension_numbers<[1], [0], [0], [1], [0, 0, 1, 1], [], []>} : vector<2x128xf32>, vector<128x128xf32>, vector<2x128xf32> -> vector<2x128xf32>
    %c0_93 = arith.constant 0 : index
    %c0_94 = arith.constant 0 : index
    %260 = vector.load %arg15[%c0_93, %c0_94] : memref<1x128xf32, #tpu.memory_space<vmem>>, vector<1x128xf32>
    %261 = vector.broadcast %260 : vector<1x128xf32> to vector<2x128xf32>
    %262 = arith.addf %259, %261 : vector<2x128xf32>
    %cst_95 = arith.constant 0.000000e+00 : f32
    %263 = vector.broadcast %cst_95 : f32 to vector<2x128xf32>
    %264 = arith.maximumf %262, %263 : vector<2x128xf32>
    %265 = arith.truncf %264 : vector<2x128xf32> to vector<2x128xbf16>
    %c0_96 = arith.constant 0 : index
    %c0_97 = arith.constant 0 : index
    %266 = vector.load %arg16[%c0_96, %c0_97] : memref<128x802xbf16, #tpu.memory_space<vmem>>, vector<128x802xbf16>
    %cst_98 = arith.constant dense<0.000000e+00> : vector<2x802xf32>
    %267 = tpu.matmul %265, %266, %cst_98 {dimension_numbers = #tpu.dot_dimension_numbers<[1], [0], [0], [1], [0, 0, 1, 1], [], []>} : vector<2x128xbf16>, vector<128x802xbf16>, vector<2x802xf32> -> vector<2x802xf32>
    %c0_99 = arith.constant 0 : index
    %c0_100 = arith.constant 0 : index
    %268 = vector.load %arg17[%c0_99, %c0_100] : memref<1x802xf32, #tpu.memory_space<vmem>>, vector<1x802xf32>
    %269 = vector.broadcast %268 : vector<1x802xf32> to vector<2x802xf32>
    %270 = arith.addf %267, %269 : vector<2x802xf32>
    %271 = vector.extract_strided_slice %270 {offsets = [0, 800], sizes = [2, 2], strides = [1, 1]} : vector<2x802xf32> to vector<2x2xf32>
    %272 = vector.extract_strided_slice %270 {offsets = [0, 0], sizes = [2, 768], strides = [1, 1]} : vector<2x802xf32> to vector<2x768xf32>
    %273 = arith.mulf %10, %10 : vector<2x768xf32>
    %cst_101 = arith.constant dense<0.000000e+00> : vector<2xf32>
    %274 = vector.multi_reduction <add>, %273, %cst_101 [1] : vector<2x768xf32> to vector<2xf32>
    %275 = vector.shape_cast %274 : vector<2xf32> to vector<2x1xf32>
    %cst_102 = arith.constant 9.99999993E-9 : f32
    %276 = vector.broadcast %cst_102 : f32 to vector<2x1xf32>
    %277 = arith.addf %275, %276 : vector<2x1xf32>
    %278 = math.rsqrt %277 : vector<2x1xf32>
    %279 = vector.broadcast %278 : vector<2x1xf32> to vector<2x768xf32>
    %280 = arith.mulf %10, %279 : vector<2x768xf32>
    %281 = arith.mulf %272, %272 : vector<2x768xf32>
    %cst_103 = arith.constant dense<0.000000e+00> : vector<2xf32>
    %282 = vector.multi_reduction <add>, %281, %cst_103 [1] : vector<2x768xf32> to vector<2xf32>
    %283 = vector.shape_cast %282 : vector<2xf32> to vector<2x1xf32>
    %cst_104 = arith.constant 9.99999993E-9 : f32
    %284 = vector.broadcast %cst_104 : f32 to vector<2x1xf32>
    %285 = arith.addf %283, %284 : vector<2x1xf32>
    %286 = math.rsqrt %285 : vector<2x1xf32>
    %287 = vector.broadcast %286 : vector<2x1xf32> to vector<2x768xf32>
    %288 = arith.mulf %272, %287 : vector<2x768xf32>
    %289 = arith.mulf %280, %288 : vector<2x768xf32>
    %cst_105 = arith.constant dense<0.000000e+00> : vector<2xf32>
    %290 = vector.multi_reduction <add>, %289, %cst_105 [1] : vector<2x768xf32> to vector<2xf32>
    %291 = vector.shape_cast %290 : vector<2xf32> to vector<2x1xf32>
    %cst_106 = arith.constant dense<0.000000e+00> : vector<2x2xf32>
    %292 = tpu.matmul %280, %288, %cst_106 {dimension_numbers = #tpu.dot_dimension_numbers<[1], [1], [0], [0], [0, 0, 1, 0], [], []>} : vector<2x768xf32>, vector<2x768xf32>, vector<2x2xf32> -> vector<2x2xf32>
    %cst_107 = arith.constant dense<0xFF800000> : vector<2xf32>
    %293 = vector.multi_reduction <maximumf>, %292, %cst_107 [1] : vector<2x2xf32> to vector<2xf32>
    %294 = vector.shape_cast %293 : vector<2xf32> to vector<2x1xf32>
    %295 = vector.broadcast %294 : vector<2x1xf32> to vector<2x2xf32>
    %296 = arith.subf %292, %295 : vector<2x2xf32>
    %297 = math.exp %296 : vector<2x2xf32>
    %cst_108 = arith.constant dense<0.000000e+00> : vector<2xf32>
    %298 = vector.multi_reduction <add>, %297, %cst_108 [1] : vector<2x2xf32> to vector<2xf32>
    %299 = vector.shape_cast %298 : vector<2xf32> to vector<2x1xf32>
    %300 = math.log %299 : vector<2x1xf32>
    %301 = arith.addf %300, %294 : vector<2x1xf32>
    %302 = arith.subf %291, %301 : vector<2x1xf32>
    %303 = vector.shape_cast %302 : vector<2x1xf32> to vector<1x2x1xf32>
    %cst_109 = arith.constant dense<0.000000e+00> : vector<1xf32>
    %304 = vector.multi_reduction <add>, %303, %cst_109 [1, 2] : vector<1x2x1xf32> to vector<1xf32>
    %305 = vector.shape_cast %304 : vector<1xf32> to vector<1x1x1xf32>
    %306 = vector.extract %305[0, 0, 0] : f32 from vector<1x1x1xf32>
    %cst_110 = arith.constant 0.000000e+00 : f32
    %307 = arith.subf %cst_110, %306 : f32
    %cst_111 = arith.constant 5.000000e-01 : f32
    %308 = arith.mulf %307, %cst_111 : f32
    %309 = vector.extract_strided_slice %270 {offsets = [0, 768], sizes = [2, 16], strides = [1, 1]} : vector<2x802xf32> to vector<2x16xf32>
    %310 = arith.mulf %140, %140 : vector<2x16xf32>
    %cst_112 = arith.constant dense<0.000000e+00> : vector<2xf32>
    %311 = vector.multi_reduction <add>, %310, %cst_112 [1] : vector<2x16xf32> to vector<2xf32>
    %312 = vector.shape_cast %311 : vector<2xf32> to vector<2x1xf32>
    %cst_113 = arith.constant 9.99999993E-9 : f32
    %313 = vector.broadcast %cst_113 : f32 to vector<2x1xf32>
    %314 = arith.addf %312, %313 : vector<2x1xf32>
    %315 = math.rsqrt %314 : vector<2x1xf32>
    %316 = vector.broadcast %315 : vector<2x1xf32> to vector<2x16xf32>
    %317 = arith.mulf %140, %316 : vector<2x16xf32>
    %318 = arith.mulf %309, %309 : vector<2x16xf32>
    %cst_114 = arith.constant dense<0.000000e+00> : vector<2xf32>
    %319 = vector.multi_reduction <add>, %318, %cst_114 [1] : vector<2x16xf32> to vector<2xf32>
    %320 = vector.shape_cast %319 : vector<2xf32> to vector<2x1xf32>
    %cst_115 = arith.constant 9.99999993E-9 : f32
    %321 = vector.broadcast %cst_115 : f32 to vector<2x1xf32>
    %322 = arith.addf %320, %321 : vector<2x1xf32>
    %323 = math.rsqrt %322 : vector<2x1xf32>
    %324 = vector.broadcast %323 : vector<2x1xf32> to vector<2x16xf32>
    %325 = arith.mulf %309, %324 : vector<2x16xf32>
    %326 = arith.mulf %317, %325 : vector<2x16xf32>
    %cst_116 = arith.constant dense<0.000000e+00> : vector<2xf32>
    %327 = vector.multi_reduction <add>, %326, %cst_116 [1] : vector<2x16xf32> to vector<2xf32>
    %328 = vector.shape_cast %327 : vector<2xf32> to vector<2x1xf32>
    %cst_117 = arith.constant dense<0.000000e+00> : vector<2x2xf32>
    %329 = tpu.matmul %317, %325, %cst_117 {dimension_numbers = #tpu.dot_dimension_numbers<[1], [1], [0], [0], [0, 0, 1, 0], [], []>} : vector<2x16xf32>, vector<2x16xf32>, vector<2x2xf32> -> vector<2x2xf32>
    %cst_118 = arith.constant dense<0xFF800000> : vector<2xf32>
    %330 = vector.multi_reduction <maximumf>, %329, %cst_118 [1] : vector<2x2xf32> to vector<2xf32>
    %331 = vector.shape_cast %330 : vector<2xf32> to vector<2x1xf32>
    %332 = vector.broadcast %331 : vector<2x1xf32> to vector<2x2xf32>
    %333 = arith.subf %329, %332 : vector<2x2xf32>
    %334 = math.exp %333 : vector<2x2xf32>
    %cst_119 = arith.constant dense<0.000000e+00> : vector<2xf32>
    %335 = vector.multi_reduction <add>, %334, %cst_119 [1] : vector<2x2xf32> to vector<2xf32>
    %336 = vector.shape_cast %335 : vector<2xf32> to vector<2x1xf32>
    %337 = math.log %336 : vector<2x1xf32>
    %338 = arith.addf %337, %331 : vector<2x1xf32>
    %339 = arith.subf %328, %338 : vector<2x1xf32>
    %340 = vector.shape_cast %339 : vector<2x1xf32> to vector<1x2x1xf32>
    %cst_120 = arith.constant dense<0.000000e+00> : vector<1xf32>
    %341 = vector.multi_reduction <add>, %340, %cst_120 [1, 2] : vector<1x2x1xf32> to vector<1xf32>
    %342 = vector.shape_cast %341 : vector<1xf32> to vector<1x1x1xf32>
    %343 = vector.extract %342[0, 0, 0] : f32 from vector<1x1x1xf32>
    %cst_121 = arith.constant 0.000000e+00 : f32
    %344 = arith.subf %cst_121, %343 : f32
    %cst_122 = arith.constant 5.000000e-01 : f32
    %345 = arith.mulf %344, %cst_122 : f32
    %346 = arith.addf %308, %345 : f32
    %347 = vector.extract_strided_slice %270 {offsets = [0, 784], sizes = [2, 16], strides = [1, 1]} : vector<2x802xf32> to vector<2x16xf32>
    %348 = arith.mulf %179, %179 : vector<2x16xf32>
    %cst_123 = arith.constant dense<0.000000e+00> : vector<2xf32>
    %349 = vector.multi_reduction <add>, %348, %cst_123 [1] : vector<2x16xf32> to vector<2xf32>
    %350 = vector.shape_cast %349 : vector<2xf32> to vector<2x1xf32>
    %cst_124 = arith.constant 9.99999993E-9 : f32
    %351 = vector.broadcast %cst_124 : f32 to vector<2x1xf32>
    %352 = arith.addf %350, %351 : vector<2x1xf32>
    %353 = math.rsqrt %352 : vector<2x1xf32>
    %354 = vector.broadcast %353 : vector<2x1xf32> to vector<2x16xf32>
    %355 = arith.mulf %179, %354 : vector<2x16xf32>
    %356 = arith.mulf %347, %347 : vector<2x16xf32>
    %cst_125 = arith.constant dense<0.000000e+00> : vector<2xf32>
    %357 = vector.multi_reduction <add>, %356, %cst_125 [1] : vector<2x16xf32> to vector<2xf32>
    %358 = vector.shape_cast %357 : vector<2xf32> to vector<2x1xf32>
    %cst_126 = arith.constant 9.99999993E-9 : f32
    %359 = vector.broadcast %cst_126 : f32 to vector<2x1xf32>
    %360 = arith.addf %358, %359 : vector<2x1xf32>
    %361 = math.rsqrt %360 : vector<2x1xf32>
    %362 = vector.broadcast %361 : vector<2x1xf32> to vector<2x16xf32>
    %363 = arith.mulf %347, %362 : vector<2x16xf32>
    %364 = arith.mulf %355, %363 : vector<2x16xf32>
    %cst_127 = arith.constant dense<0.000000e+00> : vector<2xf32>
    %365 = vector.multi_reduction <add>, %364, %cst_127 [1] : vector<2x16xf32> to vector<2xf32>
    %366 = vector.shape_cast %365 : vector<2xf32> to vector<2x1xf32>
    %cst_128 = arith.constant dense<0.000000e+00> : vector<2x2xf32>
    %367 = tpu.matmul %355, %363, %cst_128 {dimension_numbers = #tpu.dot_dimension_numbers<[1], [1], [0], [0], [0, 0, 1, 0], [], []>} : vector<2x16xf32>, vector<2x16xf32>, vector<2x2xf32> -> vector<2x2xf32>
    %cst_129 = arith.constant dense<0xFF800000> : vector<2xf32>
    %368 = vector.multi_reduction <maximumf>, %367, %cst_129 [1] : vector<2x2xf32> to vector<2xf32>
    %369 = vector.shape_cast %368 : vector<2xf32> to vector<2x1xf32>
    %370 = vector.broadcast %369 : vector<2x1xf32> to vector<2x2xf32>
    %371 = arith.subf %367, %370 : vector<2x2xf32>
    %372 = math.exp %371 : vector<2x2xf32>
    %cst_130 = arith.constant dense<0.000000e+00> : vector<2xf32>
    %373 = vector.multi_reduction <add>, %372, %cst_130 [1] : vector<2x2xf32> to vector<2xf32>
    %374 = vector.shape_cast %373 : vector<2xf32> to vector<2x1xf32>
    %375 = math.log %374 : vector<2x1xf32>
    %376 = arith.addf %375, %369 : vector<2x1xf32>
    %377 = arith.subf %366, %376 : vector<2x1xf32>
    %378 = vector.shape_cast %377 : vector<2x1xf32> to vector<1x2x1xf32>
    %cst_131 = arith.constant dense<0.000000e+00> : vector<1xf32>
    %379 = vector.multi_reduction <add>, %378, %cst_131 [1, 2] : vector<1x2x1xf32> to vector<1xf32>
    %380 = vector.shape_cast %379 : vector<1xf32> to vector<1x1x1xf32>
    %381 = vector.extract %380[0, 0, 0] : f32 from vector<1x1x1xf32>
    %cst_132 = arith.constant 0.000000e+00 : f32
    %382 = arith.subf %cst_132, %381 : f32
    %cst_133 = arith.constant 5.000000e-01 : f32
    %383 = arith.mulf %382, %cst_133 : f32
    %384 = arith.addf %346, %383 : f32
    %385 = arith.cmpf one, %384, %384 : f32
    %cst_134 = arith.constant 0.000000e+00 : f32
    %386 = arith.select %385, %cst_134, %384 : f32
    %cst_135 = arith.constant 0.000000e+00 : f32
    %387 = vector.broadcast %cst_135 : f32 to vector<2x126xf32>
    %388 = tpu.concatenate %271, %387 in 1 : vector<2x2xf32>, vector<2x126xf32> -> vector<2x128xf32>
    %c0_136 = arith.constant 0 : index
    %c0_137 = arith.constant 0 : index
    %389 = vector.load %arg18[%c0_136, %c0_137] : memref<2x128xf32, #tpu.memory_space<vmem>>, vector<2x128xf32>
    tpu.vector_store %arg18[%c0_136, %c0_137], %388 {strides = array<i32>} : memref<2x128xf32, #tpu.memory_space<vmem>>, vector<2x128xf32>,
    %c0_138 = arith.constant 0 : index
    %c0_139 = arith.constant 0 : index
    %390 = memref.load %arg19[%c0_138, %c0_139] : memref<1x2xf32, #tpu.memory_space<smem>>
    memref.store %257, %arg19[%c0_138, %c0_139] : memref<1x2xf32, #tpu.memory_space<smem>>
    %c0_140 = arith.constant 0 : index
    %c1_141 = arith.constant 1 : index
    %391 = memref.load %arg19[%c0_140, %c1_141] : memref<1x2xf32, #tpu.memory_space<smem>>
    memref.store %386, %arg19[%c0_140, %c1_141] : memref<1x2xf32, #tpu.memory_space<smem>>
    return
  }
}

</mosaic_0001>

<bundles_post_ra>
// kernel: _mmim_forward_impl.1
= control target key start
LH: loop header
LB: loop body
LE: loop exit
PB: predicated region body
PF: predicated region fallthrough
CT: control target
= control target key end

     0   :  { %s6190_s0 = inlined_call_operand.vmem [shape: f32[2,8,768], index: 0, kind: input, shape index: {}]   ;;  %s6191_s1 = inlined_call_operand.vmem [shape: f32[2,8,1], index: 1, kind: input, shape index: {}]   ;;  %s6192_s2 = inlined_call_operand.vmem [shape: bf16[10,768], index: 2, kind: input, shape index: {}]   ;;  %s6193_s3 = inlined_call_operand.vmem [shape: bf16[768,128], index: 3, kind: input, shape index: {}]   ;;  %s6194_s4 = inlined_call_operand.vmem [shape: f32[1,128], index: 4, kind: input, shape index: {}]   ;;  %s6195_s5 = inlined_call_operand.vmem [shape: f32[2,16,64], index: 5, kind: input, shape index: {}]   ;;  %s6196_s6 = inlined_call_operand.vmem [shape: f32[2,16,16], index: 6, kind: input, shape index: {}]   ;;  %s6197_s7 = inlined_call_operand.vmem [shape: f32[2,1,16], index: 7, kind: input, shape index: {}]   ;;  %s6198_s8 = inlined_call_operand.vmem [shape: bf16[768,192], index: 8, kind: input, shape index: {}]   ;;  %s6199_s9 = inlined_call_operand.vmem [shape: f32[1,192], index: 9, kind: input, shape index: {}]   ;;  %s6200_s10 = inlined_call_operand.vmem [shape: f32[16,32], index: 10, kind: input, shape index: {}]   ;;  %s6201_s11 = inlined_call_operand.vmem [shape: f32[1,32], index: 11, kind: input, shape index: {}]   ;;  %s6202_s12 = inlined_call_operand.vmem [shape: f32[96,96], index: 12, kind: input, shape index: {}]   ;;  %s6203_s13 = inlined_call_operand.vmem [shape: f32[1,96], index: 13, kind: input, shape index: {}]   ;;  %s6204_s14 = inlined_call_operand.vmem [shape: f32[128,128], index: 14, kind: input, shape index: {}]   ;;  %s6205_s15 = inlined_call_operand.vmem [shape: f32[1,128], index: 15, kind: input, shape index: {}]   ;;  %s6206_s16 = inlined_call_operand.vmem [shape: bf16[128,802], index: 16, kind: input, shape index: {}]   ;;  %s6207_s17 = inlined_call_operand.vmem [shape: f32[1,802], index: 17, kind: input, shape index: {}]   ;;  %s6208_s18 = inlined_call_operand.hbm [shape: f32[2,128], index: 18, kind: output, shape index: {0}]   ;;  %s6209_s19 = inlined_call_operand.vmem [shape: f32[1,2], index: 19, kind: output, shape index: {1}]  }
   0x1   :  { %6214 = sst [smem:[#allocation8_spill]] %s6190_s0 }
   0x2   :  { %6215 = sst [smem:[#allocation9_spill]] %s6191_s1 }
   0x3   :  { %6216 = sst [smem:[#allocation10_spill]] %s6192_s2 }
   0x4   :  { %6217 = sst [smem:[#allocation11_spill]] %s6193_s3 }
   0x5   :  { %25 = vsyncpa [#allocation3], 0  ;;  %s6218_s20 = sld [smem:[#allocation11_spill]]  ;;  %s6219_s25 = sld [smem:[#allocation10_spill]]  ;;  %v4878_v37 = vmov 0.0|0.0   ;;  %vm4879_vm0 = vmmov 0  }
   0x6   :  { %v4880_v42 = vmov 0.0   ;;  %v763_v49 = vld [vmem:[%s6195_s5] sm:$0xff]  ;;  %v764_v50 = vld [vmem:[%s6195_s5 + $0x8] sm:$0xff] }
   0x7   :  { %v5143_v52 = vpack.c.bf16 %v764_v50, %v763_v49 }
   0xb   :  { %v4489_v0 = vld [vmem:[%s6218_s20 + $0x40] sm:$0xff]   ;;  %v4493_v4 = vld [vmem:[%s6218_s20 + $0x48] sm:$0xff]   ;;  %v4497_v8 = vld [vmem:[%s6218_s20 + $0x50] sm:$0xff]  }
   0xc   :  { %v4490_v1 = vld [vmem:[%s6218_s20] sm:$0xff]   ;;  %4097 = vmatprep.subr.bf16.mxu0 %v4489_v0  ;;  %v4494_v5 = vld [vmem:[%s6218_s20 + $0x8] sm:$0xff]   ;;  %v4498_v9 = vld [vmem:[%s6218_s20 + $0x10] sm:$0xff]  }
   0xd   :  { %v4491_v2 = vld [vmem:[%s6218_s20 + $0xc0] sm:$0xff]   ;;  %4098 = vmatpush3.bf16.msra.mxu0 %v4490_v1  ;;  %v4495_v6 = vld [vmem:[%s6218_s20 + $0xc8] sm:$0xff]   ;;  %v4499_v10 = vld [vmem:[%s6218_s20 + $0xd0] sm:$0xff]  }
   0xe   :  { %v4492_v3 = vld [vmem:[%s6218_s20 + $0x80] sm:$0xff]   ;;  %4119 = vmatprep.subr.bf16.mxu1 %v4491_v2  ;;  %4099 = vmatprep.subr.bf16.mxu0 %v4493_v4  ;;  %v4496_v7 = vld [vmem:[%s6218_s20 + $0x88] sm:$0xff]   ;;  %v4500_v11 = vld [vmem:[%s6218_s20 + $0x90] sm:$0xff]  }
   0xf   :  { %4120 = vmatpush3.bf16.msra.mxu1 %v4492_v3  ;;  %v4501_v12 = vld [vmem:[%s6218_s20 + $0x58] sm:$0xff]   ;;  %v4505_v16 = vld [vmem:[%s6218_s20 + $0x60] sm:$0xff]   ;;  %v4509_v20 = vld [vmem:[%s6218_s20 + $0x68] sm:$0xff]  }
  0x10   :  { %4121 = vmatprep.subr.bf16.mxu1 %v4495_v6  ;;  %v4502_v13 = vld [vmem:[%s6218_s20 + $0x18] sm:$0xff]   ;;  %v4506_v17 = vld [vmem:[%s6218_s20 + $0x20] sm:$0xff]   ;;  %v4510_v21 = vld [vmem:[%s6218_s20 + $0x28] sm:$0xff]  }
  0x11   :  { %4100 = vmatpush3.bf16.msra.mxu0 %v4494_v5  ;;  %v4503_v14 = vld [vmem:[%s6218_s20 + $0xd8] sm:$0xff]   ;;  %v4507_v18 = vld [vmem:[%s6218_s20 + $0xe0] sm:$0xff]   ;;  %v4511_v22 = vld [vmem:[%s6218_s20 + $0xe8] sm:$0xff]  }
  0x12   :  { %4101 = vmatprep.subr.bf16.mxu0 %v4497_v8  ;;  %v4504_v15 = vld [vmem:[%s6218_s20 + $0x98] sm:$0xff]   ;;  %v4508_v19 = vld [vmem:[%s6218_s20 + $0xa0] sm:$0xff]   ;;  %v4512_v23 = vld [vmem:[%s6218_s20 + $0xa8] sm:$0xff]  }
  0x13   :  { %4122 = vmatpush3.bf16.msra.mxu1 %v4496_v7  ;;  %v4513_v24 = vld [vmem:[%s6218_s20 + $0x70] sm:$0xff]   ;;  %v4517_v28 = vld [vmem:[%s6218_s20 + $0x78] sm:$0xff]   ;;  %v4524_v34 = vld [vmem:[%s6218_s20 + $0x140] sm:$0xff]  }
  0x14   :  { %4123 = vmatprep.subr.bf16.mxu1 %v4499_v10  ;;  %v4514_v25 = vld [vmem:[%s6218_s20 + $0x30] sm:$0xff]   ;;  %v4518_v29 = vld [vmem:[%s6218_s20 + $0x38] sm:$0xff]   ;;  %v4525_v35 = vld [vmem:[%s6219_s25 + $0x8] ss:$24 sps:$4 sm:$0x1f]  }
  0x15   :  { %4102 = vmatpush3.bf16.msra.mxu0 %v4498_v9  ;;  %v4515_v26 = vld [vmem:[%s6218_s20 + $0xf0] sm:$0xff]   ;;  %v4519_v30 = vld [vmem:[%s6218_s20 + $0xf8] sm:$0xff]   ;;  %v4527_v36 = vld [vmem:[%s6219_s25 + $0xc] ss:$24 sps:$4 sm:$0x1f]  }
  0x16   :  { %4103 = vmatprep.subr.bf16.mxu0 %v4501_v12  ;;  %v4516_v27 = vld [vmem:[%s6218_s20 + $0xb0] sm:$0xff]   ;;  %v4520_v31 = vld [vmem:[%s6219_s25] ss:$24 sps:$4 sm:$0x1f]   ;;  %713 = vmatprep.mubr.bf16.mxu1 %v4527_v36  ;;  %v4529_v39 = vld [vmem:[%s6218_s20 + $0x148] sm:$0xff]  }
  0x17   :  { %4124 = vmatpush3.bf16.msra.mxu1 %v4500_v11  ;;  %v4522_v32 = vld [vmem:[%s6219_s25 + $0x4] ss:$24 sps:$4 sm:$0x1f]   ;;  %v4530_v40 = vld [vmem:[%s6218_s20 + $0x108] sm:$0xff]   ;;  %v4531_v41 = vld [vmem:[%s6218_s20 + $0x150] sm:$0xff]  }
  0x18   :  { %4125 = vmatprep.subr.bf16.mxu1 %v4503_v14  ;;  %v4523_v33 = vld [vmem:[%s6218_s20 + $0xb8] sm:$0xff]   ;;  %672 = vmatprep.mubr.bf16.mxu0 %v4522_v32  ;;  %v4528_v38 = vld [vmem:[%s6218_s20 + $0x100] sm:$0xff]   ;;  %v4532_v43 = vld [vmem:[%s6218_s20 + $0x110] sm:$0xff]  }
  0x19   :  { %4104 = vmatpush3.bf16.msra.mxu0 %v4502_v13  ;;  %v4533_v44 = vld [vmem:[%s6218_s20 + $0x158] sm:$0xff]   ;;  %v4535_v46 = vld [vmem:[%s6218_s20 + $0x160] sm:$0xff]   ;;  %v4537_v48 = vld [vmem:[%s6218_s20 + $0x168] sm:$0xff]  }
  0x1a   :  { %4105 = vmatprep.subr.bf16.mxu0 %v4505_v16  ;;  %v4534_v45 = vld [vmem:[%s6218_s20 + $0x118] sm:$0xff]   ;;  %v4536_v47 = vld [vmem:[%s6218_s20 + $0x120] sm:$0xff]   ;;  %v4538_v51 = vld [vmem:[%s6218_s20 + $0x128] sm:$0xff]  }
  0x1b   :  { %4126 = vmatpush3.bf16.msra.mxu1 %v4504_v15  ;;  %v4539_v53 = vld [vmem:[%s6218_s20 + $0x170] sm:$0xff]   ;;  %v4541_v56 = vld [vmem:[%s6218_s20 + $0x178] sm:$0xff]  }
  0x1c   :  { %4127 = vmatprep.subr.bf16.mxu1 %v4507_v18  ;;  %v4545_v54 = vld [vmem:[%s6219_s25 + $0x14] ss:$24 sps:$4 sm:$0x1f]   ;;  %v4542_v57 = vld [vmem:[%s6218_s20 + $0x138] sm:$0xff]  }
  0x1d   :  { %4106 = vmatpush3.bf16.msra.mxu0 %v4506_v17  ;;  %v4540_v55 = vld [vmem:[%s6218_s20 + $0x130] sm:$0xff]  }
  0x1e   :  { %4107 = vmatprep.subr.bf16.mxu0 %v4509_v20  ;;  %v4543_v58 = vld [vmem:[%s6219_s25 + $0x10] ss:$24 sps:$4 sm:$0x1f]  }
  0x1f   :  { %4128 = vmatpush3.bf16.msra.mxu1 %v4508_v19 }
  0x20   :  { %4129 = vmatprep.subr.bf16.mxu1 %v4511_v22 }
  0x21   :  { %4108 = vmatpush3.bf16.msra.mxu0 %v4510_v21 }
  0x22   :  { %4109 = vmatprep.subr.bf16.mxu0 %v4513_v24 }
  0x23   :  { %4130 = vmatpush3.bf16.msra.mxu1 %v4512_v23 }
  0x24   :  { %4131 = vmatprep.subr.bf16.mxu1 %v4515_v26 }
  0x25   :  { %4110 = vmatpush3.bf16.msra.mxu0 %v4514_v25 }
  0x26   :  { %4111 = vmatprep.subr.bf16.mxu0 %v4517_v28 }
  0x27   :  { %4132 = vmatpush3.bf16.msra.mxu1 %v4516_v27 }
  0x28   :  { %4133 = vmatprep.subr.bf16.mxu1 %v4519_v30 }
  0x29   :  { %4112 = vmatpush3.bf16.msra.mxu0 %v4518_v29 }
  0x2a   :  { %4141 = vmatprep.subr.bf16.mxu0 %v4524_v34 }
  0x2b   :  { %4134 = vmatpush3.bf16.msra.mxu1 %v4523_v33 }
  0x2c   :  { %673 = vmatmul.mubr.bf16.vlgmr.msra.gmra.mrb[0].mxu0 %v4520_v31  ;;  %4378 = vmatprep.subr.bf16.mxu1 %v4878_v37 }
  0x2d   :  { %4142 = vmatpush3.bf16.msra.mxu0 %v4528_v38  ;;  %754 = vmatprep.mubr.bf16.mxu0 %v4545_v54 }
  0x2e   :  { %714 = vmatmul.mubr.bf16.vlgmr.msra.gmra.mrb[0].mxu1 %v4525_v35  ;;  %4143 = vmatprep.subr.bf16.mxu0 %v4529_v39 }
  0x2f   :  { %4234 = vmatprep.mubr.msk.f32.mxu1 %vm4879_vm0, %v4880_v42  ;;  %4380 = vmatpush3.bf16.msra.mxu1 %v5143_v52 }
  0x30   :  { %4381 = vmatprep.subr.bf16.mxu1 %v4878_v37 }
  0x31   :  { %4144 = vmatpush3.bf16.msra.mxu0 %v4530_v40 }
  0x32   :  { %4145 = vmatprep.subr.bf16.mxu0 %v4531_v41 }
  0x35   :  { %4146 = vmatpush3.bf16.msra.mxu0 %v4532_v43 }
  0x36   :  { %4147 = vmatprep.subr.bf16.mxu0 %v4533_v44  ;;  %4235 = vmatmul.mubr.f32.vlgmr.msra.gmra.mrb[4].mxu1 %v4880_v42 }
  0x37   :  { %4383 = vmatpush3.bf16.msra.mxu1 %v5143_v52  ;;  %4241 = vmatprep.mubr.msk.f32.mxu1 %vm4879_vm0, %v4880_v42 }
  0x38   :  { %4384 = vmatprep.subr.bf16.mxu1 %v4878_v37 }
  0x39   :  { %4148 = vmatpush3.bf16.msra.mxu0 %v4534_v45 }
  0x3a   :  { %4149 = vmatprep.subr.bf16.mxu0 %v4535_v46 }
  0x3d   :  { %4150 = vmatpush3.bf16.msra.mxu0 %v4536_v47 }
  0x3e   :  { %4151 = vmatprep.subr.bf16.mxu0 %v4537_v48 }
  0x41   :  { %4152 = vmatpush3.bf16.msra.mxu0 %v4538_v51 }
  0x42   :  { %4153 = vmatprep.subr.bf16.mxu0 %v4539_v53 }
  0x45   :  { %4154 = vmatpush3.bf16.msra.mxu0 %v4540_v55 }
  0x46   :  { %4155 = vmatprep.subr.bf16.mxu0 %v4541_v56 }
  0x49   :  { %4156 = vmatpush3.bf16.msra.mxu0 %v4542_v57 }
  0x4c   :  { %755 = vmatmul.mubr.bf16.vlgmr.msra.gmra.mrb[4].mxu0 %v4543_v58 }
  0x4d   :  { %26 = vsyncpa [#allocation4], 0  ;;  %v3864_v60 = vld [vmem:[%s6194_s4] ss:$0 sm:$0xff]  ;;  %s4881_s4 = smov 96   ;;  %s4882_s20 = smov 16  }
  0x4e   :  { %s4883_s25 = smov 32   ;;  %s4884_s23 = smov 80   ;;  %vm768_vm1 = vcmask 130048   ;;  %vm172_vm2 = vcmask 7168   ;;  %vm1601_vm3 = vcmask 1041409   ;;  %vm2333_vm4 = vcmask 785408  }
  0x4f   :  { %s6220_s22 = sld [smem:[#allocation9_spill]]  ;;  %s6221_s26 = sld [smem:[#allocation8_spill]]  ;;  %vm2312_vm5 = vcmask 523264   ;;  %vm3171_vm6 = vcmask 1041408   ;;  %vm2419_vm7 = vcmask 123904   ;;  %vm3549_vm8 = vcmask 9216  }
  0x50   :  { %vm3563_vm9 = vcmask 1024   ;;  %vm3828_vm10 = vcmask 15360  }
  0xff   :  { %v4113_v59 = vpop.f32.mrb[0].mxu0 }
 0x100   :  { %v4114_v61 = vpop.f32.mrb[1].mxu0 }
 0x101   :  { %v4115_v62 = vadd.f32 %v4114_v61, %v4113_v59  ;;  %v4116_v63 = vpop.f32.mrb[2].mxu0  ;;  %v4135_v0 = vpop.f32.mrb[0].mxu1 }
 0x102   :  { %v4117_v1 = vpop.f32.mrb[3].mxu0  ;;  %v4136_v4 = vpop.f32.mrb[1].mxu1 }
 0x103   :  { %v675_v2 = vadd.f32 %v4115_v62, %v3864_v60  ;;  %v4118_v3 = vadd.f32 %v4117_v1, %v4116_v63  ;;  %v4137_v5 = vadd.f32 %v4136_v4, %v4135_v0  ;;  %v4138_v6 = vpop.f32.mrb[2].mxu1 }
 0x104   :  { %v4139_v8 = vpop.f32.mrb[3].mxu1 }
 0x105   :  { %v678_v7 = vadd.f32 %v4118_v3, %v3864_v60  ;;  %v716_v9 = vadd.f32 %v4137_v5, %v675_v2  ;;  %v4140_v10 = vadd.f32 %v4139_v8, %v4138_v6 }
 0x107   :  { %v719_v11 = vadd.f32 %v4140_v10, %v678_v7 }
 0x109   :  { %v838_v12 = vpop.f32.mrb[4].mxu1 }
 0x10a   :  { %v4236_v13 = vpop.f32.mrb[5].mxu1 }
 0x11f   :  { %v4157_v14 = vpop.f32.mrb[4].mxu0 }
 0x120   :  { %v4158_v15 = vpop.f32.mrb[5].mxu0 }
 0x121   :  { %v4159_v16 = vadd.f32 %v4158_v15, %v4157_v14  ;;  %v4160_v17 = vpop.f32.mrb[6].mxu0 }
 0x122   :  { %v4161_v18 = vpop.f32.mrb[7].mxu0 }
 0x123   :  { %v5173_v19 = vadd.f32 %v4159_v16, %v716_v9  ;;  %v4162_v20 = vadd.f32 %v4161_v18, %v4160_v17 }
 0x125   :  { %v842_v21 = vadd.f32 %v838_v12, %v5173_v19  ;;  %v5176_v22 = vadd.f32 %v4162_v20, %v719_v11 }
 0x127   :  { %4770 = vtanh.f32 %v842_v21  ;;  %v3919_v24 = vmul.f32 -1.442695, %v842_v21 }
 0x129   :  { %4772 = vpow2.f32 %v3919_v24 }
 0x131   :  { %v4771_v23 = vpop.eup %4770 }
 0x132   :  { %852 = vrot.lane.b32.xlu0 %v4771_v23, %s4881_s4 }
 0x133   :  { %v4773_v25 = vpop.eup %4772 }
 0x134   :  { %v846_v26 = vadd.f32 1.0, %v4773_v25 }
 0x136   :  { %4774 = vrcp.f32 %v846_v26 }
 0x140   :  { %v4775_v27 = vpop.eup %4774 }
 0x141   :  { %v850_v30 = vmul.f32 0.0, %v4775_v27 }
 0x1a4   :  { %v853_v28 = vpop.permute.xlu0 %852 }
 0x1a5   :  { %v855_v29 = vmul.f32 %v4775_v27, %v853_v28 }
 0x1a7   :  { %857 = vrot.lane.b32.xlu0 %v855_v29, %s4882_s20 }
 0x219   :  { %v858_v31 = vpop.permute.xlu0 %857 }
 0x21a   :  { %v860_v32 = vadd.f32 %v858_v31, %v850_v30 }
 0x21c   :  { %4776 = vtanh.f32 %v860_v32  ;;  %v954_v50 = vrot.slane %v860_v32, 6  ;;  %v766_v32 = vld [vmem:[%s6196_s6 + $0x8] sm:$0xff] }
 0x226   :  { %v4777_v33 = vpop.eup %4776 }
 0x227   :  { %863 = vrot.lane.b32.xlu1 %v4777_v33, %s4883_s25 }
 0x299   :  { %v864_v34 = vpop.permute.xlu1 %863 }
 0x29a   :  { %v866_v35 = vmul.f32 %v4775_v27, %v864_v34 }
 0x29c   :  { %868 = vrot.lane.b32.xlu1 %v866_v35, %s4884_s23 }
 0x30e   :  { %v869_v36 = vpop.permute.xlu1 %868 }
 0x30f   :  { %4242 = vmatmul.mubr.msk.f32.vlgmr.msra.gmra.mrb[6].mxu1 %vm768_vm1, %v869_v36 }
 0x310   :  { %4386 = vmatpush3.bf16.msra.mxu1 %v5143_v52  ;;  %4248 = vmatprep.mubr.msk.f32.mxu1 %vm4879_vm0, %v4880_v42 }
 0x311   :  { %4387 = vmatprep.subr.bf16.mxu1 %v4878_v37 }
 0x3e2   :  { %v938_v38 = vpop.f32.mrb[6].mxu1 }
 0x3e3   :  { %v943_v39 = vrot.slane %v938_v38, 6  ;;  %v4243_v40 = vpop.f32.mrb[7].mxu1 }
 0x3e4   :  { %v3929_v40 = vld [vmem:[%s6195_s5 + $0x18] sm:$0xff] }
 0x3e5   :  { %v945_v41 = vadd.f32 %v943_v39, %v5173_v19  ;;  %v3928_v39 = vld [vmem:[%s6195_s5 + $0x10] sm:$0xff]  ;;  %s4885_s5 = smov 64  }
 0x3e7   :  { %4778 = vtanh.f32 %v945_v41  ;;  %v3921_v44 = vmul.f32 -1.442695, %v945_v41  ;;  %v4394_v41 = vpack.c.bf16 %v3929_v40, %v3928_v39  ;;  %v4584_v39 = vld [vmem:[%s6198_s8 + $0xc4] ss:$8 sps:$4 sm:$0xff]   ;;  %v4582_v40 = vld [vmem:[%s6198_s8 + $0xc0] ss:$8 sps:$4 sm:$0xff]  }
 0x3e9   :  { %4780 = vpow2.f32 %v3921_v44 }
 0x3f1   :  { %v4779_v43 = vpop.eup %4778 }
 0x3f2   :  { %958 = vrot.lane.b32.xlu0 %v4779_v43, %s4881_s4 }
 0x3f3   :  { %v4781_v45 = vpop.eup %4780 }
 0x3f4   :  { %v949_v46 = vadd.f32 1.0, %v4781_v45 }
 0x3f6   :  { %4782 = vrcp.f32 %v949_v46 }
 0x400   :  { %v4783_v47 = vpop.eup %4782 }
 0x401   :  { %v956_v51 = vmul.f32 %v4783_v47, %v954_v50 }
 0x464   :  { %v959_v48 = vpop.permute.xlu0 %958 }
 0x465   :  { %v961_v49 = vmul.f32 %v4783_v47, %v959_v48  ;;  %v76_v48 = vld [vmem:[%s6220_s22] sm:$0xff] }
 0x467   :  { %963 = vrot.lane.b32.xlu1 %v961_v49, %s4882_s20  ;;  %v173_v49 = vsel %vm172_vm2, %v76_v48, 0.0 }
 0x468   :  { %v174_v50 = vrot.slane %v173_v49, 4 }
 0x4d9   :  { %v964_v53 = vpop.permute.xlu1 %963 }
 0x4da   :  { %v966_v54 = vadd.f32 %v964_v53, %v956_v51  ;;  %v5239_v51 = vld [vmem:[%s6220_s22 + $0x8] sm:$0xff]  ;;  %v175_v53 = vadd.f32 %v174_v50, %v173_v49 }
 0x4dc   :  { %4784 = vtanh.f32 %v966_v54  ;;  %v1061_v6 = vrot.slane %v966_v54, 6  ;;  %v180_v54 = vsel %vm172_vm2, %v5239_v51, 0.0 }
 0x4e6   :  { %v4785_v55 = vpop.eup %4784 }
 0x4e7   :  { %969 = vrot.lane.b32.xlu0 %v4785_v55, %s4883_s25  ;;  %v181_v55 = vrot.slane %v180_v54, 4 }
 0x559   :  { %v970_v56 = vpop.permute.xlu0 %969 }
 0x55a   :  { %v972_v57 = vmul.f32 %v4783_v47, %v970_v56  ;;  %v176_v56 = vrot.slane %v175_v53, 2 }
 0x55c   :  { %v974_v58 = vrot.slane %v972_v57, 2  ;;  %v182_v57 = vadd.f32 %v181_v55, %v180_v54  ;;  %v4590_v54 = vld [vmem:[%s6198_s8 + $0xe4] ss:$8 sps:$4 sm:$0xff]  }
 0x55e   :  { %975 = vrot.lane.b32.xlu1 %v974_v58, %s4884_s23  ;;  %v177_v58 = vadd.f32 %v176_v56, %v175_v53 }
 0x5d0   :  { %v976_v59 = vpop.permute.xlu1 %975 }
 0x5d1   :  { %4249 = vmatmul.mubr.msk.f32.vlgmr.msra.gmra.mrb[8].mxu1 %vm768_vm1, %v976_v59 }
 0x5d2   :  { %4389 = vmatpush3.bf16.msra.mxu1 %v5143_v52  ;;  %4255 = vmatprep.mubr.msk.f32.mxu1 %vm4879_vm0, %v4880_v42 }
 0x5d3   :  { %4390 = vmatprep.subr.bf16.mxu1 %v4878_v37 }
 0x6a4   :  { %v1045_v60 = vpop.f32.mrb[8].mxu1 }
 0x6a5   :  { %v1050_v61 = vrot.slane %v1045_v60, 4  ;;  %v4250_v62 = vpop.f32.mrb[9].mxu1  ;;  %v183_v60 = vrot.slane %v182_v57, 2 }
 0x6a7   :  { %v1052_v63 = vadd.f32 %v1050_v61, %v5173_v19  ;;  %v178_v61 = vrot.slane %v177_v58, 1 }
 0x6a9   :  { %4786 = vtanh.f32 %v1052_v63  ;;  %v3923_v1 = vmul.f32 -1.442695, %v1052_v63  ;;  %v184_v63 = vadd.f32 %v183_v60, %v182_v57  ;;  %v4588_v57 = vld [vmem:[%s6198_s8 + $0xe0] ss:$8 sps:$4 sm:$0xff]  }
 0x6ab   :  { %4788 = vpow2.f32 %v3923_v1  ;;  %v4886_v1 = vmov 0  }
 0x6ac   :  { %4483 = vset.pattern.permute.xlu0 %v4886_v1  ;;  %4482 = vset.pattern.permute.xlu1 %v4886_v1 }
 0x6b3   :  { %v4787_v0 = vpop.eup %4786 }
 0x6b4   :  { %1065 = vrot.lane.b32.xlu0 %v4787_v0, %s4881_s4  ;;  %v179_v0 = vadd.f32 %v178_v61, %v177_v58 }
 0x6b5   :  { %v4789_v2 = vpop.eup %4788 }
 0x6b6   :  { %v1056_v3 = vadd.f32 1.0, %v4789_v2  ;;  %v185_v2 = vrot.slane %v184_v63, 1 }
 0x6b8   :  { %4790 = vrcp.f32 %v1056_v3  ;;  %v187_v3 = vadd.f32 1e-08, %v179_v0 }
 0x6c2   :  { %v4791_v52 = vpop.eup %4790 }
 0x6c3   :  { %v1063_v7 = vmul.f32 %v4791_v52, %v1061_v6 }
 0x726   :  { %v1066_v4 = vpop.permute.xlu0 %1065 }
 0x727   :  { %v1068_v5 = vmul.f32 %v4791_v52, %v1066_v4  ;;  %v4546_v4 = vld [vmem:[%s6198_s8] ss:$8 sps:$4 sm:$0xff]  }
 0x729   :  { %1070 = vrot.lane.b32.xlu1 %v1068_v5, %s4882_s20  ;;  %v4548_v5 = vld [vmem:[%s6198_s8 + $0x4] ss:$8 sps:$4 sm:$0xff]  }
 0x72a   :  { %2100 = vmatprep.subr.bf16.mxu0 %v4548_v5 }
 0x72b   :  { %2101 = vmatpush1.bf16.msra.mxu0 %v4546_v4 }
 0x79b   :  { %v1071_v8 = vpop.permute.xlu1 %1070 }
 0x79c   :  { %v1073_v9 = vadd.f32 %v1071_v8, %v1063_v7  ;;  %v4549_v7 = vld [vmem:[%s6198_s8 + $0x10] ss:$8 sps:$4 sm:$0xff]   ;;  %v4554_v8 = vld [vmem:[%s6198_s8 + $0x24] ss:$8 sps:$4 sm:$0xff]  }
 0x79e   :  { %4792 = vtanh.f32 %v1073_v9  ;;  %v1168_v28 = vrot.slane %v1073_v9, 6 }
 0x7a8   :  { %v4793_v10 = vpop.eup %4792 }
 0x7a9   :  { %1076 = vrot.lane.b32.xlu0 %v4793_v10, %s4883_s25  ;;  %v4552_v10 = vld [vmem:[%s6198_s8 + $0x20] ss:$8 sps:$4 sm:$0xff]  }
 0x81b   :  { %v1077_v11 = vpop.permute.xlu0 %1076 }
 0x81c   :  { %v1079_v12 = vmul.f32 %v4791_v52, %v1077_v11  ;;  %v186_v52 = vadd.f32 %v185_v2, %v184_v63  ;;  %v4557_v11 = vld [vmem:[%s6198_s8 + $0x34] ss:$8 sps:$4 sm:$0xff]  }
 0x81e   :  { %v1081_v13 = vrot.slane %v1079_v12, 4  ;;  %v188_v6 = vadd.f32 1e-08, %v186_v52  ;;  %v4555_v12 = vld [vmem:[%s6198_s8 + $0x30] ss:$8 sps:$4 sm:$0xff]  }
 0x820   :  { %1082 = vrot.lane.b32.xlu1 %v1081_v13, %s4884_s23 }
 0x892   :  { %v1083_v14 = vpop.permute.xlu1 %1082 }
 0x893   :  { %4256 = vmatmul.mubr.msk.f32.vlgmr.msra.gmra.mrb[10].mxu1 %vm768_vm1, %v1083_v14  ;;  %v4560_v14 = vld [vmem:[%s6198_s8 + $0x44] ss:$8 sps:$4 sm:$0xff]  }
 0x894   :  { %4262 = vmatprep.mubr.msk.f32.mxu1 %vm4879_vm0, %v4880_v42 }
 0x966   :  { %v1152_v15 = vpop.f32.mrb[10].mxu1 }
 0x967   :  { %v1157_v16 = vrot.slane %v1152_v15, 2  ;;  %v4257_v17 = vpop.f32.mrb[11].mxu1  ;;  %v4558_v15 = vld [vmem:[%s6198_s8 + $0x40] ss:$8 sps:$4 sm:$0xff]  }
 0x968   :  { %v4563_v17 = vld [vmem:[%s6198_s8 + $0x54] ss:$8 sps:$4 sm:$0xff]  }
 0x969   :  { %v1159_v18 = vadd.f32 %v1157_v16, %v5173_v19  ;;  %v765_v19 = vld [vmem:[%s6196_s6] sm:$0xff] }
 0x96a   :  { %v4391_v33 = vpack.c.bf16 %v766_v32, %v765_v19 }
 0x96b   :  { %4794 = vtanh.f32 %v1159_v18  ;;  %v3925_v21 = vmul.f32 -1.442695, %v1159_v18  ;;  %v4561_v18 = vld [vmem:[%s6198_s8 + $0x50] ss:$8 sps:$4 sm:$0xff]  }
 0x96c   :  { %4392 = vmatpush3.bf16.msra.mxu1 %v4391_v33 }
 0x96d   :  { %4796 = vpow2.f32 %v3925_v21  ;;  %4393 = vmatprep.subr.bf16.mxu1 %v4878_v37 }
 0x975   :  { %v4795_v20 = vpop.eup %4794 }
 0x976   :  { %1172 = vrot.lane.b32.xlu0 %v4795_v20, %s4881_s4 }
 0x977   :  { %v4797_v23 = vpop.eup %4796 }
 0x978   :  { %v1163_v24 = vadd.f32 1.0, %v4797_v23 }
 0x97a   :  { %4798 = vrcp.f32 %v1163_v24  ;;  %v4566_v24 = vld [vmem:[%s6198_s8 + $0x64] ss:$8 sps:$4 sm:$0xff]  }
 0x984   :  { %v4799_v25 = vpop.eup %4798 }
 0x985   :  { %v1170_v29 = vmul.f32 %v4799_v25, %v1168_v28  ;;  %v4572_v28 = vld [vmem:[%s6198_s8 + $0x84] ss:$8 sps:$4 sm:$0xff]  }
 0x9e8   :  { %v1173_v26 = vpop.permute.xlu0 %1172 }
 0x9e9   :  { %v1175_v27 = vmul.f32 %v4799_v25, %v1173_v26  ;;  %v4567_v26 = vld [vmem:[%s6198_s8 + $0x70] ss:$8 sps:$4 sm:$0xff]  }
 0x9eb   :  { %1177 = vrot.lane.b32.xlu1 %v1175_v27, %s4882_s20  ;;  %v4569_v27 = vld [vmem:[%s6198_s8 + $0x74] ss:$8 sps:$4 sm:$0xff]  }
 0xa5d   :  { %v1178_v30 = vpop.permute.xlu1 %1177 }
 0xa5e   :  { %v1180_v31 = vadd.f32 %v1178_v30, %v1170_v29  ;;  %v4570_v29 = vld [vmem:[%s6198_s8 + $0x80] ss:$8 sps:$4 sm:$0xff]   ;;  %v4575_v30 = vld [vmem:[%s6198_s8 + $0x94] ss:$8 sps:$4 sm:$0xff]  }
 0xa60   :  { %4800 = vtanh.f32 %v1180_v31  ;;  %v4573_v31 = vld [vmem:[%s6198_s8 + $0x90] ss:$8 sps:$4 sm:$0xff]  }
 0xa6a   :  { %v4801_v34 = vpop.eup %4800 }
 0xa6b   :  { %1183 = vrot.lane.b32.xlu0 %v4801_v34, %s4883_s25  ;;  %v4576_v34 = vld [vmem:[%s6198_s8 + $0xa0] ss:$8 sps:$4 sm:$0xff]  }
 0xadd   :  { %v1184_v35 = vpop.permute.xlu0 %1183 }
 0xade   :  { %v1186_v36 = vmul.f32 %v4799_v25, %v1184_v35  ;;  %v4564_v25 = vld [vmem:[%s6198_s8 + $0x60] ss:$8 sps:$4 sm:$0xff]   ;;  %v4578_v35 = vld [vmem:[%s6198_s8 + $0xa4] ss:$8 sps:$4 sm:$0xff]  }
 0xae0   :  { %v1194_v38 = vrot.slane %v1186_v36, 6  ;;  %v4581_v36 = vld [vmem:[%s6198_s8 + $0xb4] ss:$8 sps:$4 sm:$0xff]  }
 0xae2   :  { %1195 = vrot.lane.b32.xlu1 %v1194_v38, %s4884_s23  ;;  %v4579_v38 = vld [vmem:[%s6198_s8 + $0xb0] ss:$8 sps:$4 sm:$0xff]  }
 0xb54   :  { %v1196_v43 = vpop.permute.xlu1 %1195 }
 0xb55   :  { %4263 = vmatmul.mubr.msk.f32.vlgmr.msra.gmra.mrb[12].mxu1 %vm768_vm1, %v1196_v43  ;;  %v4585_v43 = vld [vmem:[%s6198_s8 + $0xd0] ss:$8 sps:$4 sm:$0xff]  }
 0xb56   :  { %4395 = vmatpush3.bf16.msra.mxu1 %v4394_v41  ;;  %4269 = vmatprep.mubr.msk.f32.mxu1 %vm4879_vm0, %v4880_v42  ;;  %v66_v41 = vld [vmem:[%s6221_s26 + $0x10] sm:$0xff] }
 0xb57   :  { %4396 = vmatprep.subr.bf16.mxu1 %v4878_v37 }
 0xb59   :  { %4270 = vmatmul.mubr.f32.vlgmr.msra.gmra.mrb[14].mxu1 %v4880_v42 }
 0xb5a   :  { %4276 = vmatprep.mubr.msk.f32.mxu1 %vm4879_vm0, %v4880_v42 }
 0xc28   :  { %v5230_v44 = vpop.f32.mrb[12].mxu1 }
 0xc29   :  { %v4264_v45 = vpop.f32.mrb[13].mxu1 }
 0xc2a   :  { %v4587_v45 = vld [vmem:[%s6198_s8 + $0xd4] ss:$8 sps:$4 sm:$0xff]  }
 0xc2c   :  { %v1343_v46 = vpop.f32.mrb[14].mxu1 }
 0xc2d   :  { %1348 = vrot.lane.b32.xlu0 %v1343_v46, %s4885_s5  ;;  %v4271_v47 = vpop.f32.mrb[15].mxu1  ;;  %v68_v46 = vld [vmem:[%s6221_s26 + $0x20] sm:$0xff] }
 0xc2e   :  { %v69_v47 = vld [vmem:[%s6221_s26 + $0x28] sm:$0xff] }
 0xc9f   :  { %v1349_v59 = vpop.permute.xlu0 %1348 }
 0xca0   :  { %v1351_v62 = vadd.f32 %v1349_v59, %v5176_v22  ;;  %v4551_v22 = vld [vmem:[%s6198_s8 + $0x14] ss:$8 sps:$4 sm:$0xff]  }
 0xca1   :  { %2102 = vmatprep.subr.bf16.mxu0 %v4551_v22  ;;  %v4593_v59 = vld [vmem:[%s6198_s8 + $0xf4] ss:$8 sps:$4 sm:$0xff]   ;;  %v4596_v22 = vld [vmem:[%s6198_s8 + $0x104] ss:$8 sps:$4 sm:$0xff]  }
 0xca2   :  { %4802 = vtanh.f32 %v1351_v62  ;;  %2103 = vmatpush1.bf16.msra.mxu0 %v4549_v7  ;;  %v3933_v20 = vmul.f32 -1.442695, %v1351_v62  ;;  %v4591_v62 = vld [vmem:[%s6198_s8 + $0xf0] ss:$8 sps:$4 sm:$0xff]  }
 0xca3   :  { %4804 = vrcp.f32 %v187_v3  ;;  %2104 = vmatprep.subr.bf16.mxu0 %v4554_v8 }
 0xca4   :  { %4806 = vrcp.f32 %v188_v6 }
 0xca5   :  { %4808 = vpow2.f32 %v3933_v20 }
 0xca6   :  { %2105 = vmatpush1.bf16.msra.mxu0 %v4552_v10 }
 0xca7   :  { %2106 = vmatprep.subr.bf16.mxu0 %v4557_v11 }
 0xcaa   :  { %2107 = vmatpush1.bf16.msra.mxu0 %v4555_v12 }
 0xcab   :  { %2108 = vmatprep.subr.bf16.mxu0 %v4560_v14 }
 0xcac   :  { %v4803_v9 = vpop.eup %4802 }
 0xcad   :  { %1361 = vrot.lane.b32.xlu1 %v4803_v9, %s4881_s4  ;;  %v4805_v13 = vpop.eup %4804 }
 0xcae   :  { %v4807_v16 = vpop.eup %4806  ;;  %2109 = vmatpush1.bf16.msra.mxu0 %v4558_v15  ;;  %v64_v15 = vld [vmem:[%s6221_s26] sm:$0xff] }
 0xcaf   :  { %2110 = vmatprep.subr.bf16.mxu0 %v4563_v17  ;;  %v4809_v21 = vpop.eup %4808  ;;  %v67_v17 = vld [vmem:[%s6221_s26 + $0x18] sm:$0xff] }
 0xcb0   :  { %v1355_v23 = vadd.f32 1.0, %v4809_v21 }
 0xcb1   :  { %80 = vperm.xlu1 %4482, %v76_v48  }
 0xcb2   :  { %2111 = vmatpush1.bf16.msra.mxu0 %v4561_v18  ;;  %4810 = vrcp.f32 %v1355_v23 }
 0xcb3   :  { %2112 = vmatprep.subr.bf16.mxu0 %v4566_v24 }
 0xcb5   :  { %193 = vperm.xlu1 %4482, %v4805_v13  }
 0xcb6   :  { %2113 = vmatpush1.bf16.msra.mxu0 %v4564_v25 }
 0xcb7   :  { %2114 = vmatprep.subr.bf16.mxu0 %v4569_v27 }
 0xcb9   :  { %198 = vperm.xlu1 %4482, %v4807_v16   ;;  %v65_v16 = vld [vmem:[%s6221_s26 + $0x8] sm:$0xff] }
 0xcba   :  { %2115 = vmatpush1.bf16.msra.mxu0 %v4567_v26 }
 0xcbb   :  { %2116 = vmatprep.subr.bf16.mxu0 %v4572_v28 }
 0xcbc   :  { %v5306_v19 = vpop.eup %4810 }
 0xcbd   :  { %v1359_v23 = vmul.f32 0.0, %v5306_v19 }
 0xcbe   :  { %2117 = vmatpush1.bf16.msra.mxu0 %v4570_v29 }
 0xcbf   :  { %2118 = vmatprep.subr.bf16.mxu0 %v4575_v30 }
 0xcc2   :  { %2119 = vmatpush1.bf16.msra.mxu0 %v4573_v31 }
 0xcc3   :  { %2120 = vmatprep.subr.bf16.mxu0 %v4578_v35 }
 0xcc6   :  { %2121 = vmatpush1.bf16.msra.mxu0 %v4576_v34 }
 0xcc7   :  { %2122 = vmatprep.subr.bf16.mxu0 %v4581_v36 }
 0xcca   :  { %2123 = vmatpush1.bf16.msra.mxu0 %v4579_v38 }
 0xccb   :  { %2124 = vmatprep.subr.bf16.mxu0 %v4584_v39 }
 0xcce   :  { %2125 = vmatpush1.bf16.msra.mxu0 %v4582_v40  ;;  %v70_v40 = vld [vmem:[%s6221_s26 + $0x30] sm:$0xff] }
 0xccf   :  { %2126 = vmatprep.subr.bf16.mxu0 %v4587_v45 }
 0xcd2   :  { %2127 = vmatpush1.bf16.msra.mxu0 %v4585_v43  ;;  %v73_v43 = vld [vmem:[%s6221_s26 + $0x48] sm:$0xff] }
 0xcd3   :  { %2128 = vmatprep.subr.bf16.mxu0 %v4590_v54 }
 0xcd6   :  { %2129 = vmatpush1.bf16.msra.mxu0 %v4588_v57 }
 0xcd7   :  { %2130 = vmatprep.subr.bf16.mxu0 %v4593_v59 }
 0xcda   :  { %2131 = vmatpush1.bf16.msra.mxu0 %v4591_v62 }
 0xcdb   :  { %2141 = vmatprep.subr.bf16.mxu0 %v4596_v22 }
 0xd1f   :  { %v1362_v32 = vpop.permute.xlu1 %1361 }
 0xd20   :  { %v1364_v33 = vmul.f32 %v5306_v19, %v1362_v32 }
 0xd22   :  { %1366 = vrot.lane.b32.xlu0 %v1364_v33, %s4882_s20 }
 0xd26   :  { %85 = vperm.xlu0 %4483, %v5239_v51  }
 0xd30   :  { %v81_v48 = vpop.permute.xlu1 %80 }
 0xd31   :  { %v90_v49 = vmul.f32 %v81_v48, %v66_v41  ;;  %v92_v50 = vmul.f32 %v81_v48, %v68_v46  ;;  %v93_v51 = vmul.f32 %v81_v48, %v69_v47  ;;  %v88_v18 = vmul.f32 %v81_v48, %v64_v15  ;;  %v71_v41 = vld [vmem:[%s6221_s26 + $0x38] sm:$0xff] }
 0xd32   :  { %v89_v20 = vmul.f32 %v81_v48, %v65_v16  ;;  %v91_v21 = vmul.f32 %v81_v48, %v67_v17 }
 0xd33   :  { %v112_v53 = vrot.slane %v90_v49, 4  ;;  %v124_v55 = vrot.slane %v92_v50, 4  ;;  %v130_v56 = vrot.slane %v93_v51, 4  ;;  %v100_v26 = vrot.slane %v88_v18, 4 }
 0xd34   :  { %v194_v9 = vpop.permute.xlu1 %193  ;;  %v106_v27 = vrot.slane %v89_v20, 4  ;;  %v118_v28 = vrot.slane %v91_v21, 4 }
 0xd35   :  { %v113_v58 = vadd.f32 %v112_v53, %v90_v49  ;;  %v125_v60 = vadd.f32 %v124_v55, %v92_v50  ;;  %v131_v61 = vadd.f32 %v130_v56, %v93_v51  ;;  %v101_v29 = vadd.f32 %v100_v26, %v88_v18 }
 0xd36   :  { %v107_v30 = vadd.f32 %v106_v27, %v89_v20  ;;  %v119_v31 = vadd.f32 %v118_v28, %v91_v21 }
 0xd37   :  { %v114_v63 = vrot.slane %v113_v58, 2  ;;  %v126_v0 = vrot.slane %v125_v60, 2  ;;  %v132_v2 = vrot.slane %v131_v61, 2  ;;  %v102_v32 = vrot.slane %v101_v29, 2 }
 0xd38   :  { %v108_v33 = vrot.slane %v107_v30, 2  ;;  %v120_v34 = vrot.slane %v119_v31, 2 }
 0xd39   :  { %v115_v3 = vadd.f32 %v114_v63, %v113_v58  ;;  %v127_v52 = vadd.f32 %v126_v0, %v125_v60  ;;  %v133_v4 = vadd.f32 %v132_v2, %v131_v61  ;;  %v103_v36 = vadd.f32 %v102_v32, %v101_v29 }
 0xd3a   :  { %v109_v38 = vadd.f32 %v108_v33, %v107_v30  ;;  %v121_v39 = vadd.f32 %v120_v34, %v119_v31 }
 0xd3b   :  { %v116_v5 = vrot.slane %v115_v3, 1  ;;  %v128_v6 = vrot.slane %v127_v52, 1  ;;  %v134_v7 = vrot.slane %v133_v4, 1  ;;  %v104_v46 = vrot.slane %v103_v36, 1 }
 0xd3c   :  { %v110_v47 = vrot.slane %v109_v38, 1  ;;  %v122_v51 = vrot.slane %v121_v39, 1 }
 0xd3d   :  { %v117_v8 = vadd.f32 %v116_v5, %v115_v3  ;;  %v129_v10 = vadd.f32 %v128_v6, %v127_v52  ;;  %v135_v11 = vadd.f32 %v134_v7, %v133_v4  ;;  %v105_v56 = vadd.f32 %v104_v46, %v103_v36  ;;  %v3931_v46 = vld [vmem:[%s6196_s6 + $0x18] sm:$0xff] }
 0xd3e   :  { %v111_v57 = vadd.f32 %v110_v47, %v109_v38  ;;  %v123_v61 = vadd.f32 %v122_v51, %v121_v39  ;;  %v4594_v38 = vld [vmem:[%s6198_s8 + $0x100] ss:$8 sps:$4 sm:$0xff]   ;;  %v4597_v47 = vld [vmem:[%s6198_s8 + $0x110] ss:$8 sps:$4 sm:$0xff]   ;;  %v4605_v51 = vld [vmem:[%s6198_s8 + $0x134] ss:$8 sps:$4 sm:$0xff]  }
 0xd3f   :  { %v5359_v12 = vmul.f32 %v194_v9, %v117_v8  ;;  %v5361_v13 = vmul.f32 %v194_v9, %v129_v10  ;;  %v5363_v14 = vmul.f32 %v194_v9, %v135_v11  ;;  %v5390_v2 = vmul.f32 %v194_v9, %v105_v56  ;;  %v5396_v10 = vpop.permute.xlu1 %198  ;;  %v72_v56 = vld [vmem:[%s6221_s26 + $0x40] sm:$0xff] }
 0xd40   :  { %v5392_v3 = vmul.f32 %v194_v9, %v111_v57  ;;  %v5394_v52 = vmul.f32 %v194_v9, %v123_v61  ;;  %v4611_v57 = vld [vmem:[%s6198_s8 + $0x154] ss:$8 sps:$4 sm:$0xff]  }
 0xd41   :  { %v1457_v15 = vpack.c.bf16 %v5390_v2, %v5390_v2 }
 0xd42   :  { %v1458_v11 = vpack.c.bf16 %v5392_v3, %v5392_v3  ;;  %v1460_v9 = vpack.c.bf16 %v5394_v52, %v5394_v52 }
 0xd44   :  { %v1592_v29 = vunpack.c.l.b16 %v1460_v9  ;;  %v4621_v9 = vld [vmem:[%s6198_s8 + $0x190] ss:$8 sps:$4 sm:$0xff]  }
 0xd94   :  { %v1367_v24 = vpop.permute.xlu0 %1366 }
 0xd95   :  { %v1369_v25 = vadd.f32 %v1367_v24, %v1359_v23  ;;  %v1590_v24 = vunpack.c.l.b16 %v1458_v11 }
 0xd97   :  { %4812 = vtanh.f32 %v1369_v25  ;;  %v1589_v25 = vunpack.c.l.b16 %v1457_v15  ;;  %v4618_v15 = vld [vmem:[%s6198_s8 + $0x180] ss:$8 sps:$4 sm:$0xff]  }
 0xda1   :  { %v4813_v35 = vpop.eup %4812 }
 0xda2   :  { %1372 = vrot.lane.b32.xlu0 %v4813_v35, %s4883_s25 }
 0xda5   :  { %v5385_v45 = vpop.permute.xlu0 %85 }
 0xda6   :  { %v94_v48 = vmul.f32 %v5385_v45, %v70_v40  ;;  %v95_v49 = vmul.f32 %v5385_v45, %v71_v41  ;;  %v97_v50 = vmul.f32 %v5385_v45, %v73_v43  ;;  %v4599_v41 = vld [vmem:[%s6198_s8 + $0x114] ss:$8 sps:$4 sm:$0xff]  }
 0xda7   :  { %v3930_v43 = vld [vmem:[%s6196_s6 + $0x10] sm:$0xff] }
 0xda8   :  { %v136_v53 = vrot.slane %v94_v48, 4  ;;  %v142_v54 = vrot.slane %v95_v49, 4  ;;  %v154_v55 = vrot.slane %v97_v50, 4 }
 0xdaa   :  { %v137_v58 = vadd.f32 %v136_v53, %v94_v48  ;;  %v143_v59 = vadd.f32 %v142_v54, %v95_v49  ;;  %v155_v60 = vadd.f32 %v154_v55, %v97_v50  ;;  %v4397_v48 = vpack.c.bf16 %v3931_v46, %v3930_v43  ;;  %v4602_v49 = vld [vmem:[%s6198_s8 + $0x124] ss:$8 sps:$4 sm:$0xff]   ;;  %v4600_v50 = vld [vmem:[%s6198_s8 + $0x120] ss:$8 sps:$4 sm:$0xff]   ;;  %v4603_v53 = vld [vmem:[%s6198_s8 + $0x130] ss:$8 sps:$4 sm:$0xff]  }
 0xdab   :  { %v4608_v54 = vld [vmem:[%s6198_s8 + $0x144] ss:$8 sps:$4 sm:$0xff]   ;;  %v4606_v55 = vld [vmem:[%s6198_s8 + $0x140] ss:$8 sps:$4 sm:$0xff]   ;;  %v1462_v46 = vpack.c.bf16 %v5363_v14, %v5363_v14 }
 0xdac   :  { %v138_v62 = vrot.slane %v137_v58, 2  ;;  %v144_v63 = vrot.slane %v143_v59, 2  ;;  %v156_v0 = vrot.slane %v155_v60, 2  ;;  %4398 = vmatpush3.bf16.msra.mxu1 %v4397_v48  ;;  %v4638_v43 = vld [vmem:[%s6198_s8 + $0x1e4] ss:$8 sps:$4 sm:$0xff]  }
 0xdad   :  { %4399 = vmatprep.subr.bf16.mxu1 %v4878_v37  ;;  %v4636_v48 = vld [vmem:[%s6198_s8 + $0x1e0] ss:$8 sps:$4 sm:$0xff]  }
 0xdae   :  { %v139_v4 = vadd.f32 %v138_v62, %v137_v58  ;;  %v145_v5 = vadd.f32 %v144_v63, %v143_v59  ;;  %v157_v22 = vadd.f32 %v156_v0, %v155_v60  ;;  %v75_v58 = vld [vmem:[%s6221_s26 + $0x58] sm:$0xff]  ;;  %v96_v59 = vmul.f32 %v5385_v45, %v72_v56  ;;  %v4614_v62 = vld [vmem:[%s6198_s8 + $0x164] ss:$8 sps:$4 sm:$0xff]   ;;  %v4612_v0 = vld [vmem:[%s6198_s8 + $0x160] ss:$8 sps:$4 sm:$0xff]  }
 0xdaf   :  { %v4609_v60 = vld [vmem:[%s6198_s8 + $0x150] ss:$8 sps:$4 sm:$0xff]   ;;  %v99_v61 = vmul.f32 %v5385_v45, %v75_v58 }
 0xdb0   :  { %v140_v6 = vrot.slane %v139_v4, 1  ;;  %v146_v7 = vrot.slane %v145_v5, 1  ;;  %v158_v8 = vrot.slane %v157_v22, 1  ;;  %v148_v63 = vrot.slane %v96_v59, 4 }
 0xdb2   :  { %v141_v16 = vadd.f32 %v140_v6, %v139_v4  ;;  %v147_v17 = vadd.f32 %v146_v7, %v145_v5  ;;  %v159_v18 = vadd.f32 %v158_v8, %v157_v22  ;;  %v166_v4 = vrot.slane %v99_v61, 4  ;;  %v4617_v5 = vld [vmem:[%s6198_s8 + $0x174] ss:$8 sps:$4 sm:$0xff]   ;;  %v4615_v6 = vld [vmem:[%s6198_s8 + $0x170] ss:$8 sps:$4 sm:$0xff]  }
 0xdb3   :  { %v149_v22 = vadd.f32 %v148_v63, %v96_v59  ;;  %v4620_v8 = vld [vmem:[%s6198_s8 + $0x184] ss:$8 sps:$4 sm:$0xff]   ;;  %v4645_v63 = vld [vmem:[%s6198_s8 + $0x210] ss:$8 sps:$4 sm:$0xff]  }
 0xdb4   :  { %v5405_v20 = vmul.f32 %v5396_v10, %v141_v16  ;;  %v5408_v21 = vmul.f32 %v5396_v10, %v147_v17  ;;  %v5411_v23 = vmul.f32 %v5396_v10, %v159_v18  ;;  %v167_v7 = vadd.f32 %v166_v4, %v99_v61  ;;  %v4623_v17 = vld [vmem:[%s6198_s8 + $0x194] ss:$8 sps:$4 sm:$0xff]   ;;  %v4648_v4 = vld [vmem:[%s6198_s8 + $0x220] ss:$8 sps:$4 sm:$0xff]  }
 0xdb5   :  { %v150_v11 = vrot.slane %v149_v22, 2 }
 0xdb6   :  { %v1464_v26 = vpack.c.bf16 %v5408_v21, %v5408_v21  ;;  %v1463_v27 = vpack.c.bf16 %v5405_v20, %v5405_v20  ;;  %v1466_v28 = vpack.c.bf16 %v5411_v23, %v5411_v23  ;;  %v168_v16 = vrot.slane %v167_v7, 2 }
 0xdb7   :  { %v151_v18 = vadd.f32 %v150_v11, %v149_v22  ;;  %v4651_v22 = vld [vmem:[%s6198_s8 + $0x230] ss:$8 sps:$4 sm:$0xff]  }
 0xdb8   :  { %v1596_v30 = vunpack.c.l.b16 %v1464_v26  ;;  %v1595_v31 = vunpack.c.l.b16 %v1463_v27  ;;  %v1598_v32 = vunpack.c.l.b16 %v1466_v28  ;;  %v4624_v27 = vld [vmem:[%s6198_s8 + $0x1a0] ss:$8 sps:$4 sm:$0xff]   ;;  %v4657_v11 = vld [vmem:[%s6198_s8 + $0x250] ss:$8 sps:$4 sm:$0xff]  }
 0xdb9   :  { %v152_v26 = vrot.slane %v151_v18, 1 }
 0xdba   :  { %v1603_v33 = vsel %vm1601_vm3, %v1596_v30, %v1590_v24  ;;  %v1602_v34 = vsel %vm1601_vm3, %v1595_v31, %v1589_v25  ;;  %v1605_v35 = vsel %vm1601_vm3, %v1598_v32, %v1592_v29  ;;  %v169_v24 = vadd.f32 %v168_v16, %v167_v7  ;;  %v4626_v25 = vld [vmem:[%s6198_s8 + $0x1a4] ss:$8 sps:$4 sm:$0xff]   ;;  %v4629_v29 = vld [vmem:[%s6198_s8 + $0x1b4] ss:$8 sps:$4 sm:$0xff]   ;;  %v4627_v31 = vld [vmem:[%s6198_s8 + $0x1b0] ss:$8 sps:$4 sm:$0xff]  }
 0xdbb   :  { %v1609_v36 = vpack.c.b16 %v1603_v33, %v1603_v33  ;;  %v1608_v39 = vpack.c.b16 %v1602_v34, %v1602_v34  ;;  %v1611_v40 = vpack.c.b16 %v1605_v35, %v1605_v35  ;;  %v153_v30 = vadd.f32 %v152_v26, %v151_v18  ;;  %v4632_v33 = vld [vmem:[%s6198_s8 + $0x1c4] ss:$8 sps:$4 sm:$0xff]   ;;  %v4630_v35 = vld [vmem:[%s6198_s8 + $0x1c0] ss:$8 sps:$4 sm:$0xff]  }
 0xdbc   :  { %v170_v28 = vrot.slane %v169_v24, 1  ;;  %v4654_v7 = vld [vmem:[%s6198_s8 + $0x240] ss:$8 sps:$4 sm:$0xff]   ;;  %v4662_v16 = vld [vmem:[%s6198_s8 + $0x264] ss:$8 sps:$4 sm:$0xff]  }
 0xdbd   :  { %2132 = vmatprep.mubr.bf16.mxu0 %v1609_v36  ;;  %v5510_v34 = vmul.f32 %v5396_v10, %v153_v30  ;;  %v4660_v18 = vld [vmem:[%s6198_s8 + $0x260] ss:$8 sps:$4 sm:$0xff]  }
 0xdbe   :  { %2133 = vmatmul.mubr.bf16.vlgmr.msra.gmra.mrb[8].mxu0 %v1608_v39  ;;  %v171_v32 = vadd.f32 %v170_v28, %v169_v24  ;;  %v4633_v39 = vld [vmem:[%s6198_s8 + $0x1d0] ss:$8 sps:$4 sm:$0xff]   ;;  %v4665_v24 = vld [vmem:[%s6198_s8 + $0x274] ss:$8 sps:$4 sm:$0xff]  }
 0xdbf   :  { %2142 = vmatpush1.bf16.msra.mxu0 %v4594_v38  ;;  %2173 = vmatprep.mubr.bf16.mxu0 %v1611_v40  ;;  %v4635_v38 = vld [vmem:[%s6198_s8 + $0x1d4] ss:$8 sps:$4 sm:$0xff]   ;;  %v1459_v40 = vpack.c.bf16 %v5359_v12, %v5359_v12 }
 0xdc0   :  { %2143 = vmatprep.subr.bf16.mxu0 %v4599_v41  ;;  %v5516_v36 = vmul.f32 %v5396_v10, %v171_v32  ;;  %v1465_v41 = vpack.c.bf16 %v5510_v34, %v5510_v34  ;;  %v4674_v32 = vld [vmem:[%s6198_s8 + $0x2a4] ss:$8 sps:$4 sm:$0xff]  }
 0xdc3   :  { %2144 = vmatpush1.bf16.msra.mxu0 %v4597_v47  ;;  %v1468_v47 = vpack.c.bf16 %v5516_v36, %v5516_v36 }
 0xdc4   :  { %2145 = vmatprep.subr.bf16.mxu0 %v4602_v49  ;;  %v1591_v49 = vunpack.c.l.b16 %v1459_v40  ;;  %v4675_v40 = vld [vmem:[%s6198_s8 + $0x2b0] ss:$8 sps:$4 sm:$0xff]  }
 0xdc7   :  { %2146 = vmatpush1.bf16.msra.mxu0 %v4600_v50  ;;  %v1597_v50 = vunpack.c.l.b16 %v1465_v41  ;;  %v4680_v41 = vld [vmem:[%s6198_s8 + $0x2c4] ss:$8 sps:$4 sm:$0xff]  }
 0xdc8   :  { %2147 = vmatprep.subr.bf16.mxu0 %v4605_v51  ;;  %v4641_v51 = vld [vmem:[%s6198_s8 + $0x1f4] ss:$8 sps:$4 sm:$0xff]  }
 0xdc9   :  { %v1604_v56 = vsel %vm1601_vm3, %v1597_v50, %v1591_v49  ;;  %v4681_v49 = vld [vmem:[%s6198_s8 + $0x2d0] ss:$8 sps:$4 sm:$0xff]   ;;  %v4686_v50 = vld [vmem:[%s6198_s8 + $0x2e4] ss:$8 sps:$4 sm:$0xff]  }
 0xdca   :  { %v1610_v59 = vpack.c.b16 %v1604_v56, %v1604_v56 }
 0xdcb   :  { %2148 = vmatpush1.bf16.msra.mxu0 %v4603_v53  ;;  %v1594_v53 = vunpack.c.l.b16 %v1462_v46  ;;  %v4678_v46 = vld [vmem:[%s6198_s8 + $0x2c0] ss:$8 sps:$4 sm:$0xff]  }
 0xdcc   :  { %2149 = vmatprep.subr.bf16.mxu0 %v4608_v54  ;;  %v1600_v54 = vunpack.c.l.b16 %v1468_v47  ;;  %v4683_v47 = vld [vmem:[%s6198_s8 + $0x2d4] ss:$8 sps:$4 sm:$0xff]  }
 0xdce   :  { %v1607_v58 = vsel %vm1601_vm3, %v1600_v54, %v1594_v53  ;;  %v4689_v54 = vld [vmem:[%s6198_s8 + $0x2f4] ss:$8 sps:$4 sm:$0xff]  }
 0xdcf   :  { %2150 = vmatpush1.bf16.msra.mxu0 %v4606_v55  ;;  %v4639_v55 = vld [vmem:[%s6198_s8 + $0x1f0] ss:$8 sps:$4 sm:$0xff]   ;;  %v1613_v61 = vpack.c.b16 %v1607_v58, %v1607_v58 }
 0xdd0   :  { %2151 = vmatprep.subr.bf16.mxu0 %v4611_v57  ;;  %v4644_v57 = vld [vmem:[%s6198_s8 + $0x204] ss:$8 sps:$4 sm:$0xff]  }
 0xdd3   :  { %2152 = vmatpush1.bf16.msra.mxu0 %v4609_v60  ;;  %v4642_v60 = vld [vmem:[%s6198_s8 + $0x200] ss:$8 sps:$4 sm:$0xff]  }
 0xdd4   :  { %2153 = vmatprep.subr.bf16.mxu0 %v4614_v62  ;;  %v4647_v62 = vld [vmem:[%s6198_s8 + $0x214] ss:$8 sps:$4 sm:$0xff]  }
 0xdd7   :  { %2154 = vmatpush1.bf16.msra.mxu0 %v4612_v0  ;;  %v4650_v0 = vld [vmem:[%s6198_s8 + $0x224] ss:$8 sps:$4 sm:$0xff]  }
 0xdd8   :  { %2155 = vmatprep.subr.bf16.mxu0 %v4617_v5  ;;  %v4653_v5 = vld [vmem:[%s6198_s8 + $0x234] ss:$8 sps:$4 sm:$0xff]  }
 0xddb   :  { %2156 = vmatpush1.bf16.msra.mxu0 %v4615_v6  ;;  %v4656_v6 = vld [vmem:[%s6198_s8 + $0x244] ss:$8 sps:$4 sm:$0xff]  }
 0xddc   :  { %2157 = vmatprep.subr.bf16.mxu0 %v4620_v8  ;;  %v4659_v8 = vld [vmem:[%s6198_s8 + $0x254] ss:$8 sps:$4 sm:$0xff]  }
 0xddf   :  { %2158 = vmatpush1.bf16.msra.mxu0 %v4618_v15  ;;  %v74_v15 = vld [vmem:[%s6221_s26 + $0x50] sm:$0xff]  ;;  %s4887_s26 = smov 112  }
 0xde0   :  { %2159 = vmatprep.subr.bf16.mxu0 %v4623_v17  ;;  %v98_v17 = vmul.f32 %v5385_v45, %v74_v15  ;;  %v4663_v45 = vld [vmem:[%s6198_s8 + $0x270] ss:$8 sps:$4 sm:$0xff]  }
 0xde1   :  { %v2316_v15 = vld [vmem:[%s6202_s12 + $0x10] sm:$0xff] }
 0xde2   :  { %v160_v26 = vrot.slane %v98_v17, 4 }
 0xde3   :  { %2160 = vmatpush1.bf16.msra.mxu0 %v4621_v9 }
 0xde4   :  { %2161 = vmatprep.subr.bf16.mxu0 %v4626_v25  ;;  %v161_v28 = vadd.f32 %v160_v26, %v98_v17  ;;  %v2317_v17 = vld [vmem:[%s6202_s12 + $0x18] sm:$0xff]  ;;  %v2319_v26 = vld [vmem:[%s6202_s12 + $0x28] sm:$0xff] }
 0xde6   :  { %v162_v30 = vrot.slane %v161_v28, 2 }
 0xde7   :  { %2162 = vmatpush1.bf16.msra.mxu0 %v4624_v27  ;;  %v4668_v27 = vld [vmem:[%s6198_s8 + $0x284] ss:$8 sps:$4 sm:$0xff]  }
 0xde8   :  { %2163 = vmatprep.subr.bf16.mxu0 %v4629_v29  ;;  %v4666_v29 = vld [vmem:[%s6198_s8 + $0x280] ss:$8 sps:$4 sm:$0xff]  }
 0xdeb   :  { %2164 = vmatpush1.bf16.msra.mxu0 %v4627_v31  ;;  %v4669_v31 = vld [vmem:[%s6198_s8 + $0x290] ss:$8 sps:$4 sm:$0xff]  }
 0xdec   :  { %2165 = vmatprep.subr.bf16.mxu0 %v4632_v33  ;;  %v163_v33 = vadd.f32 %v162_v30, %v161_v28 }
 0xdef   :  { %2166 = vmatpush1.bf16.msra.mxu0 %v4630_v35  ;;  %v4672_v35 = vld [vmem:[%s6198_s8 + $0x2a0] ss:$8 sps:$4 sm:$0xff]  }
 0xdf0   :  { %2167 = vmatprep.subr.bf16.mxu0 %v4635_v38  ;;  %v4677_v38 = vld [vmem:[%s6198_s8 + $0x2b4] ss:$8 sps:$4 sm:$0xff]  }
 0xdf3   :  { %2168 = vmatpush1.bf16.msra.mxu0 %v4633_v39  ;;  %v164_v39 = vrot.slane %v163_v33, 1 }
 0xdf4   :  { %2169 = vmatprep.subr.bf16.mxu0 %v4638_v43 }
 0xdf5   :  { %v165_v43 = vadd.f32 %v164_v39, %v163_v33  ;;  %v2320_v33 = vld [vmem:[%s6202_s12 + $0x30] sm:$0xff] }
 0xdf7   :  { %2170 = vmatpush1.bf16.msra.mxu0 %v4636_v48  ;;  %v5634_v48 = vmul.f32 %v5396_v10, %v165_v43  ;;  %v4684_v10 = vld [vmem:[%s6198_s8 + $0x2e0] ss:$8 sps:$4 sm:$0xff]  }
 0xdf8   :  { %2171 = vmatprep.subr.bf16.mxu0 %v4641_v51  ;;  %v1461_v51 = vpack.c.bf16 %v5361_v13, %v5361_v13  ;;  %v2323_v43 = vld [vmem:[%s6202_s12 + $0x48] sm:$0xff] }
 0xdf9   :  { %v1467_v53 = vpack.c.bf16 %v5634_v48, %v5634_v48 }
 0xdfb   :  { %2172 = vmatpush1.bf16.msra.mxu0 %v4639_v55  ;;  %v1593_v55 = vunpack.c.l.b16 %v1461_v51  ;;  %v1599_v56 = vunpack.c.l.b16 %v1467_v53 }
 0xdfc   :  { %2182 = vmatprep.subr.bf16.mxu0 %v4644_v57  ;;  %v4687_v57 = vld [vmem:[%s6198_s8 + $0x2f0] ss:$8 sps:$4 sm:$0xff]  }
 0xdfd   :  { %v1606_v58 = vsel %vm1601_vm3, %v1599_v56, %v1593_v55 }
 0xdfe   :  { %2174 = vmatmul.mubr.bf16.vlgmr.msra.gmra.mrb[8].mxu0 %v1610_v59  ;;  %v1612_v59 = vpack.c.b16 %v1606_v58, %v1606_v58  ;;  %v2480_v58 = vld [vmem:[%s6204_s14] sm:$0xff] }
 0xdff   :  { %2183 = vmatpush1.bf16.msra.mxu0 %v4642_v60  ;;  %2214 = vmatprep.mubr.bf16.mxu0 %v1613_v61  ;;  %v2225_v60 = vld [vmem:[%s6200_s10] sm:$0xff]  ;;  %v2226_v61 = vld [vmem:[%s6200_s10 + $0x8] sm:$0xff] }
 0xe00   :  { %2184 = vmatprep.subr.bf16.mxu0 %v4647_v62  ;;  %v4400_v62 = vpack.c.bf16 %v2226_v61, %v2225_v60 }
 0xe03   :  { %2185 = vmatpush1.bf16.msra.mxu0 %v4645_v63  ;;  %v3926_v63 = vld [vmem:[%s6197_s7] ss:$0 sm:$0xff] }
 0xe04   :  { %2186 = vmatprep.subr.bf16.mxu0 %v4650_v0 }
 0xe07   :  { %2187 = vmatpush1.bf16.msra.mxu0 %v4648_v4  ;;  %v5672_v4 = vadd.f32 %v3926_v63, %v5230_v44  ;;  %v2483_v63 = vld [vmem:[%s6204_s14 + $0x18] sm:$0xff] }
 0xe08   :  { %2188 = vmatprep.subr.bf16.mxu0 %v4653_v5  ;;  %v1567_v5 = vlaneseq }
 0xe0b   :  { %2189 = vmatpush1.bf16.msra.mxu0 %v4651_v22  ;;  %v5679_v22 = vshrl.u32 %v1567_v5, 7 }
 0xe0c   :  { %2190 = vmatprep.subr.bf16.mxu0 %v4656_v6 }
 0xe0d   :  { %v1569_v6 = vsub.s32 0, %v5679_v22  ;;  %v1573_v44 = vsub.s32 1, %v5679_v22 }
 0xe0f   :  { %2191 = vmatpush1.bf16.msra.mxu0 %v4654_v7  ;;  %v1565_v7 = vld [vmem:[%s6199_s9] sm:$0x3] }
 0xe10   :  { %2192 = vmatprep.subr.bf16.mxu0 %v4659_v8  ;;  %v2314_v8 = vld [vmem:[%s6202_s12] sm:$0xff] }
 0xe13   :  { %2193 = vmatpush1.bf16.msra.mxu0 %v4657_v11  ;;  %v2315_v11 = vld [vmem:[%s6202_s12 + $0x8] sm:$0xff] }
 0xe14   :  { %v1373_v9 = vpop.permute.xlu0 %1372  ;;  %2194 = vmatprep.subr.bf16.mxu0 %v4662_v16  ;;  %v4403_v16 = vpack.c.bf16 %v2315_v11, %v2314_v8  ;;  %v2485_v8 = vld [vmem:[%s6204_s14 + $0x28] sm:$0xff] }
 0xe15   :  { %v1375_v25 = vmul.f32 %v5306_v19, %v1373_v9  ;;  %v4671_v19 = vld [vmem:[%s6198_s8 + $0x294] ss:$8 sps:$4 sm:$0xff]   ;;  %v1574_v9 = vrot.slane %v1565_v7, %v1573_v44 }
 0xe17   :  { %2195 = vmatpush1.bf16.msra.mxu0 %v4660_v18  ;;  %1383 = vrot.lane.b32.xlu1 %v1375_v25, %s4882_s20  ;;  %v1570_v18 = vrot.slane %v1565_v7, %v1569_v6  ;;  %v2318_v25 = vld [vmem:[%s6202_s12 + $0x20] sm:$0xff] }
 0xe18   :  { %2196 = vmatprep.subr.bf16.mxu0 %v4665_v24  ;;  %v4406_v24 = vpack.c.bf16 %v2317_v17, %v2316_v15  ;;  %v4409_v30 = vpack.c.bf16 %v2319_v26, %v2318_v25  ;;  %v2484_v7 = vld [vmem:[%s6204_s14 + $0x20] sm:$0xff]  ;;  %v2486_v15 = vld [vmem:[%s6204_s14 + $0x30] sm:$0xff]  ;;  %v2491_v26 = vld [vmem:[%s6204_s14 + $0x58] sm:$0xff] }
 0xe19   :  { %v4427_v11 = vpack.c.bf16 %v2485_v8, %v2484_v7  ;;  %v2490_v25 = vld [vmem:[%s6204_s14 + $0x50] sm:$0xff]  ;;  %v4714_v8 = vld [vmem:[%s6206_s16 + $0x8] ss:$28 sps:$4 sm:$0xff]  }
 0xe1b   :  { %2197 = vmatpush1.bf16.msra.mxu0 %v4663_v45 }
 0xe1c   :  { %2198 = vmatprep.subr.bf16.mxu0 %v4668_v27 }
 0xe1f   :  { %2199 = vmatpush1.bf16.msra.mxu0 %v4666_v29 }
 0xe20   :  { %2200 = vmatprep.subr.bf16.mxu0 %v4671_v19 }
 0xe23   :  { %2201 = vmatpush1.bf16.msra.mxu0 %v4669_v31 }
 0xe24   :  { %2202 = vmatprep.subr.bf16.mxu0 %v4674_v32 }
 0xe27   :  { %2203 = vmatpush1.bf16.msra.mxu0 %v4672_v35  ;;  %v2321_v35 = vld [vmem:[%s6202_s12 + $0x38] sm:$0xff] }
 0xe28   :  { %2204 = vmatprep.subr.bf16.mxu0 %v4677_v38 }
 0xe2b   :  { %2205 = vmatpush1.bf16.msra.mxu0 %v4675_v40  ;;  %v4412_v40 = vpack.c.bf16 %v2321_v35, %v2320_v33 }
 0xe2c   :  { %2206 = vmatprep.subr.bf16.mxu0 %v4680_v41  ;;  %v2322_v41 = vld [vmem:[%s6202_s12 + $0x40] sm:$0xff] }
 0xe2f   :  { %2207 = vmatpush1.bf16.msra.mxu0 %v4678_v46  ;;  %v4415_v46 = vpack.c.bf16 %v2323_v43, %v2322_v41  ;;  %v4695_v41 = vld [vmem:[%s6206_s16 + $0x3c] ss:$28 sps:$4 sm:$0xff]   ;;  %v4698_v43 = vld [vmem:[%s6206_s16 + $0x74] ss:$28 sps:$4 sm:$0xff]  }
 0xe30   :  { %2208 = vmatprep.subr.bf16.mxu0 %v4683_v47  ;;  %v2324_v47 = vld [vmem:[%s6202_s12 + $0x50] sm:$0xff] }
 0xe33   :  { %2209 = vmatpush1.bf16.msra.mxu0 %v4681_v49  ;;  %v2325_v49 = vld [vmem:[%s6202_s12 + $0x58] sm:$0xff] }
 0xe34   :  { %2210 = vmatprep.subr.bf16.mxu0 %v4686_v50  ;;  %v4418_v50 = vpack.c.bf16 %v2325_v49, %v2324_v47  ;;  %v4701_v47 = vld [vmem:[%s6206_s16 + $0xac] ss:$28 sps:$4 sm:$0xff]  }
 0xe35   :  { %v4699_v49 = vld [vmem:[%s6206_s16 + $0xa8] ss:$28 sps:$4 sm:$0xff]  }
 0xe37   :  { %2211 = vmatpush1.bf16.msra.mxu0 %v4684_v10  ;;  %v4032_v10 = vld [vmem:[%s6201_s11] ss:$0 sm:$0xff] }
 0xe38   :  { %2212 = vmatprep.subr.bf16.mxu0 %v4689_v54 }
 0xe3b   :  { %2213 = vmatpush1.bf16.msra.mxu0 %v4687_v57 }
 0xe3c   :  { %4368 = vmatprep.subr.mxu0 %v4880_v42 }
 0xe3e   :  { %2215 = vmatmul.mubr.bf16.vlgmr.msra.gmra.mrb[8].mxu0 %v1612_v59  ;;  %v2481_v59 = vld [vmem:[%s6204_s14 + $0x8] sm:$0xff] }
 0xe3f   :  { %4370 = vmatprep.mubr.msk.f32.mxu0 %vm4879_vm0, %v4880_v42  ;;  %v4421_v60 = vpack.c.bf16 %v2481_v59, %v2480_v58  ;;  %v4711_v58 = vld [vmem:[%s6206_s16 + $0x188] ss:$28 sps:$4 sm:$0xff]  }
 0xe40   :  { %v4716_v59 = vld [vmem:[%s6206_s16 + $0xc] ss:$28 sps:$4 sm:$0xff]  }
 0xe89   :  { %v1384_v0 = vpop.permute.xlu1 %1383 }
 0xe8a   :  { %4277 = vmatmul.mubr.msk.f32.vlgmr.msra.gmra.mrb[16].mxu1 %vm768_vm1, %v1384_v0 }
 0xe8b   :  { %4401 = vmatpush3.bf16.msra.mxu1 %v4400_v62  ;;  %4283 = vmatprep.mubr.msk.f32.mxu1 %vm4879_vm0, %v4880_v42  ;;  %v2482_v62 = vld [vmem:[%s6204_s14 + $0x10] sm:$0xff] }
 0xe8c   :  { %4402 = vmatprep.subr.bf16.mxu1 %v4878_v37  ;;  %v4424_v5 = vpack.c.bf16 %v2483_v63, %v2482_v62  ;;  %v4036_v62 = vld [vmem:[%s6205_s15] ss:$0 sm:$0xff] }
 0xe8e   :  { %4284 = vmatmul.mubr.msk.f32.vlgmr.msra.gmra.mrb[18].mxu1 %vm768_vm1, %v5672_v4 }
 0xe8f   :  { %4310 = vmatprep.mubr.msk.f32.mxu1 %vm4879_vm0, %v4880_v42  ;;  %4404 = vmatpush3.bf16.msra.mxu1 %v4403_v16  ;;  %v2487_v16 = vld [vmem:[%s6204_s14 + $0x38] sm:$0xff] }
 0xe90   :  { %4405 = vmatprep.subr.bf16.mxu1 %v4878_v37  ;;  %v4430_v17 = vpack.c.bf16 %v2487_v16, %v2486_v15  ;;  %v4719_v15 = vld [vmem:[%s6206_s16 + $0x44] ss:$28 sps:$4 sm:$0xff]  }
 0xe91   :  { %v4717_v16 = vld [vmem:[%s6206_s16 + $0x40] ss:$28 sps:$4 sm:$0xff]  }
 0xe93   :  { %4407 = vmatpush3.bf16.msra.mxu1 %v4406_v24 }
 0xe94   :  { %4408 = vmatprep.subr.bf16.mxu1 %v4878_v37 }
 0xe97   :  { %4410 = vmatpush3.bf16.msra.mxu1 %v4409_v30  ;;  %v2495_v30 = vld [vmem:[%s6204_s14 + $0x78] sm:$0xff] }
 0xe98   :  { %4411 = vmatprep.subr.bf16.mxu1 %v4878_v37 }
 0xe9b   :  { %4413 = vmatpush3.bf16.msra.mxu1 %v4412_v40  ;;  %v4690_v40 = vld [vmem:[%s6206_s16] ss:$28 sps:$4 sm:$0xff]  }
 0xe9c   :  { %4414 = vmatprep.subr.bf16.mxu1 %v4878_v37 }
 0xe9f   :  { %4416 = vmatpush3.bf16.msra.mxu1 %v4415_v46  ;;  %v4696_v46 = vld [vmem:[%s6206_s16 + $0x70] ss:$28 sps:$4 sm:$0xff]  }
 0xea0   :  { %4417 = vmatprep.subr.bf16.mxu1 %v4878_v37 }
 0xea3   :  { %4419 = vmatpush3.bf16.msra.mxu1 %v4418_v50  ;;  %v4704_v50 = vld [vmem:[%s6206_s16 + $0xe4] ss:$28 sps:$4 sm:$0xff]  }
 0xea4   :  { %4420 = vmatprep.subr.bf16.mxu1 %v4878_v37 }
 0xf11   :  { %v2216_v45 = vpop.f32.mrb[8].mxu0 }
 0xf12   :  { %v4444_v27 = vadd.f32 %v2216_v45, %v1570_v18  ;;  %v2218_v28 = vpop.f32.mrb[9].mxu0  ;;  %v2488_v18 = vld [vmem:[%s6204_s14 + $0x40] sm:$0xff]  ;;  %v4436_v45 = vpack.c.bf16 %v2491_v26, %v2490_v25  ;;  %v4728_v25 = vld [vmem:[%s6206_s16 + $0xec] ss:$28 sps:$4 sm:$0xff]  }
 0xf13   :  { %v4445_v29 = vadd.f32 %v2218_v28, %v1574_v9  ;;  %v2220_v19 = vpop.f32.mrb[10].mxu0  ;;  %v2489_v9 = vld [vmem:[%s6204_s14 + $0x48] sm:$0xff] }
 0xf14   :  { %v2223_v31 = vmax.f32 %v4444_v27, 0.0  ;;  %v2221_v32 = vpop.f32.mrb[11].mxu0  ;;  %v4433_v24 = vpack.c.bf16 %v2489_v9, %v2488_v18  ;;  %v2492_v27 = vld [vmem:[%s6204_s14 + $0x60] sm:$0xff]  ;;  %v2493_v28 = vld [vmem:[%s6204_s14 + $0x68] sm:$0xff]  ;;  %v2494_v19 = vld [vmem:[%s6204_s14 + $0x70] sm:$0xff] }
 0xf15   :  { %v2224_v38 = vmax.f32 %v4445_v29, 0.0  ;;  %v4439_v29 = vpack.c.bf16 %v2493_v28, %v2492_v27  ;;  %v4442_v32 = vpack.c.bf16 %v2495_v30, %v2494_v19  ;;  %v4720_v18 = vld [vmem:[%s6206_s16 + $0x78] ss:$28 sps:$4 sm:$0xff]   ;;  %v4726_v26 = vld [vmem:[%s6206_s16 + $0xe8] ss:$28 sps:$4 sm:$0xff]  }
 0xf16   :  { %v4725_v9 = vld [vmem:[%s6206_s16 + $0xb4] ss:$28 sps:$4 sm:$0xff]   ;;  %v4729_v27 = vld [vmem:[%s6206_s16 + $0x120] ss:$28 sps:$4 sm:$0xff]  }
 0xf17   :  { %v4484_v39 = vpack.i.bf16 %v2224_v38, %v2223_v31  ;;  %v4734_v28 = vld [vmem:[%s6206_s16 + $0x15c] ss:$28 sps:$4 sm:$0xff]   ;;  %v4737_v19 = vld [vmem:[%s6206_s16 + $0x194] ss:$28 sps:$4 sm:$0xff]  }
 0xf18   :  { %v4735_v30 = vld [vmem:[%s6206_s16 + $0x190] ss:$28 sps:$4 sm:$0xff]  }
 0xf19   :  { %4485 = vrot.lane.b32.xlu1 %v4484_v39, %s4885_s5  ;;  %v4692_v39 = vld [vmem:[%s6206_s16 + $0x4] ss:$28 sps:$4 sm:$0xff]  }
 0xf5d   :  { %v5733_v51 = vpop.f32.mrb[16].mxu1 }
 0xf5e   :  { %v4278_v53 = vpop.f32.mrb[17].mxu1 }
 0xf5f   :  { %v4702_v53 = vld [vmem:[%s6206_s16 + $0xe0] ss:$28 sps:$4 sm:$0xff]  }
 0xf61   :  { %v2303_v54 = vpop.f32.mrb[18].mxu1 }
 0xf62   :  { %v2304_v55 = vadd.f32 %v4032_v10, %v2303_v54  ;;  %v4285_v56 = vpop.f32.mrb[19].mxu1  ;;  %v4707_v10 = vld [vmem:[%s6206_s16 + $0x11c] ss:$28 sps:$4 sm:$0xff]  }
 0xf63   :  { %v4705_v54 = vld [vmem:[%s6206_s16 + $0x118] ss:$28 sps:$4 sm:$0xff]   ;;  %v4708_v56 = vld [vmem:[%s6206_s16 + $0x150] ss:$28 sps:$4 sm:$0xff]  }
 0xf64   :  { %v2307_v57 = vmax.f32 %v2304_v55, 0.0  ;;  %v4710_v55 = vld [vmem:[%s6206_s16 + $0x154] ss:$28 sps:$4 sm:$0xff]  }
 0xf66   :  { %2309 = vrot.lane.b32.xlu0 %v2307_v57, %s4885_s5  ;;  %v4713_v57 = vld [vmem:[%s6206_s16 + $0x18c] ss:$28 sps:$4 sm:$0xff]  }
 0xfd8   :  { %v2310_v61 = vpop.permute.xlu0 %2309 }
 0xfd9   :  { %v2313_v0 = vsel %vm2312_vm5, %v2223_v31, %v2310_v61  ;;  %v4486_v31 = vpop.permute.xlu1 %4485 }
 0xfda   :  { %4311 = vmatmul.mubr.msk.f32.vlgmr.msra.gmra.mrb[20].mxu1 %vm2333_vm4, %v2313_v0  ;;  %v4488_v33 = vunpack.i.h.bf16 %v4486_v31  ;;  %v4487_v35 = vunpack.i.l.bf16 %v4486_v31  ;;  %v4740_v31 = vld [vmem:[%s6206_s16 + $0x14] ss:$28 sps:$4 sm:$0xff]  }
 0xfdb   :  { %4422 = vmatpush3.bf16.msra.mxu1 %v4421_v60  ;;  %4345 = vmatprep.mubr.msk.f32.mxu1 %vm4879_vm0, %v4880_v42 }
 0xfdc   :  { %4423 = vmatprep.subr.bf16.mxu1 %v4878_v37  ;;  %v2509_v38 = vsel %vm2312_vm5, %v4487_v35, %v4488_v33  ;;  %v4743_v33 = vld [vmem:[%s6206_s16 + $0x4c] ss:$28 sps:$4 sm:$0xff]  }
 0xfdd   :  { %v4741_v35 = vld [vmem:[%s6206_s16 + $0x48] ss:$28 sps:$4 sm:$0xff]  }
 0xfdf   :  { %4425 = vmatpush3.bf16.msra.mxu1 %v4424_v5 }
 0xfe0   :  { %4426 = vmatprep.subr.bf16.mxu1 %v4878_v37 }
 0xfe3   :  { %4428 = vmatpush3.bf16.msra.mxu1 %v4427_v11 }
 0xfe4   :  { %4429 = vmatprep.subr.bf16.mxu1 %v4878_v37 }
 0xfe7   :  { %4431 = vmatpush3.bf16.msra.mxu1 %v4430_v17  ;;  %v4722_v17 = vld [vmem:[%s6206_s16 + $0x7c] ss:$28 sps:$4 sm:$0xff]  }
 0xfe8   :  { %4432 = vmatprep.subr.bf16.mxu1 %v4878_v37 }
 0xfeb   :  { %4434 = vmatpush3.bf16.msra.mxu1 %v4433_v24  ;;  %v4723_v24 = vld [vmem:[%s6206_s16 + $0xb0] ss:$28 sps:$4 sm:$0xff]  }
 0xfec   :  { %4435 = vmatprep.subr.bf16.mxu1 %v4878_v37 }
 0xfef   :  { %4437 = vmatpush3.bf16.msra.mxu1 %v4436_v45  ;;  %v4731_v45 = vld [vmem:[%s6206_s16 + $0x124] ss:$28 sps:$4 sm:$0xff]  }
 0xff0   :  { %4438 = vmatprep.subr.bf16.mxu1 %v4878_v37 }
 0xff3   :  { %4440 = vmatpush3.bf16.msra.mxu1 %v4439_v29  ;;  %v4732_v29 = vld [vmem:[%s6206_s16 + $0x158] ss:$28 sps:$4 sm:$0xff]  }
 0xff4   :  { %4441 = vmatprep.subr.bf16.mxu1 %v4878_v37  ;;  %v4693_v37 = vld [vmem:[%s6206_s16 + $0x38] ss:$28 sps:$4 sm:$0xff]  }
 0xff7   :  { %4443 = vmatpush3.bf16.msra.mxu1 %v4442_v32  ;;  %v4738_v32 = vld [vmem:[%s6206_s16 + $0x10] ss:$28 sps:$4 sm:$0xff]  }
 0xff8   :  { %2972 = vmatprep.subr.bf16.mxu1 %v4692_v39  ;;  %v4744_v39 = vld [vmem:[%s6206_s16 + $0x80] ss:$28 sps:$4 sm:$0xff]  }
 0xffa   :  { %4346 = vmatmul.mubr.f32.vlgmr.msra.gmra.mrb[22].mxu1 %v2509_v38  ;;  %v4746_v38 = vld [vmem:[%s6206_s16 + $0x84] ss:$28 sps:$4 sm:$0xff]  }
 0xffb   :  { %3004 = vmatprep.mubr.bf16.mxu1 %v4886_v1  ;;  %2973 = vmatpush1.bf16.msra.mxu1 %v4690_v40  ;;  %v4749_v40 = vld [vmem:[%s6206_s16 + $0xbc] ss:$28 sps:$4 sm:$0xff]  }
 0xffc   :  { %2974 = vmatprep.subr.bf16.mxu1 %v4695_v41  ;;  %v4750_v41 = vld [vmem:[%s6206_s16 + $0xf0] ss:$28 sps:$4 sm:$0xff]  }
 0xfff   :  { %2975 = vmatpush1.bf16.msra.mxu1 %v4693_v37  ;;  %v4752_v37 = vld [vmem:[%s6206_s16 + $0xf4] ss:$28 sps:$4 sm:$0xff]  }
0x1000   :  { %2976 = vmatprep.subr.bf16.mxu1 %v4698_v43  ;;  %v4755_v43 = vld [vmem:[%s6206_s16 + $0x12c] ss:$28 sps:$4 sm:$0xff]  }
0x1003   :  { %2977 = vmatpush1.bf16.msra.mxu1 %v4696_v46  ;;  %v4753_v46 = vld [vmem:[%s6206_s16 + $0x128] ss:$28 sps:$4 sm:$0xff]  }
0x1004   :  { %2978 = vmatprep.subr.bf16.mxu1 %v4701_v47  ;;  %v4758_v47 = vld [vmem:[%s6206_s16 + $0x164] ss:$28 sps:$4 sm:$0xff]  }
0x1007   :  { %2979 = vmatpush1.bf16.msra.mxu1 %v4699_v49  ;;  %v4756_v49 = vld [vmem:[%s6206_s16 + $0x160] ss:$28 sps:$4 sm:$0xff]  }
0x1008   :  { %2980 = vmatprep.subr.bf16.mxu1 %v4704_v50  ;;  %v4761_v50 = vld [vmem:[%s6206_s16 + $0x19c] ss:$28 sps:$4 sm:$0xff]  }
0x100b   :  { %2981 = vmatpush1.bf16.msra.mxu1 %v4702_v53  ;;  %v4759_v53 = vld [vmem:[%s6206_s16 + $0x198] ss:$28 sps:$4 sm:$0xff]  }
0x100c   :  { %2982 = vmatprep.subr.bf16.mxu1 %v4707_v10  ;;  %v4762_v10 = vld [vmem:[%s6206_s16 + $0x18] ss:$28 sps:$4 sm:$0xff]  }
0x100f   :  { %2983 = vmatpush1.bf16.msra.mxu1 %v4705_v54  ;;  %v4763_v54 = vld [vmem:[%s6206_s16 + $0x50] ss:$28 sps:$4 sm:$0xff]  }
0x1010   :  { %2984 = vmatprep.subr.bf16.mxu1 %v4710_v55  ;;  %v4764_v55 = vld [vmem:[%s6206_s16 + $0x88] ss:$28 sps:$4 sm:$0xff]  }
0x1013   :  { %2985 = vmatpush1.bf16.msra.mxu1 %v4708_v56  ;;  %v4765_v56 = vld [vmem:[%s6206_s16 + $0xc0] ss:$28 sps:$4 sm:$0xff]  }
0x1014   :  { %2986 = vmatprep.subr.bf16.mxu1 %v4713_v57  ;;  %v4766_v57 = vld [vmem:[%s6206_s16 + $0xf8] ss:$28 sps:$4 sm:$0xff]  }
0x1017   :  { %2987 = vmatpush1.bf16.msra.mxu1 %v4711_v58  ;;  %v4767_v58 = vld [vmem:[%s6206_s16 + $0x130] ss:$28 sps:$4 sm:$0xff]  }
0x1018   :  { %3013 = vmatprep.subr.bf16.mxu1 %v4716_v59  ;;  %v4768_v59 = vld [vmem:[%s6206_s16 + $0x168] ss:$28 sps:$4 sm:$0xff]  }
0x10ad   :  { %v5850_v60 = vpop.f32.mrb[20].mxu1 }
0x10ae   :  { %v4312_v61 = vpop.f32.mrb[21].mxu1 }
0x10af   :  { %v4769_v61 = vld [vmem:[%s6206_s16 + $0x1a0] ss:$28 sps:$4 sm:$0xff]  }
0x10cd   :  { %v2577_v63 = vpop.f32.mrb[22].mxu1 }
0x10ce   :  { %v2578_v0 = vadd.f32 %v4036_v62, %v2577_v63  ;;  %v4347_v5 = vpop.f32.mrb[23].mxu1 }
0x10d0   :  { %v2581_v7 = vmax.f32 %v2578_v0, 0.0 }
0x10d2   :  { %v5858_v11 = vpack.c.bf16 %v2581_v7, %v2581_v7 }
0x10d4   :  { %3005 = vmatmul.mubr.bf16.vlgmr.msra.gmra.mrb[24].mxu1 %v5858_v11 }
0x10d5   :  { %3014 = vmatpush1.bf16.msra.mxu1 %v4714_v8  ;;  %3045 = vmatprep.mubr.bf16.mxu1 %v4886_v1 }
0x10d6   :  { %3015 = vmatprep.subr.bf16.mxu1 %v4719_v15 }
0x10d9   :  { %3016 = vmatpush1.bf16.msra.mxu1 %v4717_v16 }
0x10da   :  { %3017 = vmatprep.subr.bf16.mxu1 %v4722_v17 }
0x10dd   :  { %3018 = vmatpush1.bf16.msra.mxu1 %v4720_v18 }
0x10de   :  { %3019 = vmatprep.subr.bf16.mxu1 %v4725_v9 }
0x10e1   :  { %3020 = vmatpush1.bf16.msra.mxu1 %v4723_v24 }
0x10e2   :  { %3021 = vmatprep.subr.bf16.mxu1 %v4728_v25  ;;  %v2675_v25 = vsub.s32 6, %v5679_v22 }
0x10e5   :  { %3022 = vmatpush1.bf16.msra.mxu1 %v4726_v26  ;;  %v2647_v26 = vld [vmem:[%s6207_s17] sm:$0x7f] }
0x10e6   :  { %3023 = vmatprep.subr.bf16.mxu1 %v4731_v45 }
0x10e9   :  { %3024 = vmatpush1.bf16.msra.mxu1 %v4729_v27 }
0x10ea   :  { %3025 = vmatprep.subr.bf16.mxu1 %v4734_v28 }
0x10ed   :  { %3026 = vmatpush1.bf16.msra.mxu1 %v4732_v29 }
0x10ee   :  { %3027 = vmatprep.subr.bf16.mxu1 %v4737_v19 }
0x10f1   :  { %3028 = vmatpush1.bf16.msra.mxu1 %v4735_v30 }
0x10f2   :  { %3054 = vmatprep.subr.bf16.mxu1 %v4740_v31  ;;  %v3135_v31 = vmul.f32 %v5390_v2, %v5390_v2 }
0x10f4   :  { %3046 = vmatmul.mubr.bf16.vlgmr.msra.gmra.mrb[28].mxu1 %v5858_v11 }
0x10f5   :  { %3055 = vmatpush1.bf16.msra.mxu1 %v4738_v32  ;;  %3086 = vmatprep.mubr.bf16.mxu1 %v4886_v1  ;;  %v4747_v1 = vld [vmem:[%s6206_s16 + $0xb8] ss:$28 sps:$4 sm:$0xff]   ;;  %v3141_v32 = vmul.f32 %v5405_v20, %v5405_v20 }
0x10f6   :  { %3056 = vmatprep.subr.bf16.mxu1 %v4743_v33  ;;  %v3136_v33 = vmul.f32 %v5392_v3, %v5392_v3 }
0x10f9   :  { %3057 = vmatpush1.bf16.msra.mxu1 %v4741_v35  ;;  %v3142_v35 = vmul.f32 %v5408_v21, %v5408_v21 }
0x10fa   :  { %3058 = vmatprep.subr.bf16.mxu1 %v4746_v38  ;;  %v2659_v38 = vsub.s32 2, %v5679_v22 }
0x10fd   :  { %3059 = vmatpush1.bf16.msra.mxu1 %v4744_v39  ;;  %v3137_v39 = vmul.f32 %v5359_v12, %v5359_v12 }
0x10fe   :  { %3060 = vmatprep.subr.bf16.mxu1 %v4749_v40  ;;  %v3143_v40 = vmul.f32 %v5510_v34, %v5510_v34 }
0x1101   :  { %3061 = vmatpush1.bf16.msra.mxu1 %v4747_v1  ;;  %v2652_v1 = vrot.slane %v2647_v26, %v1569_v6 }
0x1102   :  { %3062 = vmatprep.subr.bf16.mxu1 %v4752_v37  ;;  %v2656_v37 = vrot.slane %v2647_v26, %v1573_v44 }
0x1105   :  { %3063 = vmatpush1.bf16.msra.mxu1 %v4750_v41  ;;  %v3159_v41 = vsel %vm1601_vm3, %v3141_v32, %v3135_v31 }
0x1106   :  { %3064 = vmatprep.subr.bf16.mxu1 %v4755_v43  ;;  %v3160_v43 = vsel %vm1601_vm3, %v3142_v35, %v3136_v33  ;;  %v3172_v6 = vsel %vm3171_vm6, %v3159_v41, 0.0 }
0x1109   :  { %3065 = vmatpush1.bf16.msra.mxu1 %v4753_v46  ;;  %v2660_v46 = vrot.slane %v2647_v26, %v2659_v38 }
0x110a   :  { %3066 = vmatprep.subr.bf16.mxu1 %v4758_v47  ;;  %v2663_v47 = vsub.s32 3, %v5679_v22 }
0x110d   :  { %3067 = vmatpush1.bf16.msra.mxu1 %v4756_v49  ;;  %v3138_v49 = vmul.f32 %v5394_v52, %v5394_v52 }
0x110e   :  { %3068 = vmatprep.subr.bf16.mxu1 %v4761_v50  ;;  %v3144_v50 = vmul.f32 %v5411_v23, %v5411_v23 }
0x1111   :  { %3069 = vmatpush1.bf16.msra.mxu1 %v4759_v53  ;;  %v3161_v53 = vsel %vm1601_vm3, %v3143_v40, %v3137_v39 }
0x1112   :  { %4348 = vmatprep.subr.bf16.mxu1 %v4880_v42 }
0x1114   :  { %3087 = vmatmul.mubr.bf16.vlgmr.msra.gmra.mrb[32].mxu1 %v5858_v11 }
0x1115   :  { %4349 = vmatpush3.bf16.msra.mxu1 %v4762_v10  ;;  %4364 = vmatprep.mubr.msk.bf16.mxu1 %vm4879_vm0, %v4880_v42 }
0x1116   :  { %4350 = vmatprep.subr.bf16.mxu1 %v4880_v42 }
0x1119   :  { %4351 = vmatpush3.bf16.msra.mxu1 %v4763_v54  ;;  %v2667_v54 = vsub.s32 4, %v5679_v22 }
0x111a   :  { %4352 = vmatprep.subr.bf16.mxu1 %v4880_v42 }
0x111d   :  { %4353 = vmatpush3.bf16.msra.mxu1 %v4764_v55  ;;  %v3173_v55 = vsel %vm3171_vm6, %v3160_v43, 0.0 }
0x111e   :  { %4354 = vmatprep.subr.bf16.mxu1 %v4880_v42 }
0x1121   :  { %4355 = vmatpush3.bf16.msra.mxu1 %v4765_v56 }
0x1122   :  { %4356 = vmatprep.subr.bf16.mxu1 %v4880_v42 }
0x1125   :  { %4357 = vmatpush3.bf16.msra.mxu1 %v4766_v57  ;;  %v2664_v57 = vrot.slane %v2647_v26, %v2663_v47 }
0x1126   :  { %4358 = vmatprep.subr.bf16.mxu1 %v4880_v42 }
0x1129   :  { %4359 = vmatpush3.bf16.msra.mxu1 %v4767_v58  ;;  %v3162_v58 = vsel %vm1601_vm3, %v3144_v50, %v3138_v49 }
0x112a   :  { %4360 = vmatprep.subr.bf16.mxu1 %v4880_v42 }
0x112d   :  { %4361 = vmatpush3.bf16.msra.mxu1 %v4768_v59  ;;  %v3174_v59 = vadd.f32 %v3173_v55, %v3172_v6  ;;  %v3576_v6 = vmul.f32 %v5672_v4, %v5672_v4  ;;  %v3934_v55 = vld [vmem:[%s6197_s7 + $0x1] ss:$0 sm:$0xff] }
0x112e   :  { %4362 = vmatprep.subr.bf16.mxu1 %v4880_v42 }
0x1131   :  { %4363 = vmatpush3.bf16.msra.mxu1 %v4769_v61  ;;  %v3175_v61 = vsel %vm3171_vm6, %v3161_v53, 0.0 }
0x1134   :  { %4365 = vmatmul.mubr.bf16.vlgmr.msra.gmra.mrb[36].mxu1 %v5858_v11  ;;  %v2676_v11 = vrot.slane %v2647_v26, %v2675_v25  ;;  %v3177_v25 = vsel %vm3171_vm6, %v3162_v58, 0.0  ;;  %v6082_v58 = vadd.f32 %v3934_v55, %v5733_v51 }
0x11a7   :  { %v3006_v62 = vpop.f32.mrb[24].mxu1 }
0x11a8   :  { %v3008_v63 = vpop.f32.mrb[25].mxu1  ;;  %v6030_v10 = vadd.f32 %v3006_v62, %v2652_v1 }
0x11a9   :  { %v3010_v0 = vpop.f32.mrb[26].mxu1  ;;  %v6032_v44 = vadd.f32 %v3008_v63, %v2656_v37  ;;  %v2668_v63 = vrot.slane %v2647_v26, %v2667_v54  ;;  %v3577_v54 = vsel %vm2419_vm7, %v3576_v6, 0.0 }
0x11aa   :  { %v3011_v5 = vpop.f32.mrb[27].mxu1  ;;  %v3203_v0 = vmul.f32 %v6030_v10, %v6030_v10 }
0x11ab   :  { %v3204_v62 = vmul.f32 %v6032_v44, %v6032_v44  ;;  %v2671_v5 = vsub.s32 5, %v5679_v22 }
0x11ad   :  { %v2672_v22 = vrot.slane %v2647_v26, %v2671_v5 }
0x11c7   :  { %v3047_v7 = vpop.f32.mrb[28].mxu1 }
0x11c8   :  { %v3049_v8 = vpop.f32.mrb[29].mxu1  ;;  %v6036_v56 = vadd.f32 %v3047_v7, %v2660_v46  ;;  %v3145_v7 = vmul.f32 %v5634_v48, %v5634_v48 }
0x11c9   :  { %v3051_v15 = vpop.f32.mrb[30].mxu1 }
0x11ca   :  { %v3052_v16 = vpop.f32.mrb[31].mxu1  ;;  %v3139_v15 = vmul.f32 %v5361_v13, %v5361_v13 }
0x11cb   :  { %v3205_v16 = vmul.f32 %v6036_v56, %v6036_v56 }
0x11cc   :  { %v3163_v31 = vsel %vm1601_vm3, %v3145_v7, %v3139_v15 }
0x11cd   :  { %v3179_v38 = vsel %vm3171_vm6, %v3163_v31, 0.0 }
0x11e7   :  { %v3088_v17 = vpop.f32.mrb[32].mxu1 }
0x11e8   :  { %v5990_v18 = vpop.f32.mrb[33].mxu1 }
0x11e9   :  { %v3092_v9 = vpop.f32.mrb[34].mxu1  ;;  %v3091_v26 = vadd.f32 %v5990_v18, %v2672_v22 }
0x11ea   :  { %v3093_v24 = vpop.f32.mrb[35].mxu1  ;;  %v6051_v9 = vadd.f32 %v3049_v8, %v2664_v57  ;;  %v3212_v8 = vsel %vm3171_vm6, %v3205_v16, 0.0 }
0x11eb   :  { %v3176_v24 = vadd.f32 %v3175_v61, %v3174_v59  ;;  %v3208_v41 = vmul.f32 %v3091_v26, %v3091_v26 }
0x11ec   :  { %v3206_v32 = vmul.f32 %v6051_v9, %v6051_v9 }
0x11ed   :  { %v3178_v35 = vadd.f32 %v3177_v25, %v3176_v24  ;;  %v3218_v53 = vsel %vm3171_vm6, %v3208_v41, 0.0 }
0x11ee   :  { %v3214_v1 = vsel %vm3171_vm6, %v3206_v32, 0.0 }
0x11ef   :  { %v3180_v37 = vadd.f32 %v3179_v38, %v3178_v35 }
0x1207   :  { %v3129_v45 = vpop.f32.mrb[36].mxu1 }
0x1208   :  { %v5996_v27 = vadd.f32 %v3129_v45, %v2676_v11  ;;  %v4366_v28 = vpop.f32.mrb[37].mxu1  ;;  %v3209_v11 = vsel %vm3171_vm6, %v3203_v0, 0.0  ;;  %v3210_v45 = vsel %vm3171_vm6, %v3204_v62, 0.0  ;;  %v3696_v0 = vmul.f32 %v6082_v58, %v6082_v58 }
0x1209   :  { %v3132_v29 = vpop.f32.mrb[38].mxu1  ;;  %v6056_v28 = vadd.f32 %v3088_v17, %v2668_v63  ;;  %v3211_v33 = vadd.f32 %v3210_v45, %v3209_v11 }
0x120a   :  { %v4367_v19 = vpop.f32.mrb[39].mxu1  ;;  %v6000_v30 = vmul.f32 %v5996_v27, %v5996_v27  ;;  %v3140_v29 = vmul.f32 %v5363_v14, %v5363_v14  ;;  %v3697_v62 = vsel %vm2419_vm7, %v3696_v0, 0.0 }
0x120b   :  { %v3146_v19 = vmul.f32 %v5516_v36, %v5516_v36  ;;  %v3207_v17 = vmul.f32 %v6056_v28, %v6056_v28  ;;  %v3213_v39 = vadd.f32 %v3212_v8, %v3211_v33 }
0x120c   :  { %3704 = vrot.lane.b32.xlu0 %v6000_v30, %s4887_s26  ;;  %v3584_v61 = vsel %vm2419_vm7, %v6000_v30, 0.0 }
0x120d   :  { %v3164_v40 = vsel %vm1601_vm3, %v3146_v19, %v3140_v29  ;;  %v3216_v46 = vsel %vm3171_vm6, %v3207_v17, 0.0  ;;  %v3215_v47 = vadd.f32 %v3214_v1, %v3213_v39 }
0x120e   :  { %v3181_v43 = vsel %vm3171_vm6, %v3164_v40, 0.0 }
0x120f   :  { %v3182_v49 = vadd.f32 %v3181_v43, %v3180_v37  ;;  %v3217_v50 = vadd.f32 %v3216_v46, %v3215_v47 }
0x1211   :  { %v3219_v18 = vadd.f32 %v3218_v53, %v3217_v50 }
0x122b   :  { %3183 = vadd.xlane.f32.xlu0 %v3182_v49 }
0x122f   :  { %3220 = vadd.xlane.f32.xlu0 %v3219_v18 }
0x1233   :  { %3578 = vadd.xlane.f32.xlu0 %v3577_v54 }
0x127e   :  { %v3705_v57 = vpop.permute.xlu0 %3704 }
0x127f   :  { %v3707_v59 = vsel %vm2419_vm7, %v3705_v57, 0.0 }
0x1280   :  { %3708 = vadd.xlane.f32.xlu1 %v3707_v59 }
0x1284   :  { %3585 = vadd.xlane.f32.xlu1 %v3584_v61 }
0x1288   :  { %3698 = vadd.xlane.f32.xlu1 %v3697_v62 }
0x12b8   :  { %v3184_v63 = vpop.xlane.xlu0 %3183 }
0x12b9   :  { %v3185_v5 = vadd.f32 1e-08, %v3184_v63 }
0x12bb   :  { %4814 = vrsqrt.f32 %v3185_v5 }
0x12bc   :  { %v3221_v15 = vpop.xlane.xlu0 %3220 }
0x12bd   :  { %v3222_v7 = vadd.f32 1e-08, %v3221_v15 }
0x12bf   :  { %4816 = vrsqrt.f32 %v3222_v7 }
0x12c5   :  { %v4815_v51 = vpop.eup %4814 }
0x12c6   :  { %v3188_v16 = vrot.slane %v4815_v51, 1  ;;  %v3192_v24 = vmul.f32 %v4815_v51, %v5392_v3  ;;  %v3191_v30 = vmul.f32 %v4815_v51, %v5390_v2  ;;  %v3194_v29 = vmul.f32 %v4815_v51, %v5394_v52 }
0x12c7   :  { %v3193_v19 = vmul.f32 %v4815_v51, %v5359_v12  ;;  %v6099_v8 = vmul.f32 %v4815_v51, %v5361_v13  ;;  %v3196_v53 = vmul.f32 %v4815_v51, %v5363_v14 }
0x12c8   :  { %v3198_v25 = vmul.f32 %v3188_v16, %v5408_v21  ;;  %v3197_v11 = vmul.f32 %v3188_v16, %v5405_v20  ;;  %v3200_v45 = vmul.f32 %v3188_v16, %v5411_v23  ;;  %v3199_v31 = vmul.f32 %v3188_v16, %v5510_v34 }
0x12c9   :  { %v4817_v22 = vpop.eup %4816  ;;  %v3201_v6 = vmul.f32 %v3188_v16, %v5634_v48 }
0x12ca   :  { %v3225_v3 = vmul.f32 %v4817_v22, %v6032_v44  ;;  %v3224_v21 = vmul.f32 %v4817_v22, %v6030_v10  ;;  %v3323_v32 = vrot.slane %v3198_v25, 7  ;;  %v3227_v2 = vmul.f32 %v4817_v22, %v6051_v9 }
0x12cb   :  { %v3321_v20 = vrot.slane %v3197_v11, 7  ;;  %v3226_v23 = vmul.f32 %v4817_v22, %v6036_v56  ;;  %v3327_v33 = vrot.slane %v3200_v45, 7  ;;  %v3229_v35 = vmul.f32 %v4817_v22, %v3091_v26 }
0x12cc   :  { %v3237_v52 = vrot.slane %v3225_v3, 1  ;;  %3339 = vmatprep.subr.mxu1 %v3225_v3  ;;  %v3236_v12 = vrot.slane %v3224_v21, 1  ;;  %v3255_v17 = vmul.f32 %v3225_v3, %v3192_v24  ;;  %v3324_v34 = vsel %vm1601_vm3, %v3323_v32, %v3192_v24 }
0x12cd   :  { %3340 = vmatpush1.xpose.msra.mxu1 %v3224_v21  ;;  %3403 = vmatprep.mubr.f32.mxu1 %v3324_v34  ;;  %v3239_v13 = vrot.slane %v3227_v2, 1  ;;  %v3254_v44 = vmul.f32 %v3224_v21, %v3191_v30  ;;  %v3238_v38 = vrot.slane %v3226_v23, 1  ;;  %v3202_v10 = vmul.f32 %v3188_v16, %v5516_v36 }
0x12ce   :  { %v3261_v39 = vmul.f32 %v3237_v52, %v3198_v25  ;;  %3409 = vmatprep.subr.mxu1 %v3227_v2  ;;  %v3260_v9 = vmul.f32 %v3236_v12, %v3197_v11  ;;  %v3322_v56 = vsel %vm1601_vm3, %v3321_v20, %v3191_v30  ;;  %v3257_v40 = vmul.f32 %v3227_v2, %v3194_v29  ;;  %v4034_v20 = vld [vmem:[%s6203_s13] ss:$0 sm:$0xff]  ;;  %s4888_s13 = smov [#allocation2]  }
0x12cf   :  { %v3263_v26 = vmul.f32 %v3239_v13, %v3200_v45  ;;  %v3241_v1 = vrot.slane %v3229_v35, 1  ;;  %v3256_v37 = vmul.f32 %v3226_v23, %v3193_v19  ;;  %v3262_v41 = vmul.f32 %v3238_v38, %v3199_v31 }
0x12d0   :  { %v3280_v43 = vrot.slane %v3261_v39, 7  ;;  %v3278_v46 = vrot.slane %v3260_v9, 7  ;;  %3404 = vmatmul.mubr.f32.vlgmr.msra.gmra.mrb[40].mxu1 %v3322_v56  ;;  %v3328_v47 = vsel %vm1601_vm3, %v3327_v33, %v3194_v29  ;;  %v3228_v49 = vmul.f32 %v4817_v22, %v6056_v28 }
0x12d1   :  { %3410 = vmatpush1.xpose.msra.mxu1 %v3226_v23  ;;  %v3284_v50 = vrot.slane %v3263_v26, 7  ;;  %3473 = vmatprep.mubr.f32.mxu1 %v3328_v47  ;;  %v3282_v36 = vrot.slane %v3262_v41, 7  ;;  %v3325_v55 = vrot.slane %v3199_v31, 7  ;;  %v3331_v57 = vrot.slane %v3202_v10, 7  ;;  %v3579_v23 = vpop.xlane.xlu0 %3578 }
0x12d2   :  { %3479 = vmatprep.subr.mxu1 %v3229_v35  ;;  %v3240_v18 = vrot.slane %v3228_v49, 1  ;;  %v3258_v54 = vmul.f32 %v3228_v49, %v6099_v8  ;;  %v3259_v59 = vmul.f32 %v3229_v35, %v3196_v53  ;;  %v3265_v61 = vmul.f32 %v3241_v1, %v3202_v10 }
0x12d3   :  { %v3279_v62 = vsel %vm1601_vm3, %v3278_v46, %v3254_v44  ;;  %v3281_v28 = vsel %vm1601_vm3, %v3280_v43, %v3255_v17  ;;  %v3283_v63 = vsel %vm1601_vm3, %v3282_v36, %v3256_v37  ;;  %v3285_v5 = vsel %vm1601_vm3, %v3284_v50, %v3257_v40 }
0x12d4   :  { %v3264_v0 = vmul.f32 %v3240_v18, %v3201_v6  ;;  %v3288_v14 = vrot.slane %v3265_v61, 7  ;;  %v3296_v15 = vsel %vm3171_vm6, %v3279_v62, 0.0  ;;  %v3297_v48 = vsel %vm3171_vm6, %v3281_v28, 0.0 }
0x12d5   :  { %v3298_v51 = vadd.f32 %v3297_v48, %v3296_v15  ;;  %v3326_v16 = vsel %vm1601_vm3, %v3325_v55, %v3193_v19  ;;  %v3299_v25 = vsel %vm3171_vm6, %v3283_v63, 0.0  ;;  %v3332_v30 = vsel %vm1601_vm3, %v3331_v57, %v3196_v53 }
0x12d6   :  { %v3286_v7 = vrot.slane %v3264_v0, 7  ;;  %v3289_v24 = vsel %vm1601_vm3, %v3288_v14, %v3259_v59  ;;  %v3301_v22 = vsel %vm3171_vm6, %v3285_v5, 0.0  ;;  %v3329_v31 = vrot.slane %v3201_v6, 7 }
0x12d7   :  { %v3300_v45 = vadd.f32 %v3299_v25, %v3298_v51  ;;  %v3305_v19 = vsel %vm3171_vm6, %v3289_v24, 0.0  ;;  %v6133_v35 = vadd.f32 %v4034_v20, %v5850_v60  ;;  %v3580_v52 = vadd.f32 1e-08, %v3579_v23 }
0x12d8   :  { %3474 = vmatmul.mubr.f32.vlgmr.msra.gmra.mrb[40].mxu1 %v3326_v16  ;;  %v3287_v11 = vsel %vm1601_vm3, %v3286_v7, %v3258_v54  ;;  %v3330_v2 = vsel %vm1601_vm3, %v3329_v31, %v6099_v8 }
0x12d9   :  { %3480 = vmatpush1.xpose.msra.mxu1 %v3228_v49  ;;  %3543 = vmatprep.mubr.f32.mxu1 %v3332_v30  ;;  %v3302_v29 = vadd.f32 %v3301_v22, %v3300_v45  ;;  %v3303_v3 = vsel %vm3171_vm6, %v3287_v11, 0.0  ;;  %v2411_v34 = vsub.f32 0.0, %v6133_v35 }
0x12db   :  { %v3304_v21 = vadd.f32 %v3303_v3, %v3302_v29  ;;  %v2412_v8 = vmul.f32 1.442695, %v2411_v34 }
0x12dd   :  { %v3306_v32 = vadd.f32 %v3305_v19, %v3304_v21 }
0x12e0   :  { %3544 = vmatmul.mubr.f32.vlgmr.msra.gmra.mrb[40].mxu1 %v3330_v2  ;;  %v2407_v2 = vsub.f32 %v6133_v35, %v5672_v4 }
0x12e2   :  { %v2408_v23 = vmul.f32 %v2407_v2, %v2407_v2 }
0x130d   :  { %v3709_v33 = vpop.xlane.xlu1 %3708 }
0x130e   :  { %v3710_v12 = vadd.f32 1e-08, %v3709_v33 }
0x1310   :  { %4818 = vrsqrt.f32 %v3710_v12 }
0x1311   :  { %v3586_v17 = vpop.xlane.xlu1 %3585  ;;  %4820 = vrsqrt.f32 %v3580_v52  ;;  %v2409_v52 = vsub.f32 0.0, %v2408_v23 }
0x1312   :  { %v3587_v13 = vadd.f32 1e-08, %v3586_v17 }
0x1313   :  { %v2410_v12 = vmul.f32 0.5, %v2409_v52 }
0x1314   :  { %4822 = vrsqrt.f32 %v3587_v13 }
0x1315   :  { %4824 = vpow2.f32 %v2412_v8  ;;  %v3699_v26 = vpop.xlane.xlu1 %3698 }
0x1316   :  { %v3700_v1 = vadd.f32 1e-08, %v3699_v26 }
0x1318   :  { %4826 = vrsqrt.f32 %v3700_v1 }
0x131a   :  { %v4819_v44 = vpop.eup %4818 }
0x131b   :  { %v3712_v38 = vmul.f32 %v4819_v44, %v5996_v27  ;;  %v4821_v10 = vpop.eup %4820 }
0x131c   :  { %v3582_v9 = vmul.f32 %v4821_v10, %v5672_v4 }
0x131d   :  { %3714 = vrot.lane.b32.xlu0 %v3712_v38, %s4887_s26 }
0x131e   :  { %v4823_v39 = vpop.eup %4822 }
0x131f   :  { %v3589_v60 = vmul.f32 %v4823_v39, %v5996_v27  ;;  %v4825_v40 = vpop.eup %4824 }
0x1321   :  { %4369 = vmatpush3.xpose.msk.msra.mxu0 %vm768_vm1, %v3589_v60  ;;  %2456 = vrot.lane.b32.xlu0 %v6082_v58, %s4885_s5  ;;  %v3590_v56 = vmul.f32 %v3589_v60, %v3582_v9 }
0x1322   :  { %4373 = vmatprep.subr.mxu0 %v4880_v42  ;;  %v4827_v37 = vpop.eup %4826 }
0x1323   :  { %v3702_v41 = vmul.f32 %v4827_v37, %v6082_v58  ;;  %v3591_v48 = vsel %vm2419_vm7, %v3590_v56, 0.0 }
0x1324   :  { %4371 = vmatmul.mubr.msk.f32.vlgmr.msra.gmra.mrb[12].mxu0 %vm768_vm1, %v3582_v9 }
0x1325   :  { %2415 = vrot.lane.b32.xlu0 %v4825_v40, %s4887_s26  ;;  %4375 = vmatprep.mubr.msk.f32.mxu0 %vm4879_vm0, %v4880_v42 }
0x138f   :  { %v3715_v43 = vpop.permute.xlu0 %3714 }
0x1390   :  { %v3717_v46 = vmul.f32 %v3715_v43, %v3702_v41  ;;  %4374 = vmatpush3.xpose.msk.msra.mxu0 %vm768_vm1, %v3715_v43 }
0x1392   :  { %v3718_v59 = vsel %vm2419_vm7, %v3717_v46, 0.0 }
0x1393   :  { %4376 = vmatmul.mubr.msk.f32.vlgmr.msra.gmra.mrb[14].mxu0 %vm768_vm1, %v3702_v41  ;;  %v2457_v30 = vpop.permute.xlu0 %2456 }
0x1394   :  { %v2459_v21 = vsub.f32 %v6133_v35, %v2457_v30 }
0x1396   :  { %v2460_v19 = vmul.f32 %v2459_v21, %v2459_v21 }
0x1397   :  { %v2416_v22 = vpop.permute.xlu0 %2415 }
0x1398   :  { %v2418_v17 = vmul.f32 %v2416_v22, %v2410_v12 }
0x139a   :  { %v2420_v34 = vsel %vm2419_vm7, %v2418_v17, 0.0 }
0x13b3   :  { %v3545_v47 = vpop.f32.mrb[40].mxu1 }
0x13b4   :  { %v3547_v49 = vpop.f32.mrb[41].mxu1  ;;  %v3550_v50 = vsel %vm3549_vm8, %v3545_v47, -inf }
0x13b5   :  { %3551 = vmax.xlane.f32.xlu1 %v3550_v50 }
0x13f7   :  { %v3666_v36 = vpop.f32.mrb[12].mxu0 }
0x13f8   :  { %v4372_v42 = vpop.f32.mrb[13].mxu0  ;;  %v3670_v53 = vsel %vm3549_vm8, %v3666_v36, -inf }
0x13f9   :  { %3671 = vmax.xlane.f32.xlu1 %v3670_v53 }
0x1442   :  { %v3552_v18 = vpop.xlane.xlu1 %3551 }
0x1443   :  { %v3553_v6 = vsub.f32 %v3545_v47, %v3552_v18 }
0x1445   :  { %v3554_v54 = vmul.f32 1.442695, %v3553_v6 }
0x1447   :  { %4828 = vpow2.f32 %v3554_v54 }
0x1451   :  { %v4829_v55 = vpop.eup %4828 }
0x1452   :  { %v3556_v57 = vsel %vm3549_vm8, %v4829_v55, 0.0 }
0x1453   :  { %3557 = vadd.xlane.f32.xlu0 %v3556_v57 }
0x1457   :  { %3307 = vadd.xlane.f32.xlu0 %v3306_v32  ;;  %v2461_v32 = vsub.f32 0.0, %v2460_v19 }
0x1459   :  { %v2462_v20 = vmul.f32 0.5, %v2461_v32 }
0x145b   :  { %3719 = vadd.xlane.f32.xlu0 %v3718_v59  ;;  %v2463_v33 = vmul.f32 %v2462_v20, %v2416_v22 }
0x1466   :  { %v3792_v61 = vpop.f32.mrb[14].mxu0 }
0x1467   :  { %v4377_v0 = vpop.f32.mrb[15].mxu0  ;;  %v3796_v62 = vsel %vm3549_vm8, %v3792_v61, -inf }
0x1468   :  { %3797 = vmax.xlane.f32.xlu1 %v3796_v62 }
0x1479   :  { %2432 = vrot.lane.b32.xlu1 %v6082_v58, %s4883_s25 }
0x1486   :  { %v3672_v28 = vpop.xlane.xlu1 %3671 }
0x1487   :  { %v3673_v63 = vsub.f32 %v3666_v36, %v3672_v28 }
0x1489   :  { %v3674_v5 = vmul.f32 1.442695, %v3673_v63 }
0x148b   :  { %4830 = vpow2.f32 %v3674_v5 }
0x1495   :  { %v4831_v14 = vpop.eup %4830 }
0x1496   :  { %v3676_v15 = vsel %vm3549_vm8, %v4831_v14, 0.0 }
0x149d   :  { %3677 = vadd.xlane.f32.xlu1 %v3676_v15 }
0x14a1   :  { %3592 = vadd.xlane.f32.xlu1 %v3591_v48 }
0x14e0   :  { %v3558_v13 = vpop.xlane.xlu0 %3557 }
0x14e4   :  { %v3308_v60 = vpop.xlane.xlu0 %3307 }
0x14e8   :  { %v3720_v26 = vpop.xlane.xlu0 %3719 }
0x14f5   :  { %v3798_v7 = vpop.xlane.xlu1 %3797 }
0x14f6   :  { %v3799_v51 = vsub.f32 %v3792_v61, %v3798_v7 }
0x14f8   :  { %v3800_v16 = vmul.f32 1.442695, %v3799_v51 }
0x14f9   :  { %v2433_v24 = vpop.permute.xlu1 %2432 }
0x14fa   :  { %4832 = vpow2.f32 %v3800_v16  ;;  %v2435_v25 = vsub.f32 %v6133_v35, %v2433_v24 }
0x14fb   :  { %4834 = vlog2.f32 %v3558_v13 }
0x14fc   :  { %v2436_v58 = vmul.f32 %v2435_v25, %v2435_v25 }
0x14fe   :  { %v2437_v11 = vsub.f32 0.0, %v2436_v58 }
0x1500   :  { %v2438_v45 = vmul.f32 0.5, %v2437_v11 }
0x1502   :  { %v2439_v29 = vmul.f32 %v2438_v45, %v2416_v22 }
0x1504   :  { %v4833_v31 = vpop.eup %4832  ;;  %2441 = vrot.lane.b32.xlu1 %v2439_v29, %s4881_s4 }
0x1505   :  { %v3802_v3 = vsel %vm3549_vm8, %v4833_v31, 0.0  ;;  %v4835_v8 = vpop.eup %4834 }
0x1506   :  { %3803 = vadd.xlane.f32.xlu0 %v3802_v3  ;;  %v3560_v38 = vmul.f32 0.6931472, %v4835_v8 }
0x1508   :  { %v3561_v39 = vadd.f32 %v3560_v38, %v3552_v18 }
0x150a   :  { %v3562_v35 = vsub.f32 %v3308_v60, %v3561_v39 }
0x150c   :  { %v3564_v56 = vsel %vm3563_vm9, %v3562_v35, 0.0 }
0x151c   :  { %2465 = vrot.lane.b32.xlu0 %v2463_v33, %s4885_s5 }
0x1528   :  { %2421 = vadd.xlane.f32.xlu1 %v2420_v34 }
0x152a   :  { %v3678_v44 = vpop.xlane.xlu1 %3677 }
0x152b   :  { %4836 = vlog2.f32 %v3678_v44 }
0x152e   :  { %v3593_v10 = vpop.xlane.xlu1 %3592 }
0x1535   :  { %v4837_v40 = vpop.eup %4836 }
0x1536   :  { %v3680_v1 = vmul.f32 0.6931472, %v4837_v40 }
0x1538   :  { %v3681_v41 = vadd.f32 %v3680_v1, %v3672_v28 }
0x153a   :  { %v3682_v46 = vsub.f32 %v3593_v10, %v3681_v41 }
0x153c   :  { %v3683_v49 = vsel %vm3563_vm9, %v3682_v46, 0.0 }
0x1576   :  { %v2442_v4 = vpop.permute.xlu1 %2441 }
0x1577   :  { %v2444_v9 = vsel %vm2419_vm7, %v2442_v4, 0.0 }
0x1578   :  { %2445 = vadd.xlane.f32.xlu0 %v2444_v9 }
0x157c   :  { %3565 = vadd.xlane.f32.xlu0 %v3564_v56 }
0x1593   :  { %v3804_v37 = vpop.xlane.xlu0 %3803 }
0x1594   :  { %4838 = vlog2.f32 %v3804_v37 }
0x1597   :  { %v2466_v43 = vpop.permute.xlu0 %2465 }
0x1598   :  { %v2468_v47 = vsel %vm2419_vm7, %v2466_v43, 0.0 }
0x1599   :  { %2469 = vadd.xlane.f32.xlu1 %v2468_v47 }
0x159d   :  { %3684 = vadd.xlane.f32.xlu1 %v3683_v49 }
0x159e   :  { %v4839_v50 = vpop.eup %4838 }
0x159f   :  { %v3806_v36 = vmul.f32 0.6931472, %v4839_v50 }
0x15a1   :  { %v3807_v42 = vadd.f32 %v3806_v36, %v3798_v7 }
0x15a3   :  { %v3808_v53 = vsub.f32 %v3720_v26, %v3807_v42 }
0x15a5   :  { %v3809_v18 = vsel %vm3563_vm9, %v3808_v53, 0.0 }
0x15a6   :  { %3810 = vadd.xlane.f32.xlu0 %v3809_v18 }
0x15ae   :  { %3825 = vrot.lane.b32.xlu1 %v5996_v27, %s4881_s4  ;;  %s3841_s4 = sshll.u32 %s4888_s13, 4  ;;  %s3842_s4 = int_to_ptr.vmem [resolvable:$true] %s3841_s4 }
0x15af   :  { %s4840_s25 = scalar_lea.vmem %s3842_s4, 32  ;;  %p4845_p1 = scmp.lt.s32.totalorder %s3842_s4, %s3842_s4 }
0x15b0   :  { %p4841_p0 = scmp.ne.s32.totalorder %s3842_s4, %s4840_s25  ;;  %p4846_p2 = scmp.lt.s32.totalorder %s4840_s25, %s4840_s25 }
0x15b2   :  { %p4847_p3 = por %p4846_p2, %p4845_p1 }
0x15b4   :  { %p4848_p4 = pnand %p4847_p3, %p4841_p0 }
0x15b5   :  { %v2422_v6 = vpop.xlane.xlu1 %2421 }
0x15b6   :  { %v2423_v54 = vrot.slane %v2422_v6, 4 }
0x15b8   :  { %v2424_v55 = vadd.f32 %v2423_v54, %v2422_v6 }
0x15ba   :  { %v2425_v57 = vrot.slane %v2424_v55, 2 }
0x15bc   :  { %v2426_v59 = vadd.f32 %v2425_v57, %v2424_v55 }
0x15be   :  { %v2427_v61 = vrot.slane %v2426_v59, 1 }
0x15c0   :  { %v2428_v0 = vadd.f32 %v2427_v61, %v2426_v59 }
0x15c2   :  { %4458 = vpush %v2428_v0 }
0x1605   :  { %v2446_v62 = vpop.xlane.xlu0 %2445 }
0x1606   :  { %v2447_v28 = vrot.slane %v2446_v62, 4 }
0x1608   :  { %v2448_v63 = vadd.f32 %v2447_v28, %v2446_v62 }
0x1609   :  { %v3566_v7 = vpop.xlane.xlu0 %3565 }
0x160a   :  { %v2449_v5 = vrot.slane %v2448_v63, 2  ;;  %v3567_v51 = vrot.slane %v3566_v7, 4 }
0x160c   :  { %v2450_v14 = vadd.f32 %v2449_v5, %v2448_v63  ;;  %v3568_v16 = vadd.f32 %v3567_v51, %v3566_v7 }
0x160e   :  { %v2451_v15 = vrot.slane %v2450_v14, 1  ;;  %v3569_v27 = vrot.slane %v3568_v16, 2 }
0x1610   :  { %v2452_v48 = vadd.f32 %v2451_v15, %v2450_v14  ;;  %v3570_v11 = vadd.f32 %v3569_v27, %v3568_v16 }
0x1612   :  { %4460 = vpush %v2452_v48  ;;  %v3571_v21 = vrot.slane %v3570_v11, 1 }
0x1626   :  { %v2470_v24 = vpop.xlane.xlu1 %2469 }
0x1627   :  { %v2471_v25 = vrot.slane %v2470_v24, 4 }
0x1629   :  { %v2472_v30 = vadd.f32 %v2471_v25, %v2470_v24 }
0x162a   :  { %v3685_v58 = vpop.xlane.xlu1 %3684 }
0x162b   :  { %v2473_v45 = vrot.slane %v2472_v30, 2  ;;  %v3686_v22 = vrot.slane %v3685_v58, 4 }
0x162d   :  { %v3687_v29 = vadd.f32 %v3686_v22, %v3685_v58  ;;  %v2474_v31 = vadd.f32 %v2473_v45, %v2472_v30 }
0x162e   :  { %v3826_v3 = vpop.permute.xlu1 %3825 }
0x162f   :  { %v3688_v19 = vrot.slane %v3687_v29, 2  ;;  %v3829_v32 = vsel %vm3828_vm10, %v3826_v3, 0.0  ;;  %v2475_v2 = vrot.slane %v2474_v31, 1 }
0x1630   :  { %3830 = vst [vmem:[#allocation2] sm:$0x3] %v3829_v32 }
0x1631   :  { %v2476_v20 = vadd.f32 %v2475_v2, %v2474_v31  ;;  %v3689_v23 = vadd.f32 %v3688_v19, %v3687_v29 }
0x1632   :  { %4851 = shalt.err (!%p4848_p4)
}
0x1633   :  { %s4852_s9 = scalar_lea.hbm %s6208_s18, 32 }
0x1634   :  { %p4853_p5 = scmp.ne.s32.totalorder %s6208_s18, %s4852_s9  ;;  %p4856_p6 = scmp.lt.u32.totalorder %s4852_s9, %s6208_s18 }
0x1636   :  { %p4858_p7 = pnand %p4856_p6, %p4853_p5 }
0x1638   :  { %4861 = shalt.err (!%p4858_p7)
}
0x1639   :  { %3844 = dma.vmem_to_hbm [thread:$0]  %s3842_s4, 32, %s6208_s18, [#allocation3]   ;;  %v3572_v33 = vadd.f32 %v3571_v21, %v3570_v11  ;;  %4462 = vpush %v2476_v20  ;;  %v3811_v52 = vpop.xlane.xlu0 %3810  ;;  %v3690_v12 = vrot.slane %v3689_v23, 1 }
0x163a   :  { %v3812_v17 = vrot.slane %v3811_v52, 4  ;;  %s4459_s8 = spop %4458  ;;  %s3851_s5 = sshll.u32 %s6209_s19, 4  ;;  %s3852_s5 = int_to_ptr.vmem [resolvable:$true] %s3851_s5 }
0x163b   :  { %4464 = vpush %v3572_v33  ;;  %v3691_v34 = vadd.f32 %v3690_v12, %v3689_v23  ;;  %s2430_s3 = smul.f32 0.5, %s4459_s8  ;;  %s4862_s12 = scalar_lea.vmem %s3852_s5, 16 }
0x163c   :  { %v3813_v13 = vadd.f32 %v3812_v17, %v3811_v52  ;;  %p4863_p9 = scmp.ne.s32.totalorder %s3852_s5, %s4862_s12  ;;  %p4867_p10 = scmp.lt.s32.totalorder %s3852_s5, %s3852_s5 }
0x163d   :  { %4466 = vpush %v3691_v34  ;;  %p4868_p11 = scmp.lt.s32.totalorder %s4862_s12, %s4862_s12 }
0x163e   :  { %v3814_v8 = vrot.slane %v3813_v13, 2 }
0x163f   :  { %p4869_p12 = por %p4868_p11, %p4867_p10 }
0x1640   :  { %v3815_v44 = vadd.f32 %v3814_v8, %v3813_v13 }
0x1641   :  { %p4870_p13 = pnand %p4869_p12, %p4863_p9 }
0x1642   :  { %v3816_v38 = vrot.slane %v3815_v44, 1 }
0x1643   :  { %s4461_s20 = spop %4460 }
0x1644   :  { %v3817_v10 = vadd.f32 %v3816_v38, %v3815_v44  ;;  %s2454_s10 = smul.f32 0.5, %s4461_s20 }
0x1646   :  { %4468 = vpush %v3817_v10  ;;  %s2455_s18 = sadd.f32 %s2454_s10, %s2430_s3 }
0x166a   :  { %s4463_s15 = spop %4462 }
0x166b   :  { %s2478_s27 = smul.f32 0.5, %s4463_s15 }
0x166c   :  { %s4465_s29 = spop %4464 }
0x166d   :  { %s2479_s28 = sadd.f32 %s2478_s27, %s2455_s18 }
0x166e   :  { %s4467_s0 = spop %4466  ;;  %s3574_s16 = ssub.f32 0.0, %s4465_s29 }
0x166f   :  { %3832 = sst [smem:[#allocation5]] %s2479_s28 }
0x1670   :  { %s3693_s14 = ssub.f32 0.0, %s4467_s0  ;;  %s3575_s17 = smul.f32 0.5, %s3574_s16 }
0x1672   :  { %s3694_s30 = smul.f32 0.5, %s3693_s14 }
0x1674   :  { %s3695_s7 = sadd.f32 %s3694_s30, %s3575_s17 }
0x1677   :  { %s4469_s26 = spop %4468 }
0x1678   :  { %s3819_s21 = ssub.f32 0.0, %s4469_s26 }
0x167a   :  { %s3820_s1 = smul.f32 0.5, %s3819_s21 }
0x167c   :  { %s3821_s13 = sadd.f32 %s3820_s1, %s3695_s7 }
0x167e   :  { %p3822_p8 = scmp.ne.f32.partialorder %s3821_s13, %s3821_s13 }
0x1680   :  { %s6223_s13 = smov (%p3822_p8, %s3821_s13), 0.0 }
0x1681   :  { %3834 = sst [smem:[#allocation5 + $0x1]] %s6223_s13 }
0x1682   :  { %4873 = shalt.err (!%p4870_p13)
}
0x1683   :  { %s4889_s9 = smov [#allocation5]  }
0x1684   :  { %3854 = dma.smem_to_vmem %s4889_s9, 16, %s3852_s5, [#allocation4]  }
0x1685   :  { %4874 = dma.done.wait [#allocation3], 32  }
0x1686   :  { %4875 = vsyncadd [#allocation3], 4294967264 }
0x1687   :  { %4876 = dma.done.wait [#allocation4], 16  }
0x1688   :  { %4877 = vsyncadd [#allocation4], 4294967280 }
0x1689   :  { %3861 = sfence }
0x168a   :  { %3862 = vsyncpa [#allocation3], 1 }
0x168b   :  { %3863 = vsyncpa [#allocation4], 1 }

</bundles_post_ra>
